<compile_context>
chip_gen: v6e
topology: v6e:2x2x1
jax: 0.10.0
libtpu: 0.0.40
codegen_flags: <defaults>
</compile_context>

<pallas_src>
import jax
import jax.numpy as jnp
from jax.experimental import pallas as pl
from jax.experimental.pallas import tpu as pltpu

# ----------------------------- config -------------------------------------
B = 2
PATCH = 16
IMG = 32            # 32x32 image, 3 channels
IN_CHANS = 3
A_T = 32            # audio time steps
A_F = 32            # audio mel bins
D = 64              # embed_dim
NUM_HEADS = 4
HEAD_DIM = D // NUM_HEADS
MLP_RATIO = 4
DH = D * MLP_RATIO                      # 256
DEPTH_MS = 2                            # modality-specific blocks
DEPTH_U = 1                             # unified blocks
L_ALL = 2 * DEPTH_MS + DEPTH_U          # stacked layers: [a0,a1,v0,v1,u0]
LABEL_DIM = 10
LN_EPS = 1e-5

NP_A = (A_F // PATCH) * (A_T // PATCH)  # 4 audio patches
NP_V = (IMG // PATCH) * (IMG // PATCH)  # 4 visual patches
BN_A = B * NP_A                         # 8 audio rows   (batch folded into rows)
BN_V = B * NP_V                         # 8 visual rows
BN_U = BN_A + BN_V                      # 16 unified rows
A_PIX = 1 * PATCH * PATCH               # 256
V_PIX = IN_CHANS * PATCH * PATCH        # 768
PE_IN = A_PIX + V_PIX                   # 1024 (block-diag patch-embed contraction)
HEAD_PAD = 128                          # lane-dense head output width
NEG_INF = -1e9
ATT_SCALE = HEAD_DIM ** -0.5


# --------------------------- in-kernel helpers ------------------------------
def _layernorm(x, w, b):
    mu = jnp.mean(x, axis=-1, keepdims=True)
    var = jnp.mean(jnp.square(x - mu), axis=-1, keepdims=True)
    return (x - mu) * jax.lax.rsqrt(var + LN_EPS) * w + b


def _softmax(x, approx=True):
    m = jnp.max(x, axis=-1, keepdims=True)
    e = jnp.exp(x - m)
    s = jnp.sum(e, axis=-1, keepdims=True)
    if approx:
        return e * pl.reciprocal(s, approx=True)
    return e / s


def _gelu(x):
    # TODO(synk): torch nn.GELU() default is exact-erf GELU; tanh approximation
    # used here (no guaranteed erf lowering in Mosaic).
    return jax.nn.gelu(x, approximate=True)


# ------------------------------ fused kernel --------------------------------
def model_kernel(patches_ref, pe_w_ref, add_ref, qkvw_ref, projw_ref,
                 fc1w_ref, fc2w_ref, bias_ref, aux_ref, haux_ref,
                 head_w_ref, o_ref):
    # --- patch embed: one block-diagonal matmul covers BOTH modalities ------
    x0 = jnp.dot(patches_ref[...], pe_w_ref[...],
                 preferred_element_type=jnp.float32) + add_ref[...]

    # --- host-precomputed block-diagonal masks / mean-pool matrix -----------
    mask_a = aux_ref[0, :BN_A, :BN_A]
    mask_v = aux_ref[1, :BN_V, :BN_V]
    mask_u = aux_ref[2]
    pool = aux_ref[3, :B, :]

    def blk(x, mask, l):
        """One transformer block on flattened (rows, D) f32 activations."""
        bias = bias_ref[l]                          # (8, DH) f32, lane-aligned rows
        n1w, n1b = bias[0, :D], bias[1, :D]
        n2w, n2b = bias[2, :D], bias[3, :D]
        projb, fc2b = bias[4, :D], bias[5, :D]
        qkvb = bias[6, :3 * D]
        fc1b = bias[7, :]

        # ---- attention: fused QKV matmul, per-head scores, fused out-proj ----
        h = _layernorm(x, n1w, n1b)
        qkv = jnp.dot(h.astype(jnp.bfloat16), qkvw_ref[l],
                      preferred_element_type=jnp.float32) + qkvb
        qkv = qkv.astype(jnp.bfloat16)              # single cast, (n, 3D)
        ovs = []
        for hh in range(NUM_HEADS):
            lo = hh * HEAD_DIM
            qh = qkv[:, lo:lo + HEAD_DIM]
            kh = qkv[:, D + lo:D + lo + HEAD_DIM]
            vh = qkv[:, 2 * D + lo:2 * D + lo + HEAD_DIM]
            att = jax.lax.dot_general(
                qh, kh, (((1,), (1,)), ((), ())),
                preferred_element_type=jnp.float32) * ATT_SCALE + mask
            att = _softmax(att, approx=True)
            ovs.append(jnp.dot(att.astype(jnp.bfloat16), vh,
                               preferred_element_type=jnp.float32))
        ov = jnp.concatenate(ovs, axis=-1)          # (n, D) f32
        proj = jnp.dot(ov.astype(jnp.bfloat16), projw_ref[l],
                       preferred_element_type=jnp.float32) + projb
        x = x + proj

        # ---- MLP ----
        h2 = _layernorm(x, n2w, n2b)
        h2 = jnp.dot(h2.astype(jnp.bfloat16), fc1w_ref[l],
                     preferred_element_type=jnp.float32) + fc1b
        h2 = _gelu(h2)
        h2 = jnp.dot(h2.astype(jnp.bfloat16), fc2w_ref[l],
                     preferred_element_type=jnp.float32) + fc2b
        return x + h2

    # --- modality-specific stacks, then unified stack ------------------------
    # TODO(synk): at real CAVMAE scale (D=768, 11+11+1 blocks) turn the layer
    # index into a pipelined grid axis (stream weights layer-by-layer) and run
    # the independent a/v stacks on the two v7x TensorCores; weights are fully
    # resident here only because the toy config fits easily in VMEM.
    a_x = x0[:BN_A]
    v_x = x0[BN_A:]
    for l in range(DEPTH_MS):
        a_x = blk(a_x, mask_a, l)
    for l in range(DEPTH_MS):
        v_x = blk(v_x, mask_v, DEPTH_MS + l)
    x = jnp.concatenate([a_x, v_x], axis=0)         # (BN_U, D)
    for l in range(DEPTH_U):
        x = blk(x, mask_u, 2 * DEPTH_MS + l)

    # --- head: norm -> per-sample mean -> LN -> linear -> softmax -----------
    norm_w, norm_b = haux_ref[0, :D], haux_ref[1, :D]
    hln_w, hln_b = haux_ref[2, :D], haux_ref[3, :D]
    head_b = haux_ref[4, :]                         # pad columns carry -1e9
    xh = _layernorm(x, norm_w, norm_b)
    pooled = jnp.dot(pool, xh, preferred_element_type=jnp.float32)   # (B, D)
    pooled = _layernorm(pooled, hln_w, hln_b)
    logits = jnp.dot(pooled.astype(jnp.bfloat16), head_w_ref[...],
                     preferred_element_type=jnp.float32) + head_b
    o_ref[...] = _softmax(logits, approx=False)


# --------------------------- parameter handling ------------------------------
def init_block_params(key):
    ks = jax.random.split(key, 4)
    s = 0.02
    return dict(
        n1w=jnp.ones((D,), jnp.float32), n1b=jnp.zeros((D,), jnp.float32),
        qkvw=s * jax.random.normal(ks[0], (D, 3 * D), jnp.float32),
        qkvb=jnp.zeros((3 * D,), jnp.float32),
        projw=s * jax.random.normal(ks[1], (D, D), jnp.float32),
        projb=jnp.zeros((D,), jnp.float32),
        n2w=jnp.ones((D,), jnp.float32), n2b=jnp.zeros((D,), jnp.float32),
        fc1w=s * jax.random.normal(ks[2], (D, DH), jnp.float32),
        fc1b=jnp.zeros((DH,), jnp.float32),
        fc2w=s * jax.random.normal(ks[3], (DH, D), jnp.float32),
        fc2b=jnp.zeros((D,), jnp.float32),
    )


def init_params(key):
    keys = jax.random.split(key, 8)
    s = 0.02
    params = dict(
        pe_a_w=s * jax.random.normal(keys[0], (A_PIX, D), jnp.float32),
        pe_a_b=jnp.zeros((D,), jnp.float32),
        pe_v_w=s * jax.random.normal(keys[1], (V_PIX, D), jnp.float32),
        pe_v_b=jnp.zeros((D,), jnp.float32),
        # TODO(synk): reference uses 2D sin-cos positional init; random normal here.
        pos_a=s * jax.random.normal(keys[2], (NP_A, D), jnp.float32),
        pos_v=s * jax.random.normal(keys[3], (NP_V, D), jnp.float32),
        mod_a=s * jax.random.normal(keys[4], (D,), jnp.float32),
        mod_v=s * jax.random.normal(keys[5], (D,), jnp.float32),
        norm_w=jnp.ones((D,), jnp.float32), norm_b=jnp.zeros((D,), jnp.float32),
        head_ln_w=jnp.ones((D,), jnp.float32), head_ln_b=jnp.zeros((D,), jnp.float32),
        head_w=s * jax.random.normal(keys[6], (D, LABEL_DIM), jnp.float32),
        head_b=jnp.zeros((LABEL_DIM,), jnp.float32),
    )
    bkeys = jax.random.split(keys[7], L_ALL)
    params['blocks_a'] = [init_block_params(bkeys[i]) for i in range(DEPTH_MS)]
    params['blocks_v'] = [init_block_params(bkeys[DEPTH_MS + i]) for i in range(DEPTH_MS)]
    params['blocks_u'] = [init_block_params(bkeys[2 * DEPTH_MS + i]) for i in range(DEPTH_U)]
    return params


def pack_params(params):
    blocks = params['blocks_a'] + params['blocks_v'] + params['blocks_u']

    def pack_bias(b):
        # each small param on its own sublane row, starting at lane 0
        r = jnp.zeros((8, DH), jnp.float32)
        r = r.at[0, :D].set(b['n1w']).at[1, :D].set(b['n1b'])
        r = r.at[2, :D].set(b['n2w']).at[3, :D].set(b['n2b'])
        r = r.at[4, :D].set(b['projb']).at[5, :D].set(b['fc2b'])
        r = r.at[6, :3 * D].set(b['qkvb']).at[7, :].set(b['fc1b'])
        return r

    # pos + modality + conv-bias additive term; rows = [audio | visual]
    add_a = jnp.tile(params['pos_a'], (B, 1)) + params['pe_a_b'] + params['mod_a']
    add_v = jnp.tile(params['pos_v'], (B, 1)) + params['pe_v_b'] + params['mod_v']

    # host-precomputed block-diagonal masks (separate audio/visual masks, so
    # NP_A != NP_V stays correct) + per-sample mean-pool matrix.
    bid_a = jnp.repeat(jnp.arange(B), NP_A)
    bid_v = jnp.repeat(jnp.arange(B), NP_V)
    bid_u = jnp.concatenate([bid_a, bid_v])

    def bd_mask(bid):
        return jnp.where(bid[:, None] == bid[None, :], 0.0, NEG_INF).astype(jnp.float32)

    pool = (bid_u[None, :] == jnp.arange(B)[:, None]).astype(jnp.float32) / (NP_A + NP_V)
    aux = jnp.zeros((4, BN_U, BN_U), jnp.float32)
    aux = aux.at[0, :BN_A, :BN_A].set(bd_mask(bid_a))
    aux = aux.at[1, :BN_V, :BN_V].set(bd_mask(bid_v))
    aux = aux.at[2].set(bd_mask(bid_u))
    aux = aux.at[3, :B, :].set(pool)

    haux = jnp.zeros((5, HEAD_PAD), jnp.float32)
    haux = haux.at[0, :D].set(params['norm_w']).at[1, :D].set(params['norm_b'])
    haux = haux.at[2, :D].set(params['head_ln_w']).at[3, :D].set(params['head_ln_b'])
    haux = haux.at[4].set(jnp.full((HEAD_PAD,), NEG_INF, jnp.float32)
                          .at[:LABEL_DIM].set(params['head_b']))

    head_w = jnp.zeros((D, HEAD_PAD), jnp.float32).at[:, :LABEL_DIM].set(params['head_w'])

    return dict(
        pe_w=jnp.concatenate([params['pe_a_w'], params['pe_v_w']],
                             axis=0).astype(jnp.bfloat16),                   # (PE_IN, D)
        add=jnp.concatenate([add_a, add_v], axis=0).astype(jnp.float32),     # (BN_U, D)
        qkvw=jnp.stack([b['qkvw'] for b in blocks]).astype(jnp.bfloat16),    # (L, D, 3D)
        projw=jnp.stack([b['projw'] for b in blocks]).astype(jnp.bfloat16),  # (L, D, D)
        fc1w=jnp.stack([b['fc1w'] for b in blocks]).astype(jnp.bfloat16),    # (L, D, DH)
        fc2w=jnp.stack([b['fc2w'] for b in blocks]).astype(jnp.bfloat16),    # (L, DH, D)
        bias=jnp.stack([pack_bias(b) for b in blocks]),                      # (L, 8, DH)
        aux=aux,                                                             # (4, 16, 16)
        haux=haux,                                                           # (5, 128)
        head_w=head_w.astype(jnp.bfloat16),                                  # (D, 128)
    )


# ------------------------------- JAX glue ------------------------------------
def extract_patches(x, p):
    # x: NCHW -> (B, num_patches, C*p*p); matches Conv2d(stride=patch) + flatten
    Bn, C, H, W = x.shape
    x = x.reshape(Bn, C, H // p, p, W // p, p)
    x = x.transpose(0, 2, 4, 1, 3, 5)
    return x.reshape(Bn, (H // p) * (W // p), C * p * p)


def _full_spec(x):
    nd = x.ndim
    return pl.BlockSpec(x.shape, lambda i, _n=nd: (0,) * _n)


@jax.jit
def cavmae_ft_multimodal(a, v, packed):
    # a: (B, T, F) audio spectrogram; v: (B, 3, H, W) image (NCHW)
    a4 = jnp.transpose(a[:, None, :, :], (0, 1, 3, 2))            # (B, 1, F, T)
    ap = extract_patches(a4, PATCH).reshape(BN_A, A_PIX)
    vp = extract_patches(v, PATCH).reshape(BN_V, V_PIX)
    # block-diagonal pixel layout so ONE matmul does both patch embeds
    patches = jnp.zeros((BN_U, PE_IN), jnp.float32)
    patches = patches.at[:BN_A, :A_PIX].set(ap)
    patches = patches.at[BN_A:, A_PIX:].set(vp)
    patches = patches.astype(jnp.bfloat16)

    args = (patches, packed['pe_w'], packed['add'],
            packed['qkvw'], packed['projw'], packed['fc1w'], packed['fc2w'],
            packed['bias'], packed['aux'], packed['haux'], packed['head_w'])

    probs = pl.pallas_call(
        model_kernel,
        out_shape=jax.ShapeDtypeStruct((B, HEAD_PAD), jnp.float32),
        grid=(1,),
        in_specs=[_full_spec(x) for x in args],
        out_specs=pl.BlockSpec((B, HEAD_PAD), lambda i: (0, 0)),
        compiler_params=pltpu.CompilerParams(
            dimension_semantics=("arbitrary",),
            vmem_limit_bytes=32 * 1024 * 1024),
    )(*args)
    return probs[:, :LABEL_DIM]


if __name__ == "__main__":
    key = jax.random.PRNGKey(0)
    ka, kv, kp = jax.random.split(key, 3)
    a = jax.random.normal(ka, (B, A_T, A_F), jnp.float32)             # audio
    v = jax.random.normal(kv, (B, IN_CHANS, IMG, IMG), jnp.float32)   # video frame
    packed = pack_params(init_params(kp))

    out = jax.block_until_ready(cavmae_ft_multimodal(a, v, packed))

    assert out.shape == (B, LABEL_DIM), out.shape
    assert bool(jnp.all(jnp.isfinite(out)))
    # softmax rows sum to 1
    assert bool(jnp.allclose(jnp.sum(out, axis=-1), 1.0, atol=1e-4))
    print("KERNEL_OK")
</pallas_src>

<mosaic_0001>
module attributes {stable_mosaic.version = 11 : i64} {
  func.func @model_kernel(%arg0: i32, %arg1: memref<16x1024xbf16, #tpu.memory_space<vmem>>, %arg2: memref<1024x64xbf16, #tpu.memory_space<vmem>>, %arg3: memref<16x64xf32, #tpu.memory_space<vmem>>, %arg4: memref<5x64x192xbf16, #tpu.memory_space<vmem>>, %arg5: memref<5x64x64xbf16, #tpu.memory_space<vmem>>, %arg6: memref<5x64x256xbf16, #tpu.memory_space<vmem>>, %arg7: memref<5x256x64xbf16, #tpu.memory_space<vmem>>, %arg8: memref<5x8x256xf32, #tpu.memory_space<vmem>>, %arg9: memref<4x16x16xf32, #tpu.memory_space<vmem>>, %arg10: memref<5x128xf32, #tpu.memory_space<vmem>>, %arg11: memref<64x128xbf16, #tpu.memory_space<vmem>>, %arg12: memref<2x128xf32, #tpu.memory_space<vmem>>) attributes {dimension_semantics = [#tpu.dimension_semantics<arbitrary>], iteration_bounds = array<i64: 1>, scalar_prefetch = 0 : i64, scratch_operands = 0 : i64, tpu.core_type = #tpu.core_type<tc>, window_params = [{pipeline_mode = #tpu.pipeline_mode<synchronous>, transform_indices = @transform_0, window_bounds = array<i64: 16, 1024>}, {pipeline_mode = #tpu.pipeline_mode<synchronous>, transform_indices = @transform_1, window_bounds = array<i64: 1024, 64>}, {pipeline_mode = #tpu.pipeline_mode<synchronous>, transform_indices = @transform_2, window_bounds = array<i64: 16, 64>}, {pipeline_mode = #tpu.pipeline_mode<synchronous>, transform_indices = @transform_3, window_bounds = array<i64: 5, 64, 192>}, {pipeline_mode = #tpu.pipeline_mode<synchronous>, transform_indices = @transform_4, window_bounds = array<i64: 5, 64, 64>}, {pipeline_mode = #tpu.pipeline_mode<synchronous>, transform_indices = @transform_5, window_bounds = array<i64: 5, 64, 256>}, {pipeline_mode = #tpu.pipeline_mode<synchronous>, transform_indices = @transform_6, window_bounds = array<i64: 5, 256, 64>}, {pipeline_mode = #tpu.pipeline_mode<synchronous>, transform_indices = @transform_7, window_bounds = array<i64: 5, 8, 256>}, {pipeline_mode = #tpu.pipeline_mode<synchronous>, transform_indices = @transform_8, window_bounds = array<i64: 4, 16, 16>}, {pipeline_mode = #tpu.pipeline_mode<synchronous>, transform_indices = @transform_9, window_bounds = array<i64: 5, 128>}, {pipeline_mode = #tpu.pipeline_mode<synchronous>, transform_indices = @transform_10, window_bounds = array<i64: 64, 128>}, {pipeline_mode = #tpu.pipeline_mode<synchronous>, transform_indices = @transform_11, window_bounds = array<i64: 2, 128>}]} {
    %c0 = arith.constant 0 : index
    %c0_0 = arith.constant 0 : index
    %0 = vector.load %arg1[%c0, %c0_0] : memref<16x1024xbf16, #tpu.memory_space<vmem>>, vector<16x1024xbf16>
    %c0_1 = arith.constant 0 : index
    %c0_2 = arith.constant 0 : index
    %1 = vector.load %arg2[%c0_1, %c0_2] : memref<1024x64xbf16, #tpu.memory_space<vmem>>, vector<1024x64xbf16>
    %cst = arith.constant dense<0.000000e+00> : vector<16x64xf32>
    %2 = tpu.matmul %0, %1, %cst {dimension_numbers = #tpu.dot_dimension_numbers<[1], [0], [0], [1], [0, 0, 1, 1], [], []>} : vector<16x1024xbf16>, vector<1024x64xbf16>, vector<16x64xf32> -> vector<16x64xf32>
    %c0_3 = arith.constant 0 : index
    %c0_4 = arith.constant 0 : index
    %3 = vector.load %arg3[%c0_3, %c0_4] : memref<16x64xf32, #tpu.memory_space<vmem>>, vector<16x64xf32>
    %4 = arith.addf %2, %3 : vector<16x64xf32>
    %c0_5 = arith.constant 0 : index
    %c0_6 = arith.constant 0 : index
    %c0_7 = arith.constant 0 : index
    %5 = vector.load %arg9[%c0_5, %c0_6, %c0_7] : memref<4x16x16xf32, #tpu.memory_space<vmem>>, vector<1x8x8xf32>
    %6 = vector.shape_cast %5 : vector<1x8x8xf32> to vector<8x8xf32>
    %c1 = arith.constant 1 : index
    %c0_8 = arith.constant 0 : index
    %c0_9 = arith.constant 0 : index
    %7 = vector.load %arg9[%c1, %c0_8, %c0_9] : memref<4x16x16xf32, #tpu.memory_space<vmem>>, vector<1x8x8xf32>
    %8 = vector.shape_cast %7 : vector<1x8x8xf32> to vector<8x8xf32>
    %c2 = arith.constant 2 : index
    %c0_10 = arith.constant 0 : index
    %c0_11 = arith.constant 0 : index
    %9 = vector.load %arg9[%c2, %c0_10, %c0_11] : memref<4x16x16xf32, #tpu.memory_space<vmem>>, vector<1x16x16xf32>
    %10 = vector.shape_cast %9 : vector<1x16x16xf32> to vector<16x16xf32>
    %c3 = arith.constant 3 : index
    %c0_12 = arith.constant 0 : index
    %c0_13 = arith.constant 0 : index
    %11 = vector.load %arg9[%c3, %c0_12, %c0_13] : memref<4x16x16xf32, #tpu.memory_space<vmem>>, vector<1x2x16xf32>
    %12 = vector.shape_cast %11 : vector<1x2x16xf32> to vector<2x16xf32>
    %13 = vector.extract_strided_slice %4 {offsets = [0, 0], sizes = [8, 64], strides = [1, 1]} : vector<16x64xf32> to vector<8x64xf32>
    %14 = vector.extract_strided_slice %4 {offsets = [8, 0], sizes = [8, 64], strides = [1, 1]} : vector<16x64xf32> to vector<8x64xf32>
    %c0_14 = arith.constant 0 : index
    %c0_15 = arith.constant 0 : index
    %c0_16 = arith.constant 0 : index
    %15 = vector.load %arg8[%c0_14, %c0_15, %c0_16] : memref<5x8x256xf32, #tpu.memory_space<vmem>>, vector<1x8x256xf32>
    %16 = vector.shape_cast %15 : vector<1x8x256xf32> to vector<8x256xf32>
    %17 = vector.extract_strided_slice %16 {offsets = [0, 0], sizes = [1, 64], strides = [1, 1]} : vector<8x256xf32> to vector<1x64xf32>
    %18 = vector.shape_cast %17 : vector<1x64xf32> to vector<64xf32>
    %19 = vector.extract_strided_slice %16 {offsets = [1, 0], sizes = [1, 64], strides = [1, 1]} : vector<8x256xf32> to vector<1x64xf32>
    %20 = vector.shape_cast %19 : vector<1x64xf32> to vector<64xf32>
    %21 = vector.extract_strided_slice %16 {offsets = [2, 0], sizes = [1, 64], strides = [1, 1]} : vector<8x256xf32> to vector<1x64xf32>
    %22 = vector.shape_cast %21 : vector<1x64xf32> to vector<64xf32>
    %23 = vector.extract_strided_slice %16 {offsets = [3, 0], sizes = [1, 64], strides = [1, 1]} : vector<8x256xf32> to vector<1x64xf32>
    %24 = vector.shape_cast %23 : vector<1x64xf32> to vector<64xf32>
    %25 = vector.extract_strided_slice %16 {offsets = [4, 0], sizes = [1, 64], strides = [1, 1]} : vector<8x256xf32> to vector<1x64xf32>
    %26 = vector.shape_cast %25 : vector<1x64xf32> to vector<64xf32>
    %27 = vector.extract_strided_slice %16 {offsets = [5, 0], sizes = [1, 64], strides = [1, 1]} : vector<8x256xf32> to vector<1x64xf32>
    %28 = vector.shape_cast %27 : vector<1x64xf32> to vector<64xf32>
    %29 = vector.extract_strided_slice %16 {offsets = [6, 0], sizes = [1, 192], strides = [1, 1]} : vector<8x256xf32> to vector<1x192xf32>
    %30 = vector.shape_cast %29 : vector<1x192xf32> to vector<192xf32>
    %31 = vector.extract_strided_slice %16 {offsets = [7, 0], sizes = [1, 256], strides = [1, 1]} : vector<8x256xf32> to vector<1x256xf32>
    %32 = vector.shape_cast %31 : vector<1x256xf32> to vector<256xf32>
    %cst_17 = arith.constant dense<0.000000e+00> : vector<8xf32>
    %33 = vector.multi_reduction <add>, %13, %cst_17 [1] : vector<8x64xf32> to vector<8xf32>
    %34 = vector.shape_cast %33 : vector<8xf32> to vector<8x1xf32>
    %cst_18 = arith.constant 6.400000e+01 : f32
    %35 = vector.broadcast %cst_18 : f32 to vector<8x1xf32>
    %36 = arith.divf %34, %35 : vector<8x1xf32>
    %37 = vector.broadcast %36 : vector<8x1xf32> to vector<8x64xf32>
    %38 = arith.subf %13, %37 : vector<8x64xf32>
    %39 = arith.mulf %38, %38 : vector<8x64xf32>
    %cst_19 = arith.constant dense<0.000000e+00> : vector<8xf32>
    %40 = vector.multi_reduction <add>, %39, %cst_19 [1] : vector<8x64xf32> to vector<8xf32>
    %41 = vector.shape_cast %40 : vector<8xf32> to vector<8x1xf32>
    %cst_20 = arith.constant 6.400000e+01 : f32
    %42 = vector.broadcast %cst_20 : f32 to vector<8x1xf32>
    %43 = arith.divf %41, %42 : vector<8x1xf32>
    %44 = vector.broadcast %36 : vector<8x1xf32> to vector<8x64xf32>
    %45 = arith.subf %13, %44 : vector<8x64xf32>
    %cst_21 = arith.constant 9.99999974E-6 : f32
    %46 = vector.broadcast %cst_21 : f32 to vector<8x1xf32>
    %47 = arith.addf %43, %46 : vector<8x1xf32>
    %48 = math.rsqrt %47 : vector<8x1xf32>
    %49 = vector.broadcast %48 : vector<8x1xf32> to vector<8x64xf32>
    %50 = arith.mulf %45, %49 : vector<8x64xf32>
    %51 = vector.shape_cast %18 : vector<64xf32> to vector<1x64xf32>
    %52 = vector.broadcast %51 : vector<1x64xf32> to vector<8x64xf32>
    %53 = arith.mulf %50, %52 : vector<8x64xf32>
    %54 = vector.shape_cast %20 : vector<64xf32> to vector<1x64xf32>
    %55 = vector.broadcast %54 : vector<1x64xf32> to vector<8x64xf32>
    %56 = arith.addf %53, %55 : vector<8x64xf32>
    %57 = arith.truncf %56 : vector<8x64xf32> to vector<8x64xbf16>
    %c0_22 = arith.constant 0 : index
    %c0_23 = arith.constant 0 : index
    %c0_24 = arith.constant 0 : index
    %58 = vector.load %arg4[%c0_22, %c0_23, %c0_24] : memref<5x64x192xbf16, #tpu.memory_space<vmem>>, vector<1x64x192xbf16>
    %59 = vector.shape_cast %58 : vector<1x64x192xbf16> to vector<64x192xbf16>
    %cst_25 = arith.constant dense<0.000000e+00> : vector<8x192xf32>
    %60 = tpu.matmul %57, %59, %cst_25 {dimension_numbers = #tpu.dot_dimension_numbers<[1], [0], [0], [1], [0, 0, 1, 1], [], []>} : vector<8x64xbf16>, vector<64x192xbf16>, vector<8x192xf32> -> vector<8x192xf32>
    %61 = vector.shape_cast %30 : vector<192xf32> to vector<1x192xf32>
    %62 = vector.broadcast %61 : vector<1x192xf32> to vector<8x192xf32>
    %63 = arith.addf %60, %62 : vector<8x192xf32>
    %64 = arith.truncf %63 : vector<8x192xf32> to vector<8x192xbf16>
    %65 = vector.extract_strided_slice %64 {offsets = [0, 0], sizes = [8, 16], strides = [1, 1]} : vector<8x192xbf16> to vector<8x16xbf16>
    %66 = vector.extract_strided_slice %64 {offsets = [0, 64], sizes = [8, 16], strides = [1, 1]} : vector<8x192xbf16> to vector<8x16xbf16>
    %67 = vector.extract_strided_slice %64 {offsets = [0, 128], sizes = [8, 16], strides = [1, 1]} : vector<8x192xbf16> to vector<8x16xbf16>
    %cst_26 = arith.constant dense<0.000000e+00> : vector<8x8xf32>
    %68 = tpu.matmul %65, %66, %cst_26 {dimension_numbers = #tpu.dot_dimension_numbers<[1], [1], [0], [0], [0, 0, 1, 0], [], []>} : vector<8x16xbf16>, vector<8x16xbf16>, vector<8x8xf32> -> vector<8x8xf32>
    %cst_27 = arith.constant 2.500000e-01 : f32
    %69 = vector.broadcast %cst_27 : f32 to vector<8x8xf32>
    %70 = arith.mulf %68, %69 : vector<8x8xf32>
    %71 = arith.addf %70, %6 : vector<8x8xf32>
    %cst_28 = arith.constant dense<0xFF800000> : vector<8xf32>
    %72 = vector.multi_reduction <maximumf>, %71, %cst_28 [1] : vector<8x8xf32> to vector<8xf32>
    %73 = vector.shape_cast %72 : vector<8xf32> to vector<8x1xf32>
    %74 = vector.broadcast %73 : vector<8x1xf32> to vector<8x8xf32>
    %75 = arith.subf %71, %74 : vector<8x8xf32>
    %76 = math.exp %75 : vector<8x8xf32>
    %cst_29 = arith.constant dense<0.000000e+00> : vector<8xf32>
    %77 = vector.multi_reduction <add>, %76, %cst_29 [1] : vector<8x8xf32> to vector<8xf32>
    %78 = vector.shape_cast %77 : vector<8xf32> to vector<8x1xf32>
    %79 = tpu.reciprocal %78 {approx = true} : vector<8x1xf32> -> vector<8x1xf32>
    %80 = vector.broadcast %79 : vector<8x1xf32> to vector<8x8xf32>
    %81 = arith.mulf %76, %80 : vector<8x8xf32>
    %82 = arith.truncf %81 : vector<8x8xf32> to vector<8x8xbf16>
    %cst_30 = arith.constant dense<0.000000e+00> : vector<8x16xf32>
    %83 = tpu.matmul %82, %67, %cst_30 {dimension_numbers = #tpu.dot_dimension_numbers<[1], [0], [0], [1], [0, 0, 1, 1], [], []>} : vector<8x8xbf16>, vector<8x16xbf16>, vector<8x16xf32> -> vector<8x16xf32>
    %84 = vector.extract_strided_slice %64 {offsets = [0, 16], sizes = [8, 16], strides = [1, 1]} : vector<8x192xbf16> to vector<8x16xbf16>
    %85 = vector.extract_strided_slice %64 {offsets = [0, 80], sizes = [8, 16], strides = [1, 1]} : vector<8x192xbf16> to vector<8x16xbf16>
    %86 = vector.extract_strided_slice %64 {offsets = [0, 144], sizes = [8, 16], strides = [1, 1]} : vector<8x192xbf16> to vector<8x16xbf16>
    %cst_31 = arith.constant dense<0.000000e+00> : vector<8x8xf32>
    %87 = tpu.matmul %84, %85, %cst_31 {dimension_numbers = #tpu.dot_dimension_numbers<[1], [1], [0], [0], [0, 0, 1, 0], [], []>} : vector<8x16xbf16>, vector<8x16xbf16>, vector<8x8xf32> -> vector<8x8xf32>
    %cst_32 = arith.constant 2.500000e-01 : f32
    %88 = vector.broadcast %cst_32 : f32 to vector<8x8xf32>
    %89 = arith.mulf %87, %88 : vector<8x8xf32>
    %90 = arith.addf %89, %6 : vector<8x8xf32>
    %cst_33 = arith.constant dense<0xFF800000> : vector<8xf32>
    %91 = vector.multi_reduction <maximumf>, %90, %cst_33 [1] : vector<8x8xf32> to vector<8xf32>
    %92 = vector.shape_cast %91 : vector<8xf32> to vector<8x1xf32>
    %93 = vector.broadcast %92 : vector<8x1xf32> to vector<8x8xf32>
    %94 = arith.subf %90, %93 : vector<8x8xf32>
    %95 = math.exp %94 : vector<8x8xf32>
    %cst_34 = arith.constant dense<0.000000e+00> : vector<8xf32>
    %96 = vector.multi_reduction <add>, %95, %cst_34 [1] : vector<8x8xf32> to vector<8xf32>
    %97 = vector.shape_cast %96 : vector<8xf32> to vector<8x1xf32>
    %98 = tpu.reciprocal %97 {approx = true} : vector<8x1xf32> -> vector<8x1xf32>
    %99 = vector.broadcast %98 : vector<8x1xf32> to vector<8x8xf32>
    %100 = arith.mulf %95, %99 : vector<8x8xf32>
    %101 = arith.truncf %100 : vector<8x8xf32> to vector<8x8xbf16>
    %cst_35 = arith.constant dense<0.000000e+00> : vector<8x16xf32>
    %102 = tpu.matmul %101, %86, %cst_35 {dimension_numbers = #tpu.dot_dimension_numbers<[1], [0], [0], [1], [0, 0, 1, 1], [], []>} : vector<8x8xbf16>, vector<8x16xbf16>, vector<8x16xf32> -> vector<8x16xf32>
    %103 = vector.extract_strided_slice %64 {offsets = [0, 32], sizes = [8, 16], strides = [1, 1]} : vector<8x192xbf16> to vector<8x16xbf16>
    %104 = vector.extract_strided_slice %64 {offsets = [0, 96], sizes = [8, 16], strides = [1, 1]} : vector<8x192xbf16> to vector<8x16xbf16>
    %105 = vector.extract_strided_slice %64 {offsets = [0, 160], sizes = [8, 16], strides = [1, 1]} : vector<8x192xbf16> to vector<8x16xbf16>
    %cst_36 = arith.constant dense<0.000000e+00> : vector<8x8xf32>
    %106 = tpu.matmul %103, %104, %cst_36 {dimension_numbers = #tpu.dot_dimension_numbers<[1], [1], [0], [0], [0, 0, 1, 0], [], []>} : vector<8x16xbf16>, vector<8x16xbf16>, vector<8x8xf32> -> vector<8x8xf32>
    %cst_37 = arith.constant 2.500000e-01 : f32
    %107 = vector.broadcast %cst_37 : f32 to vector<8x8xf32>
    %108 = arith.mulf %106, %107 : vector<8x8xf32>
    %109 = arith.addf %108, %6 : vector<8x8xf32>
    %cst_38 = arith.constant dense<0xFF800000> : vector<8xf32>
    %110 = vector.multi_reduction <maximumf>, %109, %cst_38 [1] : vector<8x8xf32> to vector<8xf32>
    %111 = vector.shape_cast %110 : vector<8xf32> to vector<8x1xf32>
    %112 = vector.broadcast %111 : vector<8x1xf32> to vector<8x8xf32>
    %113 = arith.subf %109, %112 : vector<8x8xf32>
    %114 = math.exp %113 : vector<8x8xf32>
    %cst_39 = arith.constant dense<0.000000e+00> : vector<8xf32>
    %115 = vector.multi_reduction <add>, %114, %cst_39 [1] : vector<8x8xf32> to vector<8xf32>
    %116 = vector.shape_cast %115 : vector<8xf32> to vector<8x1xf32>
    %117 = tpu.reciprocal %116 {approx = true} : vector<8x1xf32> -> vector<8x1xf32>
    %118 = vector.broadcast %117 : vector<8x1xf32> to vector<8x8xf32>
    %119 = arith.mulf %114, %118 : vector<8x8xf32>
    %120 = arith.truncf %119 : vector<8x8xf32> to vector<8x8xbf16>
    %cst_40 = arith.constant dense<0.000000e+00> : vector<8x16xf32>
    %121 = tpu.matmul %120, %105, %cst_40 {dimension_numbers = #tpu.dot_dimension_numbers<[1], [0], [0], [1], [0, 0, 1, 1], [], []>} : vector<8x8xbf16>, vector<8x16xbf16>, vector<8x16xf32> -> vector<8x16xf32>
    %122 = vector.extract_strided_slice %64 {offsets = [0, 48], sizes = [8, 16], strides = [1, 1]} : vector<8x192xbf16> to vector<8x16xbf16>
    %123 = vector.extract_strided_slice %64 {offsets = [0, 112], sizes = [8, 16], strides = [1, 1]} : vector<8x192xbf16> to vector<8x16xbf16>
    %124 = vector.extract_strided_slice %64 {offsets = [0, 176], sizes = [8, 16], strides = [1, 1]} : vector<8x192xbf16> to vector<8x16xbf16>
    %cst_41 = arith.constant dense<0.000000e+00> : vector<8x8xf32>
    %125 = tpu.matmul %122, %123, %cst_41 {dimension_numbers = #tpu.dot_dimension_numbers<[1], [1], [0], [0], [0, 0, 1, 0], [], []>} : vector<8x16xbf16>, vector<8x16xbf16>, vector<8x8xf32> -> vector<8x8xf32>
    %cst_42 = arith.constant 2.500000e-01 : f32
    %126 = vector.broadcast %cst_42 : f32 to vector<8x8xf32>
    %127 = arith.mulf %125, %126 : vector<8x8xf32>
    %128 = arith.addf %127, %6 : vector<8x8xf32>
    %cst_43 = arith.constant dense<0xFF800000> : vector<8xf32>
    %129 = vector.multi_reduction <maximumf>, %128, %cst_43 [1] : vector<8x8xf32> to vector<8xf32>
    %130 = vector.shape_cast %129 : vector<8xf32> to vector<8x1xf32>
    %131 = vector.broadcast %130 : vector<8x1xf32> to vector<8x8xf32>
    %132 = arith.subf %128, %131 : vector<8x8xf32>
    %133 = math.exp %132 : vector<8x8xf32>
    %cst_44 = arith.constant dense<0.000000e+00> : vector<8xf32>
    %134 = vector.multi_reduction <add>, %133, %cst_44 [1] : vector<8x8xf32> to vector<8xf32>
    %135 = vector.shape_cast %134 : vector<8xf32> to vector<8x1xf32>
    %136 = tpu.reciprocal %135 {approx = true} : vector<8x1xf32> -> vector<8x1xf32>
    %137 = vector.broadcast %136 : vector<8x1xf32> to vector<8x8xf32>
    %138 = arith.mulf %133, %137 : vector<8x8xf32>
    %139 = arith.truncf %138 : vector<8x8xf32> to vector<8x8xbf16>
    %cst_45 = arith.constant dense<0.000000e+00> : vector<8x16xf32>
    %140 = tpu.matmul %139, %124, %cst_45 {dimension_numbers = #tpu.dot_dimension_numbers<[1], [0], [0], [1], [0, 0, 1, 1], [], []>} : vector<8x8xbf16>, vector<8x16xbf16>, vector<8x16xf32> -> vector<8x16xf32>
    %141 = tpu.concatenate %83, %102, %121, %140 in 1 : vector<8x16xf32>, vector<8x16xf32>, vector<8x16xf32>, vector<8x16xf32> -> vector<8x64xf32>
    %142 = arith.truncf %141 : vector<8x64xf32> to vector<8x64xbf16>
    %c0_46 = arith.constant 0 : index
    %c0_47 = arith.constant 0 : index
    %c0_48 = arith.constant 0 : index
    %143 = vector.load %arg5[%c0_46, %c0_47, %c0_48] : memref<5x64x64xbf16, #tpu.memory_space<vmem>>, vector<1x64x64xbf16>
    %144 = vector.shape_cast %143 : vector<1x64x64xbf16> to vector<64x64xbf16>
    %cst_49 = arith.constant dense<0.000000e+00> : vector<8x64xf32>
    %145 = tpu.matmul %142, %144, %cst_49 {dimension_numbers = #tpu.dot_dimension_numbers<[1], [0], [0], [1], [0, 0, 1, 1], [], []>} : vector<8x64xbf16>, vector<64x64xbf16>, vector<8x64xf32> -> vector<8x64xf32>
    %146 = vector.shape_cast %26 : vector<64xf32> to vector<1x64xf32>
    %147 = vector.broadcast %146 : vector<1x64xf32> to vector<8x64xf32>
    %148 = arith.addf %145, %147 : vector<8x64xf32>
    %149 = arith.addf %13, %148 : vector<8x64xf32>
    %cst_50 = arith.constant dense<0.000000e+00> : vector<8xf32>
    %150 = vector.multi_reduction <add>, %149, %cst_50 [1] : vector<8x64xf32> to vector<8xf32>
    %151 = vector.shape_cast %150 : vector<8xf32> to vector<8x1xf32>
    %cst_51 = arith.constant 6.400000e+01 : f32
    %152 = vector.broadcast %cst_51 : f32 to vector<8x1xf32>
    %153 = arith.divf %151, %152 : vector<8x1xf32>
    %154 = vector.broadcast %153 : vector<8x1xf32> to vector<8x64xf32>
    %155 = arith.subf %149, %154 : vector<8x64xf32>
    %156 = arith.mulf %155, %155 : vector<8x64xf32>
    %cst_52 = arith.constant dense<0.000000e+00> : vector<8xf32>
    %157 = vector.multi_reduction <add>, %156, %cst_52 [1] : vector<8x64xf32> to vector<8xf32>
    %158 = vector.shape_cast %157 : vector<8xf32> to vector<8x1xf32>
    %cst_53 = arith.constant 6.400000e+01 : f32
    %159 = vector.broadcast %cst_53 : f32 to vector<8x1xf32>
    %160 = arith.divf %158, %159 : vector<8x1xf32>
    %161 = vector.broadcast %153 : vector<8x1xf32> to vector<8x64xf32>
    %162 = arith.subf %149, %161 : vector<8x64xf32>
    %cst_54 = arith.constant 9.99999974E-6 : f32
    %163 = vector.broadcast %cst_54 : f32 to vector<8x1xf32>
    %164 = arith.addf %160, %163 : vector<8x1xf32>
    %165 = math.rsqrt %164 : vector<8x1xf32>
    %166 = vector.broadcast %165 : vector<8x1xf32> to vector<8x64xf32>
    %167 = arith.mulf %162, %166 : vector<8x64xf32>
    %168 = vector.shape_cast %22 : vector<64xf32> to vector<1x64xf32>
    %169 = vector.broadcast %168 : vector<1x64xf32> to vector<8x64xf32>
    %170 = arith.mulf %167, %169 : vector<8x64xf32>
    %171 = vector.shape_cast %24 : vector<64xf32> to vector<1x64xf32>
    %172 = vector.broadcast %171 : vector<1x64xf32> to vector<8x64xf32>
    %173 = arith.addf %170, %172 : vector<8x64xf32>
    %174 = arith.truncf %173 : vector<8x64xf32> to vector<8x64xbf16>
    %c0_55 = arith.constant 0 : index
    %c0_56 = arith.constant 0 : index
    %c0_57 = arith.constant 0 : index
    %175 = vector.load %arg6[%c0_55, %c0_56, %c0_57] : memref<5x64x256xbf16, #tpu.memory_space<vmem>>, vector<1x64x256xbf16>
    %176 = vector.shape_cast %175 : vector<1x64x256xbf16> to vector<64x256xbf16>
    %cst_58 = arith.constant dense<0.000000e+00> : vector<8x256xf32>
    %177 = tpu.matmul %174, %176, %cst_58 {dimension_numbers = #tpu.dot_dimension_numbers<[1], [0], [0], [1], [0, 0, 1, 1], [], []>} : vector<8x64xbf16>, vector<64x256xbf16>, vector<8x256xf32> -> vector<8x256xf32>
    %178 = vector.shape_cast %32 : vector<256xf32> to vector<1x256xf32>
    %179 = vector.broadcast %178 : vector<1x256xf32> to vector<8x256xf32>
    %180 = arith.addf %177, %179 : vector<8x256xf32>
    %181 = arith.mulf %180, %180 : vector<8x256xf32>
    %182 = arith.mulf %180, %181 : vector<8x256xf32>
    %cst_59 = arith.constant 4.471500e-02 : f32
    %183 = vector.broadcast %cst_59 : f32 to vector<8x256xf32>
    %184 = arith.mulf %183, %182 : vector<8x256xf32>
    %185 = arith.addf %180, %184 : vector<8x256xf32>
    %cst_60 = arith.constant 0.797884583 : f32
    %186 = vector.broadcast %cst_60 : f32 to vector<8x256xf32>
    %187 = arith.mulf %186, %185 : vector<8x256xf32>
    %188 = math.tanh %187 : vector<8x256xf32>
    %cst_61 = arith.constant 1.000000e+00 : f32
    %189 = vector.broadcast %cst_61 : f32 to vector<8x256xf32>
    %190 = arith.addf %189, %188 : vector<8x256xf32>
    %cst_62 = arith.constant 5.000000e-01 : f32
    %191 = vector.broadcast %cst_62 : f32 to vector<8x256xf32>
    %192 = arith.mulf %191, %190 : vector<8x256xf32>
    %193 = arith.mulf %180, %192 : vector<8x256xf32>
    %194 = arith.truncf %193 : vector<8x256xf32> to vector<8x256xbf16>
    %c0_63 = arith.constant 0 : index
    %c0_64 = arith.constant 0 : index
    %c0_65 = arith.constant 0 : index
    %195 = vector.load %arg7[%c0_63, %c0_64, %c0_65] : memref<5x256x64xbf16, #tpu.memory_space<vmem>>, vector<1x256x64xbf16>
    %196 = vector.shape_cast %195 : vector<1x256x64xbf16> to vector<256x64xbf16>
    %cst_66 = arith.constant dense<0.000000e+00> : vector<8x64xf32>
    %197 = tpu.matmul %194, %196, %cst_66 {dimension_numbers = #tpu.dot_dimension_numbers<[1], [0], [0], [1], [0, 0, 1, 1], [], []>} : vector<8x256xbf16>, vector<256x64xbf16>, vector<8x64xf32> -> vector<8x64xf32>
    %198 = vector.shape_cast %28 : vector<64xf32> to vector<1x64xf32>
    %199 = vector.broadcast %198 : vector<1x64xf32> to vector<8x64xf32>
    %200 = arith.addf %197, %199 : vector<8x64xf32>
    %201 = arith.addf %149, %200 : vector<8x64xf32>
    %c1_67 = arith.constant 1 : index
    %c0_68 = arith.constant 0 : index
    %c0_69 = arith.constant 0 : index
    %202 = vector.load %arg8[%c1_67, %c0_68, %c0_69] : memref<5x8x256xf32, #tpu.memory_space<vmem>>, vector<1x8x256xf32>
    %203 = vector.shape_cast %202 : vector<1x8x256xf32> to vector<8x256xf32>
    %204 = vector.extract_strided_slice %203 {offsets = [0, 0], sizes = [1, 64], strides = [1, 1]} : vector<8x256xf32> to vector<1x64xf32>
    %205 = vector.shape_cast %204 : vector<1x64xf32> to vector<64xf32>
    %206 = vector.extract_strided_slice %203 {offsets = [1, 0], sizes = [1, 64], strides = [1, 1]} : vector<8x256xf32> to vector<1x64xf32>
    %207 = vector.shape_cast %206 : vector<1x64xf32> to vector<64xf32>
    %208 = vector.extract_strided_slice %203 {offsets = [2, 0], sizes = [1, 64], strides = [1, 1]} : vector<8x256xf32> to vector<1x64xf32>
    %209 = vector.shape_cast %208 : vector<1x64xf32> to vector<64xf32>
    %210 = vector.extract_strided_slice %203 {offsets = [3, 0], sizes = [1, 64], strides = [1, 1]} : vector<8x256xf32> to vector<1x64xf32>
    %211 = vector.shape_cast %210 : vector<1x64xf32> to vector<64xf32>
    %212 = vector.extract_strided_slice %203 {offsets = [4, 0], sizes = [1, 64], strides = [1, 1]} : vector<8x256xf32> to vector<1x64xf32>
    %213 = vector.shape_cast %212 : vector<1x64xf32> to vector<64xf32>
    %214 = vector.extract_strided_slice %203 {offsets = [5, 0], sizes = [1, 64], strides = [1, 1]} : vector<8x256xf32> to vector<1x64xf32>
    %215 = vector.shape_cast %214 : vector<1x64xf32> to vector<64xf32>
    %216 = vector.extract_strided_slice %203 {offsets = [6, 0], sizes = [1, 192], strides = [1, 1]} : vector<8x256xf32> to vector<1x192xf32>
    %217 = vector.shape_cast %216 : vector<1x192xf32> to vector<192xf32>
    %218 = vector.extract_strided_slice %203 {offsets = [7, 0], sizes = [1, 256], strides = [1, 1]} : vector<8x256xf32> to vector<1x256xf32>
    %219 = vector.shape_cast %218 : vector<1x256xf32> to vector<256xf32>
    %cst_70 = arith.constant dense<0.000000e+00> : vector<8xf32>
    %220 = vector.multi_reduction <add>, %201, %cst_70 [1] : vector<8x64xf32> to vector<8xf32>
    %221 = vector.shape_cast %220 : vector<8xf32> to vector<8x1xf32>
    %cst_71 = arith.constant 6.400000e+01 : f32
    %222 = vector.broadcast %cst_71 : f32 to vector<8x1xf32>
    %223 = arith.divf %221, %222 : vector<8x1xf32>
    %224 = vector.broadcast %223 : vector<8x1xf32> to vector<8x64xf32>
    %225 = arith.subf %201, %224 : vector<8x64xf32>
    %226 = arith.mulf %225, %225 : vector<8x64xf32>
    %cst_72 = arith.constant dense<0.000000e+00> : vector<8xf32>
    %227 = vector.multi_reduction <add>, %226, %cst_72 [1] : vector<8x64xf32> to vector<8xf32>
    %228 = vector.shape_cast %227 : vector<8xf32> to vector<8x1xf32>
    %cst_73 = arith.constant 6.400000e+01 : f32
    %229 = vector.broadcast %cst_73 : f32 to vector<8x1xf32>
    %230 = arith.divf %228, %229 : vector<8x1xf32>
    %231 = vector.broadcast %223 : vector<8x1xf32> to vector<8x64xf32>
    %232 = arith.subf %201, %231 : vector<8x64xf32>
    %cst_74 = arith.constant 9.99999974E-6 : f32
    %233 = vector.broadcast %cst_74 : f32 to vector<8x1xf32>
    %234 = arith.addf %230, %233 : vector<8x1xf32>
    %235 = math.rsqrt %234 : vector<8x1xf32>
    %236 = vector.broadcast %235 : vector<8x1xf32> to vector<8x64xf32>
    %237 = arith.mulf %232, %236 : vector<8x64xf32>
    %238 = vector.shape_cast %205 : vector<64xf32> to vector<1x64xf32>
    %239 = vector.broadcast %238 : vector<1x64xf32> to vector<8x64xf32>
    %240 = arith.mulf %237, %239 : vector<8x64xf32>
    %241 = vector.shape_cast %207 : vector<64xf32> to vector<1x64xf32>
    %242 = vector.broadcast %241 : vector<1x64xf32> to vector<8x64xf32>
    %243 = arith.addf %240, %242 : vector<8x64xf32>
    %244 = arith.truncf %243 : vector<8x64xf32> to vector<8x64xbf16>
    %c1_75 = arith.constant 1 : index
    %c0_76 = arith.constant 0 : index
    %c0_77 = arith.constant 0 : index
    %245 = vector.load %arg4[%c1_75, %c0_76, %c0_77] : memref<5x64x192xbf16, #tpu.memory_space<vmem>>, vector<1x64x192xbf16>
    %246 = vector.shape_cast %245 : vector<1x64x192xbf16> to vector<64x192xbf16>
    %cst_78 = arith.constant dense<0.000000e+00> : vector<8x192xf32>
    %247 = tpu.matmul %244, %246, %cst_78 {dimension_numbers = #tpu.dot_dimension_numbers<[1], [0], [0], [1], [0, 0, 1, 1], [], []>} : vector<8x64xbf16>, vector<64x192xbf16>, vector<8x192xf32> -> vector<8x192xf32>
    %248 = vector.shape_cast %217 : vector<192xf32> to vector<1x192xf32>
    %249 = vector.broadcast %248 : vector<1x192xf32> to vector<8x192xf32>
    %250 = arith.addf %247, %249 : vector<8x192xf32>
    %251 = arith.truncf %250 : vector<8x192xf32> to vector<8x192xbf16>
    %252 = vector.extract_strided_slice %251 {offsets = [0, 0], sizes = [8, 16], strides = [1, 1]} : vector<8x192xbf16> to vector<8x16xbf16>
    %253 = vector.extract_strided_slice %251 {offsets = [0, 64], sizes = [8, 16], strides = [1, 1]} : vector<8x192xbf16> to vector<8x16xbf16>
    %254 = vector.extract_strided_slice %251 {offsets = [0, 128], sizes = [8, 16], strides = [1, 1]} : vector<8x192xbf16> to vector<8x16xbf16>
    %cst_79 = arith.constant dense<0.000000e+00> : vector<8x8xf32>
    %255 = tpu.matmul %252, %253, %cst_79 {dimension_numbers = #tpu.dot_dimension_numbers<[1], [1], [0], [0], [0, 0, 1, 0], [], []>} : vector<8x16xbf16>, vector<8x16xbf16>, vector<8x8xf32> -> vector<8x8xf32>
    %cst_80 = arith.constant 2.500000e-01 : f32
    %256 = vector.broadcast %cst_80 : f32 to vector<8x8xf32>
    %257 = arith.mulf %255, %256 : vector<8x8xf32>
    %258 = arith.addf %257, %6 : vector<8x8xf32>
    %cst_81 = arith.constant dense<0xFF800000> : vector<8xf32>
    %259 = vector.multi_reduction <maximumf>, %258, %cst_81 [1] : vector<8x8xf32> to vector<8xf32>
    %260 = vector.shape_cast %259 : vector<8xf32> to vector<8x1xf32>
    %261 = vector.broadcast %260 : vector<8x1xf32> to vector<8x8xf32>
    %262 = arith.subf %258, %261 : vector<8x8xf32>
    %263 = math.exp %262 : vector<8x8xf32>
    %cst_82 = arith.constant dense<0.000000e+00> : vector<8xf32>
    %264 = vector.multi_reduction <add>, %263, %cst_82 [1] : vector<8x8xf32> to vector<8xf32>
    %265 = vector.shape_cast %264 : vector<8xf32> to vector<8x1xf32>
    %266 = tpu.reciprocal %265 {approx = true} : vector<8x1xf32> -> vector<8x1xf32>
    %267 = vector.broadcast %266 : vector<8x1xf32> to vector<8x8xf32>
    %268 = arith.mulf %263, %267 : vector<8x8xf32>
    %269 = arith.truncf %268 : vector<8x8xf32> to vector<8x8xbf16>
    %cst_83 = arith.constant dense<0.000000e+00> : vector<8x16xf32>
    %270 = tpu.matmul %269, %254, %cst_83 {dimension_numbers = #tpu.dot_dimension_numbers<[1], [0], [0], [1], [0, 0, 1, 1], [], []>} : vector<8x8xbf16>, vector<8x16xbf16>, vector<8x16xf32> -> vector<8x16xf32>
    %271 = vector.extract_strided_slice %251 {offsets = [0, 16], sizes = [8, 16], strides = [1, 1]} : vector<8x192xbf16> to vector<8x16xbf16>
    %272 = vector.extract_strided_slice %251 {offsets = [0, 80], sizes = [8, 16], strides = [1, 1]} : vector<8x192xbf16> to vector<8x16xbf16>
    %273 = vector.extract_strided_slice %251 {offsets = [0, 144], sizes = [8, 16], strides = [1, 1]} : vector<8x192xbf16> to vector<8x16xbf16>
    %cst_84 = arith.constant dense<0.000000e+00> : vector<8x8xf32>
    %274 = tpu.matmul %271, %272, %cst_84 {dimension_numbers = #tpu.dot_dimension_numbers<[1], [1], [0], [0], [0, 0, 1, 0], [], []>} : vector<8x16xbf16>, vector<8x16xbf16>, vector<8x8xf32> -> vector<8x8xf32>
    %cst_85 = arith.constant 2.500000e-01 : f32
    %275 = vector.broadcast %cst_85 : f32 to vector<8x8xf32>
    %276 = arith.mulf %274, %275 : vector<8x8xf32>
    %277 = arith.addf %276, %6 : vector<8x8xf32>
    %cst_86 = arith.constant dense<0xFF800000> : vector<8xf32>
    %278 = vector.multi_reduction <maximumf>, %277, %cst_86 [1] : vector<8x8xf32> to vector<8xf32>
    %279 = vector.shape_cast %278 : vector<8xf32> to vector<8x1xf32>
    %280 = vector.broadcast %279 : vector<8x1xf32> to vector<8x8xf32>
    %281 = arith.subf %277, %280 : vector<8x8xf32>
    %282 = math.exp %281 : vector<8x8xf32>
    %cst_87 = arith.constant dense<0.000000e+00> : vector<8xf32>
    %283 = vector.multi_reduction <add>, %282, %cst_87 [1] : vector<8x8xf32> to vector<8xf32>
    %284 = vector.shape_cast %283 : vector<8xf32> to vector<8x1xf32>
    %285 = tpu.reciprocal %284 {approx = true} : vector<8x1xf32> -> vector<8x1xf32>
    %286 = vector.broadcast %285 : vector<8x1xf32> to vector<8x8xf32>
    %287 = arith.mulf %282, %286 : vector<8x8xf32>
    %288 = arith.truncf %287 : vector<8x8xf32> to vector<8x8xbf16>
    %cst_88 = arith.constant dense<0.000000e+00> : vector<8x16xf32>
    %289 = tpu.matmul %288, %273, %cst_88 {dimension_numbers = #tpu.dot_dimension_numbers<[1], [0], [0], [1], [0, 0, 1, 1], [], []>} : vector<8x8xbf16>, vector<8x16xbf16>, vector<8x16xf32> -> vector<8x16xf32>
    %290 = vector.extract_strided_slice %251 {offsets = [0, 32], sizes = [8, 16], strides = [1, 1]} : vector<8x192xbf16> to vector<8x16xbf16>
    %291 = vector.extract_strided_slice %251 {offsets = [0, 96], sizes = [8, 16], strides = [1, 1]} : vector<8x192xbf16> to vector<8x16xbf16>
    %292 = vector.extract_strided_slice %251 {offsets = [0, 160], sizes = [8, 16], strides = [1, 1]} : vector<8x192xbf16> to vector<8x16xbf16>
    %cst_89 = arith.constant dense<0.000000e+00> : vector<8x8xf32>
    %293 = tpu.matmul %290, %291, %cst_89 {dimension_numbers = #tpu.dot_dimension_numbers<[1], [1], [0], [0], [0, 0, 1, 0], [], []>} : vector<8x16xbf16>, vector<8x16xbf16>, vector<8x8xf32> -> vector<8x8xf32>
    %cst_90 = arith.constant 2.500000e-01 : f32
    %294 = vector.broadcast %cst_90 : f32 to vector<8x8xf32>
    %295 = arith.mulf %293, %294 : vector<8x8xf32>
    %296 = arith.addf %295, %6 : vector<8x8xf32>
    %cst_91 = arith.constant dense<0xFF800000> : vector<8xf32>
    %297 = vector.multi_reduction <maximumf>, %296, %cst_91 [1] : vector<8x8xf32> to vector<8xf32>
    %298 = vector.shape_cast %297 : vector<8xf32> to vector<8x1xf32>
    %299 = vector.broadcast %298 : vector<8x1xf32> to vector<8x8xf32>
    %300 = arith.subf %296, %299 : vector<8x8xf32>
    %301 = math.exp %300 : vector<8x8xf32>
    %cst_92 = arith.constant dense<0.000000e+00> : vector<8xf32>
    %302 = vector.multi_reduction <add>, %301, %cst_92 [1] : vector<8x8xf32> to vector<8xf32>
    %303 = vector.shape_cast %302 : vector<8xf32> to vector<8x1xf32>
    %304 = tpu.reciprocal %303 {approx = true} : vector<8x1xf32> -> vector<8x1xf32>
    %305 = vector.broadcast %304 : vector<8x1xf32> to vector<8x8xf32>
    %306 = arith.mulf %301, %305 : vector<8x8xf32>
    %307 = arith.truncf %306 : vector<8x8xf32> to vector<8x8xbf16>
    %cst_93 = arith.constant dense<0.000000e+00> : vector<8x16xf32>
    %308 = tpu.matmul %307, %292, %cst_93 {dimension_numbers = #tpu.dot_dimension_numbers<[1], [0], [0], [1], [0, 0, 1, 1], [], []>} : vector<8x8xbf16>, vector<8x16xbf16>, vector<8x16xf32> -> vector<8x16xf32>
    %309 = vector.extract_strided_slice %251 {offsets = [0, 48], sizes = [8, 16], strides = [1, 1]} : vector<8x192xbf16> to vector<8x16xbf16>
    %310 = vector.extract_strided_slice %251 {offsets = [0, 112], sizes = [8, 16], strides = [1, 1]} : vector<8x192xbf16> to vector<8x16xbf16>
    %311 = vector.extract_strided_slice %251 {offsets = [0, 176], sizes = [8, 16], strides = [1, 1]} : vector<8x192xbf16> to vector<8x16xbf16>
    %cst_94 = arith.constant dense<0.000000e+00> : vector<8x8xf32>
    %312 = tpu.matmul %309, %310, %cst_94 {dimension_numbers = #tpu.dot_dimension_numbers<[1], [1], [0], [0], [0, 0, 1, 0], [], []>} : vector<8x16xbf16>, vector<8x16xbf16>, vector<8x8xf32> -> vector<8x8xf32>
    %cst_95 = arith.constant 2.500000e-01 : f32
    %313 = vector.broadcast %cst_95 : f32 to vector<8x8xf32>
    %314 = arith.mulf %312, %313 : vector<8x8xf32>
    %315 = arith.addf %314, %6 : vector<8x8xf32>
    %cst_96 = arith.constant dense<0xFF800000> : vector<8xf32>
    %316 = vector.multi_reduction <maximumf>, %315, %cst_96 [1] : vector<8x8xf32> to vector<8xf32>
    %317 = vector.shape_cast %316 : vector<8xf32> to vector<8x1xf32>
    %318 = vector.broadcast %317 : vector<8x1xf32> to vector<8x8xf32>
    %319 = arith.subf %315, %318 : vector<8x8xf32>
    %320 = math.exp %319 : vector<8x8xf32>
    %cst_97 = arith.constant dense<0.000000e+00> : vector<8xf32>
    %321 = vector.multi_reduction <add>, %320, %cst_97 [1] : vector<8x8xf32> to vector<8xf32>
    %322 = vector.shape_cast %321 : vector<8xf32> to vector<8x1xf32>
    %323 = tpu.reciprocal %322 {approx = true} : vector<8x1xf32> -> vector<8x1xf32>
    %324 = vector.broadcast %323 : vector<8x1xf32> to vector<8x8xf32>
    %325 = arith.mulf %320, %324 : vector<8x8xf32>
    %326 = arith.truncf %325 : vector<8x8xf32> to vector<8x8xbf16>
    %cst_98 = arith.constant dense<0.000000e+00> : vector<8x16xf32>
    %327 = tpu.matmul %326, %311, %cst_98 {dimension_numbers = #tpu.dot_dimension_numbers<[1], [0], [0], [1], [0, 0, 1, 1], [], []>} : vector<8x8xbf16>, vector<8x16xbf16>, vector<8x16xf32> -> vector<8x16xf32>
    %328 = tpu.concatenate %270, %289, %308, %327 in 1 : vector<8x16xf32>, vector<8x16xf32>, vector<8x16xf32>, vector<8x16xf32> -> vector<8x64xf32>
    %329 = arith.truncf %328 : vector<8x64xf32> to vector<8x64xbf16>
    %c1_99 = arith.constant 1 : index
    %c0_100 = arith.constant 0 : index
    %c0_101 = arith.constant 0 : index
    %330 = vector.load %arg5[%c1_99, %c0_100, %c0_101] : memref<5x64x64xbf16, #tpu.memory_space<vmem>>, vector<1x64x64xbf16>
    %331 = vector.shape_cast %330 : vector<1x64x64xbf16> to vector<64x64xbf16>
    %cst_102 = arith.constant dense<0.000000e+00> : vector<8x64xf32>
    %332 = tpu.matmul %329, %331, %cst_102 {dimension_numbers = #tpu.dot_dimension_numbers<[1], [0], [0], [1], [0, 0, 1, 1], [], []>} : vector<8x64xbf16>, vector<64x64xbf16>, vector<8x64xf32> -> vector<8x64xf32>
    %333 = vector.shape_cast %213 : vector<64xf32> to vector<1x64xf32>
    %334 = vector.broadcast %333 : vector<1x64xf32> to vector<8x64xf32>
    %335 = arith.addf %332, %334 : vector<8x64xf32>
    %336 = arith.addf %201, %335 : vector<8x64xf32>
    %cst_103 = arith.constant dense<0.000000e+00> : vector<8xf32>
    %337 = vector.multi_reduction <add>, %336, %cst_103 [1] : vector<8x64xf32> to vector<8xf32>
    %338 = vector.shape_cast %337 : vector<8xf32> to vector<8x1xf32>
    %cst_104 = arith.constant 6.400000e+01 : f32
    %339 = vector.broadcast %cst_104 : f32 to vector<8x1xf32>
    %340 = arith.divf %338, %339 : vector<8x1xf32>
    %341 = vector.broadcast %340 : vector<8x1xf32> to vector<8x64xf32>
    %342 = arith.subf %336, %341 : vector<8x64xf32>
    %343 = arith.mulf %342, %342 : vector<8x64xf32>
    %cst_105 = arith.constant dense<0.000000e+00> : vector<8xf32>
    %344 = vector.multi_reduction <add>, %343, %cst_105 [1] : vector<8x64xf32> to vector<8xf32>
    %345 = vector.shape_cast %344 : vector<8xf32> to vector<8x1xf32>
    %cst_106 = arith.constant 6.400000e+01 : f32
    %346 = vector.broadcast %cst_106 : f32 to vector<8x1xf32>
    %347 = arith.divf %345, %346 : vector<8x1xf32>
    %348 = vector.broadcast %340 : vector<8x1xf32> to vector<8x64xf32>
    %349 = arith.subf %336, %348 : vector<8x64xf32>
    %cst_107 = arith.constant 9.99999974E-6 : f32
    %350 = vector.broadcast %cst_107 : f32 to vector<8x1xf32>
    %351 = arith.addf %347, %350 : vector<8x1xf32>
    %352 = math.rsqrt %351 : vector<8x1xf32>
    %353 = vector.broadcast %352 : vector<8x1xf32> to vector<8x64xf32>
    %354 = arith.mulf %349, %353 : vector<8x64xf32>
    %355 = vector.shape_cast %209 : vector<64xf32> to vector<1x64xf32>
    %356 = vector.broadcast %355 : vector<1x64xf32> to vector<8x64xf32>
    %357 = arith.mulf %354, %356 : vector<8x64xf32>
    %358 = vector.shape_cast %211 : vector<64xf32> to vector<1x64xf32>
    %359 = vector.broadcast %358 : vector<1x64xf32> to vector<8x64xf32>
    %360 = arith.addf %357, %359 : vector<8x64xf32>
    %361 = arith.truncf %360 : vector<8x64xf32> to vector<8x64xbf16>
    %c1_108 = arith.constant 1 : index
    %c0_109 = arith.constant 0 : index
    %c0_110 = arith.constant 0 : index
    %362 = vector.load %arg6[%c1_108, %c0_109, %c0_110] : memref<5x64x256xbf16, #tpu.memory_space<vmem>>, vector<1x64x256xbf16>
    %363 = vector.shape_cast %362 : vector<1x64x256xbf16> to vector<64x256xbf16>
    %cst_111 = arith.constant dense<0.000000e+00> : vector<8x256xf32>
    %364 = tpu.matmul %361, %363, %cst_111 {dimension_numbers = #tpu.dot_dimension_numbers<[1], [0], [0], [1], [0, 0, 1, 1], [], []>} : vector<8x64xbf16>, vector<64x256xbf16>, vector<8x256xf32> -> vector<8x256xf32>
    %365 = vector.shape_cast %219 : vector<256xf32> to vector<1x256xf32>
    %366 = vector.broadcast %365 : vector<1x256xf32> to vector<8x256xf32>
    %367 = arith.addf %364, %366 : vector<8x256xf32>
    %368 = arith.mulf %367, %367 : vector<8x256xf32>
    %369 = arith.mulf %367, %368 : vector<8x256xf32>
    %cst_112 = arith.constant 4.471500e-02 : f32
    %370 = vector.broadcast %cst_112 : f32 to vector<8x256xf32>
    %371 = arith.mulf %370, %369 : vector<8x256xf32>
    %372 = arith.addf %367, %371 : vector<8x256xf32>
    %cst_113 = arith.constant 0.797884583 : f32
    %373 = vector.broadcast %cst_113 : f32 to vector<8x256xf32>
    %374 = arith.mulf %373, %372 : vector<8x256xf32>
    %375 = math.tanh %374 : vector<8x256xf32>
    %cst_114 = arith.constant 1.000000e+00 : f32
    %376 = vector.broadcast %cst_114 : f32 to vector<8x256xf32>
    %377 = arith.addf %376, %375 : vector<8x256xf32>
    %cst_115 = arith.constant 5.000000e-01 : f32
    %378 = vector.broadcast %cst_115 : f32 to vector<8x256xf32>
    %379 = arith.mulf %378, %377 : vector<8x256xf32>
    %380 = arith.mulf %367, %379 : vector<8x256xf32>
    %381 = arith.truncf %380 : vector<8x256xf32> to vector<8x256xbf16>
    %c1_116 = arith.constant 1 : index
    %c0_117 = arith.constant 0 : index
    %c0_118 = arith.constant 0 : index
    %382 = vector.load %arg7[%c1_116, %c0_117, %c0_118] : memref<5x256x64xbf16, #tpu.memory_space<vmem>>, vector<1x256x64xbf16>
    %383 = vector.shape_cast %382 : vector<1x256x64xbf16> to vector<256x64xbf16>
    %cst_119 = arith.constant dense<0.000000e+00> : vector<8x64xf32>
    %384 = tpu.matmul %381, %383, %cst_119 {dimension_numbers = #tpu.dot_dimension_numbers<[1], [0], [0], [1], [0, 0, 1, 1], [], []>} : vector<8x256xbf16>, vector<256x64xbf16>, vector<8x64xf32> -> vector<8x64xf32>
    %385 = vector.shape_cast %215 : vector<64xf32> to vector<1x64xf32>
    %386 = vector.broadcast %385 : vector<1x64xf32> to vector<8x64xf32>
    %387 = arith.addf %384, %386 : vector<8x64xf32>
    %388 = arith.addf %336, %387 : vector<8x64xf32>
    %c2_120 = arith.constant 2 : index
    %c0_121 = arith.constant 0 : index
    %c0_122 = arith.constant 0 : index
    %389 = vector.load %arg8[%c2_120, %c0_121, %c0_122] : memref<5x8x256xf32, #tpu.memory_space<vmem>>, vector<1x8x256xf32>
    %390 = vector.shape_cast %389 : vector<1x8x256xf32> to vector<8x256xf32>
    %391 = vector.extract_strided_slice %390 {offsets = [0, 0], sizes = [1, 64], strides = [1, 1]} : vector<8x256xf32> to vector<1x64xf32>
    %392 = vector.shape_cast %391 : vector<1x64xf32> to vector<64xf32>
    %393 = vector.extract_strided_slice %390 {offsets = [1, 0], sizes = [1, 64], strides = [1, 1]} : vector<8x256xf32> to vector<1x64xf32>
    %394 = vector.shape_cast %393 : vector<1x64xf32> to vector<64xf32>
    %395 = vector.extract_strided_slice %390 {offsets = [2, 0], sizes = [1, 64], strides = [1, 1]} : vector<8x256xf32> to vector<1x64xf32>
    %396 = vector.shape_cast %395 : vector<1x64xf32> to vector<64xf32>
    %397 = vector.extract_strided_slice %390 {offsets = [3, 0], sizes = [1, 64], strides = [1, 1]} : vector<8x256xf32> to vector<1x64xf32>
    %398 = vector.shape_cast %397 : vector<1x64xf32> to vector<64xf32>
    %399 = vector.extract_strided_slice %390 {offsets = [4, 0], sizes = [1, 64], strides = [1, 1]} : vector<8x256xf32> to vector<1x64xf32>
    %400 = vector.shape_cast %399 : vector<1x64xf32> to vector<64xf32>
    %401 = vector.extract_strided_slice %390 {offsets = [5, 0], sizes = [1, 64], strides = [1, 1]} : vector<8x256xf32> to vector<1x64xf32>
    %402 = vector.shape_cast %401 : vector<1x64xf32> to vector<64xf32>
    %403 = vector.extract_strided_slice %390 {offsets = [6, 0], sizes = [1, 192], strides = [1, 1]} : vector<8x256xf32> to vector<1x192xf32>
    %404 = vector.shape_cast %403 : vector<1x192xf32> to vector<192xf32>
    %405 = vector.extract_strided_slice %390 {offsets = [7, 0], sizes = [1, 256], strides = [1, 1]} : vector<8x256xf32> to vector<1x256xf32>
    %406 = vector.shape_cast %405 : vector<1x256xf32> to vector<256xf32>
    %cst_123 = arith.constant dense<0.000000e+00> : vector<8xf32>
    %407 = vector.multi_reduction <add>, %14, %cst_123 [1] : vector<8x64xf32> to vector<8xf32>
    %408 = vector.shape_cast %407 : vector<8xf32> to vector<8x1xf32>
    %cst_124 = arith.constant 6.400000e+01 : f32
    %409 = vector.broadcast %cst_124 : f32 to vector<8x1xf32>
    %410 = arith.divf %408, %409 : vector<8x1xf32>
    %411 = vector.broadcast %410 : vector<8x1xf32> to vector<8x64xf32>
    %412 = arith.subf %14, %411 : vector<8x64xf32>
    %413 = arith.mulf %412, %412 : vector<8x64xf32>
    %cst_125 = arith.constant dense<0.000000e+00> : vector<8xf32>
    %414 = vector.multi_reduction <add>, %413, %cst_125 [1] : vector<8x64xf32> to vector<8xf32>
    %415 = vector.shape_cast %414 : vector<8xf32> to vector<8x1xf32>
    %cst_126 = arith.constant 6.400000e+01 : f32
    %416 = vector.broadcast %cst_126 : f32 to vector<8x1xf32>
    %417 = arith.divf %415, %416 : vector<8x1xf32>
    %418 = vector.broadcast %410 : vector<8x1xf32> to vector<8x64xf32>
    %419 = arith.subf %14, %418 : vector<8x64xf32>
    %cst_127 = arith.constant 9.99999974E-6 : f32
    %420 = vector.broadcast %cst_127 : f32 to vector<8x1xf32>
    %421 = arith.addf %417, %420 : vector<8x1xf32>
    %422 = math.rsqrt %421 : vector<8x1xf32>
    %423 = vector.broadcast %422 : vector<8x1xf32> to vector<8x64xf32>
    %424 = arith.mulf %419, %423 : vector<8x64xf32>
    %425 = vector.shape_cast %392 : vector<64xf32> to vector<1x64xf32>
    %426 = vector.broadcast %425 : vector<1x64xf32> to vector<8x64xf32>
    %427 = arith.mulf %424, %426 : vector<8x64xf32>
    %428 = vector.shape_cast %394 : vector<64xf32> to vector<1x64xf32>
    %429 = vector.broadcast %428 : vector<1x64xf32> to vector<8x64xf32>
    %430 = arith.addf %427, %429 : vector<8x64xf32>
    %431 = arith.truncf %430 : vector<8x64xf32> to vector<8x64xbf16>
    %c2_128 = arith.constant 2 : index
    %c0_129 = arith.constant 0 : index
    %c0_130 = arith.constant 0 : index
    %432 = vector.load %arg4[%c2_128, %c0_129, %c0_130] : memref<5x64x192xbf16, #tpu.memory_space<vmem>>, vector<1x64x192xbf16>
    %433 = vector.shape_cast %432 : vector<1x64x192xbf16> to vector<64x192xbf16>
    %cst_131 = arith.constant dense<0.000000e+00> : vector<8x192xf32>
    %434 = tpu.matmul %431, %433, %cst_131 {dimension_numbers = #tpu.dot_dimension_numbers<[1], [0], [0], [1], [0, 0, 1, 1], [], []>} : vector<8x64xbf16>, vector<64x192xbf16>, vector<8x192xf32> -> vector<8x192xf32>
    %435 = vector.shape_cast %404 : vector<192xf32> to vector<1x192xf32>
    %436 = vector.broadcast %435 : vector<1x192xf32> to vector<8x192xf32>
    %437 = arith.addf %434, %436 : vector<8x192xf32>
    %438 = arith.truncf %437 : vector<8x192xf32> to vector<8x192xbf16>
    %439 = vector.extract_strided_slice %438 {offsets = [0, 0], sizes = [8, 16], strides = [1, 1]} : vector<8x192xbf16> to vector<8x16xbf16>
    %440 = vector.extract_strided_slice %438 {offsets = [0, 64], sizes = [8, 16], strides = [1, 1]} : vector<8x192xbf16> to vector<8x16xbf16>
    %441 = vector.extract_strided_slice %438 {offsets = [0, 128], sizes = [8, 16], strides = [1, 1]} : vector<8x192xbf16> to vector<8x16xbf16>
    %cst_132 = arith.constant dense<0.000000e+00> : vector<8x8xf32>
    %442 = tpu.matmul %439, %440, %cst_132 {dimension_numbers = #tpu.dot_dimension_numbers<[1], [1], [0], [0], [0, 0, 1, 0], [], []>} : vector<8x16xbf16>, vector<8x16xbf16>, vector<8x8xf32> -> vector<8x8xf32>
    %cst_133 = arith.constant 2.500000e-01 : f32
    %443 = vector.broadcast %cst_133 : f32 to vector<8x8xf32>
    %444 = arith.mulf %442, %443 : vector<8x8xf32>
    %445 = arith.addf %444, %8 : vector<8x8xf32>
    %cst_134 = arith.constant dense<0xFF800000> : vector<8xf32>
    %446 = vector.multi_reduction <maximumf>, %445, %cst_134 [1] : vector<8x8xf32> to vector<8xf32>
    %447 = vector.shape_cast %446 : vector<8xf32> to vector<8x1xf32>
    %448 = vector.broadcast %447 : vector<8x1xf32> to vector<8x8xf32>
    %449 = arith.subf %445, %448 : vector<8x8xf32>
    %450 = math.exp %449 : vector<8x8xf32>
    %cst_135 = arith.constant dense<0.000000e+00> : vector<8xf32>
    %451 = vector.multi_reduction <add>, %450, %cst_135 [1] : vector<8x8xf32> to vector<8xf32>
    %452 = vector.shape_cast %451 : vector<8xf32> to vector<8x1xf32>
    %453 = tpu.reciprocal %452 {approx = true} : vector<8x1xf32> -> vector<8x1xf32>
    %454 = vector.broadcast %453 : vector<8x1xf32> to vector<8x8xf32>
    %455 = arith.mulf %450, %454 : vector<8x8xf32>
    %456 = arith.truncf %455 : vector<8x8xf32> to vector<8x8xbf16>
    %cst_136 = arith.constant dense<0.000000e+00> : vector<8x16xf32>
    %457 = tpu.matmul %456, %441, %cst_136 {dimension_numbers = #tpu.dot_dimension_numbers<[1], [0], [0], [1], [0, 0, 1, 1], [], []>} : vector<8x8xbf16>, vector<8x16xbf16>, vector<8x16xf32> -> vector<8x16xf32>
    %458 = vector.extract_strided_slice %438 {offsets = [0, 16], sizes = [8, 16], strides = [1, 1]} : vector<8x192xbf16> to vector<8x16xbf16>
    %459 = vector.extract_strided_slice %438 {offsets = [0, 80], sizes = [8, 16], strides = [1, 1]} : vector<8x192xbf16> to vector<8x16xbf16>
    %460 = vector.extract_strided_slice %438 {offsets = [0, 144], sizes = [8, 16], strides = [1, 1]} : vector<8x192xbf16> to vector<8x16xbf16>
    %cst_137 = arith.constant dense<0.000000e+00> : vector<8x8xf32>
    %461 = tpu.matmul %458, %459, %cst_137 {dimension_numbers = #tpu.dot_dimension_numbers<[1], [1], [0], [0], [0, 0, 1, 0], [], []>} : vector<8x16xbf16>, vector<8x16xbf16>, vector<8x8xf32> -> vector<8x8xf32>
    %cst_138 = arith.constant 2.500000e-01 : f32
    %462 = vector.broadcast %cst_138 : f32 to vector<8x8xf32>
    %463 = arith.mulf %461, %462 : vector<8x8xf32>
    %464 = arith.addf %463, %8 : vector<8x8xf32>
    %cst_139 = arith.constant dense<0xFF800000> : vector<8xf32>
    %465 = vector.multi_reduction <maximumf>, %464, %cst_139 [1] : vector<8x8xf32> to vector<8xf32>
    %466 = vector.shape_cast %465 : vector<8xf32> to vector<8x1xf32>
    %467 = vector.broadcast %466 : vector<8x1xf32> to vector<8x8xf32>
    %468 = arith.subf %464, %467 : vector<8x8xf32>
    %469 = math.exp %468 : vector<8x8xf32>
    %cst_140 = arith.constant dense<0.000000e+00> : vector<8xf32>
    %470 = vector.multi_reduction <add>, %469, %cst_140 [1] : vector<8x8xf32> to vector<8xf32>
    %471 = vector.shape_cast %470 : vector<8xf32> to vector<8x1xf32>
    %472 = tpu.reciprocal %471 {approx = true} : vector<8x1xf32> -> vector<8x1xf32>
    %473 = vector.broadcast %472 : vector<8x1xf32> to vector<8x8xf32>
    %474 = arith.mulf %469, %473 : vector<8x8xf32>
    %475 = arith.truncf %474 : vector<8x8xf32> to vector<8x8xbf16>
    %cst_141 = arith.constant dense<0.000000e+00> : vector<8x16xf32>
    %476 = tpu.matmul %475, %460, %cst_141 {dimension_numbers = #tpu.dot_dimension_numbers<[1], [0], [0], [1], [0, 0, 1, 1], [], []>} : vector<8x8xbf16>, vector<8x16xbf16>, vector<8x16xf32> -> vector<8x16xf32>
    %477 = vector.extract_strided_slice %438 {offsets = [0, 32], sizes = [8, 16], strides = [1, 1]} : vector<8x192xbf16> to vector<8x16xbf16>
    %478 = vector.extract_strided_slice %438 {offsets = [0, 96], sizes = [8, 16], strides = [1, 1]} : vector<8x192xbf16> to vector<8x16xbf16>
    %479 = vector.extract_strided_slice %438 {offsets = [0, 160], sizes = [8, 16], strides = [1, 1]} : vector<8x192xbf16> to vector<8x16xbf16>
    %cst_142 = arith.constant dense<0.000000e+00> : vector<8x8xf32>
    %480 = tpu.matmul %477, %478, %cst_142 {dimension_numbers = #tpu.dot_dimension_numbers<[1], [1], [0], [0], [0, 0, 1, 0], [], []>} : vector<8x16xbf16>, vector<8x16xbf16>, vector<8x8xf32> -> vector<8x8xf32>
    %cst_143 = arith.constant 2.500000e-01 : f32
    %481 = vector.broadcast %cst_143 : f32 to vector<8x8xf32>
    %482 = arith.mulf %480, %481 : vector<8x8xf32>
    %483 = arith.addf %482, %8 : vector<8x8xf32>
    %cst_144 = arith.constant dense<0xFF800000> : vector<8xf32>
    %484 = vector.multi_reduction <maximumf>, %483, %cst_144 [1] : vector<8x8xf32> to vector<8xf32>
    %485 = vector.shape_cast %484 : vector<8xf32> to vector<8x1xf32>
    %486 = vector.broadcast %485 : vector<8x1xf32> to vector<8x8xf32>
    %487 = arith.subf %483, %486 : vector<8x8xf32>
    %488 = math.exp %487 : vector<8x8xf32>
    %cst_145 = arith.constant dense<0.000000e+00> : vector<8xf32>
    %489 = vector.multi_reduction <add>, %488, %cst_145 [1] : vector<8x8xf32> to vector<8xf32>
    %490 = vector.shape_cast %489 : vector<8xf32> to vector<8x1xf32>
    %491 = tpu.reciprocal %490 {approx = true} : vector<8x1xf32> -> vector<8x1xf32>
    %492 = vector.broadcast %491 : vector<8x1xf32> to vector<8x8xf32>
    %493 = arith.mulf %488, %492 : vector<8x8xf32>
    %494 = arith.truncf %493 : vector<8x8xf32> to vector<8x8xbf16>
    %cst_146 = arith.constant dense<0.000000e+00> : vector<8x16xf32>
    %495 = tpu.matmul %494, %479, %cst_146 {dimension_numbers = #tpu.dot_dimension_numbers<[1], [0], [0], [1], [0, 0, 1, 1], [], []>} : vector<8x8xbf16>, vector<8x16xbf16>, vector<8x16xf32> -> vector<8x16xf32>
    %496 = vector.extract_strided_slice %438 {offsets = [0, 48], sizes = [8, 16], strides = [1, 1]} : vector<8x192xbf16> to vector<8x16xbf16>
    %497 = vector.extract_strided_slice %438 {offsets = [0, 112], sizes = [8, 16], strides = [1, 1]} : vector<8x192xbf16> to vector<8x16xbf16>
    %498 = vector.extract_strided_slice %438 {offsets = [0, 176], sizes = [8, 16], strides = [1, 1]} : vector<8x192xbf16> to vector<8x16xbf16>
    %cst_147 = arith.constant dense<0.000000e+00> : vector<8x8xf32>
    %499 = tpu.matmul %496, %497, %cst_147 {dimension_numbers = #tpu.dot_dimension_numbers<[1], [1], [0], [0], [0, 0, 1, 0], [], []>} : vector<8x16xbf16>, vector<8x16xbf16>, vector<8x8xf32> -> vector<8x8xf32>
    %cst_148 = arith.constant 2.500000e-01 : f32
    %500 = vector.broadcast %cst_148 : f32 to vector<8x8xf32>
    %501 = arith.mulf %499, %500 : vector<8x8xf32>
    %502 = arith.addf %501, %8 : vector<8x8xf32>
    %cst_149 = arith.constant dense<0xFF800000> : vector<8xf32>
    %503 = vector.multi_reduction <maximumf>, %502, %cst_149 [1] : vector<8x8xf32> to vector<8xf32>
    %504 = vector.shape_cast %503 : vector<8xf32> to vector<8x1xf32>
    %505 = vector.broadcast %504 : vector<8x1xf32> to vector<8x8xf32>
    %506 = arith.subf %502, %505 : vector<8x8xf32>
    %507 = math.exp %506 : vector<8x8xf32>
    %cst_150 = arith.constant dense<0.000000e+00> : vector<8xf32>
    %508 = vector.multi_reduction <add>, %507, %cst_150 [1] : vector<8x8xf32> to vector<8xf32>
    %509 = vector.shape_cast %508 : vector<8xf32> to vector<8x1xf32>
    %510 = tpu.reciprocal %509 {approx = true} : vector<8x1xf32> -> vector<8x1xf32>
    %511 = vector.broadcast %510 : vector<8x1xf32> to vector<8x8xf32>
    %512 = arith.mulf %507, %511 : vector<8x8xf32>
    %513 = arith.truncf %512 : vector<8x8xf32> to vector<8x8xbf16>
    %cst_151 = arith.constant dense<0.000000e+00> : vector<8x16xf32>
    %514 = tpu.matmul %513, %498, %cst_151 {dimension_numbers = #tpu.dot_dimension_numbers<[1], [0], [0], [1], [0, 0, 1, 1], [], []>} : vector<8x8xbf16>, vector<8x16xbf16>, vector<8x16xf32> -> vector<8x16xf32>
    %515 = tpu.concatenate %457, %476, %495, %514 in 1 : vector<8x16xf32>, vector<8x16xf32>, vector<8x16xf32>, vector<8x16xf32> -> vector<8x64xf32>
    %516 = arith.truncf %515 : vector<8x64xf32> to vector<8x64xbf16>
    %c2_152 = arith.constant 2 : index
    %c0_153 = arith.constant 0 : index
    %c0_154 = arith.constant 0 : index
    %517 = vector.load %arg5[%c2_152, %c0_153, %c0_154] : memref<5x64x64xbf16, #tpu.memory_space<vmem>>, vector<1x64x64xbf16>
    %518 = vector.shape_cast %517 : vector<1x64x64xbf16> to vector<64x64xbf16>
    %cst_155 = arith.constant dense<0.000000e+00> : vector<8x64xf32>
    %519 = tpu.matmul %516, %518, %cst_155 {dimension_numbers = #tpu.dot_dimension_numbers<[1], [0], [0], [1], [0, 0, 1, 1], [], []>} : vector<8x64xbf16>, vector<64x64xbf16>, vector<8x64xf32> -> vector<8x64xf32>
    %520 = vector.shape_cast %400 : vector<64xf32> to vector<1x64xf32>
    %521 = vector.broadcast %520 : vector<1x64xf32> to vector<8x64xf32>
    %522 = arith.addf %519, %521 : vector<8x64xf32>
    %523 = arith.addf %14, %522 : vector<8x64xf32>
    %cst_156 = arith.constant dense<0.000000e+00> : vector<8xf32>
    %524 = vector.multi_reduction <add>, %523, %cst_156 [1] : vector<8x64xf32> to vector<8xf32>
    %525 = vector.shape_cast %524 : vector<8xf32> to vector<8x1xf32>
    %cst_157 = arith.constant 6.400000e+01 : f32
    %526 = vector.broadcast %cst_157 : f32 to vector<8x1xf32>
    %527 = arith.divf %525, %526 : vector<8x1xf32>
    %528 = vector.broadcast %527 : vector<8x1xf32> to vector<8x64xf32>
    %529 = arith.subf %523, %528 : vector<8x64xf32>
    %530 = arith.mulf %529, %529 : vector<8x64xf32>
    %cst_158 = arith.constant dense<0.000000e+00> : vector<8xf32>
    %531 = vector.multi_reduction <add>, %530, %cst_158 [1] : vector<8x64xf32> to vector<8xf32>
    %532 = vector.shape_cast %531 : vector<8xf32> to vector<8x1xf32>
    %cst_159 = arith.constant 6.400000e+01 : f32
    %533 = vector.broadcast %cst_159 : f32 to vector<8x1xf32>
    %534 = arith.divf %532, %533 : vector<8x1xf32>
    %535 = vector.broadcast %527 : vector<8x1xf32> to vector<8x64xf32>
    %536 = arith.subf %523, %535 : vector<8x64xf32>
    %cst_160 = arith.constant 9.99999974E-6 : f32
    %537 = vector.broadcast %cst_160 : f32 to vector<8x1xf32>
    %538 = arith.addf %534, %537 : vector<8x1xf32>
    %539 = math.rsqrt %538 : vector<8x1xf32>
    %540 = vector.broadcast %539 : vector<8x1xf32> to vector<8x64xf32>
    %541 = arith.mulf %536, %540 : vector<8x64xf32>
    %542 = vector.shape_cast %396 : vector<64xf32> to vector<1x64xf32>
    %543 = vector.broadcast %542 : vector<1x64xf32> to vector<8x64xf32>
    %544 = arith.mulf %541, %543 : vector<8x64xf32>
    %545 = vector.shape_cast %398 : vector<64xf32> to vector<1x64xf32>
    %546 = vector.broadcast %545 : vector<1x64xf32> to vector<8x64xf32>
    %547 = arith.addf %544, %546 : vector<8x64xf32>
    %548 = arith.truncf %547 : vector<8x64xf32> to vector<8x64xbf16>
    %c2_161 = arith.constant 2 : index
    %c0_162 = arith.constant 0 : index
    %c0_163 = arith.constant 0 : index
    %549 = vector.load %arg6[%c2_161, %c0_162, %c0_163] : memref<5x64x256xbf16, #tpu.memory_space<vmem>>, vector<1x64x256xbf16>
    %550 = vector.shape_cast %549 : vector<1x64x256xbf16> to vector<64x256xbf16>
    %cst_164 = arith.constant dense<0.000000e+00> : vector<8x256xf32>
    %551 = tpu.matmul %548, %550, %cst_164 {dimension_numbers = #tpu.dot_dimension_numbers<[1], [0], [0], [1], [0, 0, 1, 1], [], []>} : vector<8x64xbf16>, vector<64x256xbf16>, vector<8x256xf32> -> vector<8x256xf32>
    %552 = vector.shape_cast %406 : vector<256xf32> to vector<1x256xf32>
    %553 = vector.broadcast %552 : vector<1x256xf32> to vector<8x256xf32>
    %554 = arith.addf %551, %553 : vector<8x256xf32>
    %555 = arith.mulf %554, %554 : vector<8x256xf32>
    %556 = arith.mulf %554, %555 : vector<8x256xf32>
    %cst_165 = arith.constant 4.471500e-02 : f32
    %557 = vector.broadcast %cst_165 : f32 to vector<8x256xf32>
    %558 = arith.mulf %557, %556 : vector<8x256xf32>
    %559 = arith.addf %554, %558 : vector<8x256xf32>
    %cst_166 = arith.constant 0.797884583 : f32
    %560 = vector.broadcast %cst_166 : f32 to vector<8x256xf32>
    %561 = arith.mulf %560, %559 : vector<8x256xf32>
    %562 = math.tanh %561 : vector<8x256xf32>
    %cst_167 = arith.constant 1.000000e+00 : f32
    %563 = vector.broadcast %cst_167 : f32 to vector<8x256xf32>
    %564 = arith.addf %563, %562 : vector<8x256xf32>
    %cst_168 = arith.constant 5.000000e-01 : f32
    %565 = vector.broadcast %cst_168 : f32 to vector<8x256xf32>
    %566 = arith.mulf %565, %564 : vector<8x256xf32>
    %567 = arith.mulf %554, %566 : vector<8x256xf32>
    %568 = arith.truncf %567 : vector<8x256xf32> to vector<8x256xbf16>
    %c2_169 = arith.constant 2 : index
    %c0_170 = arith.constant 0 : index
    %c0_171 = arith.constant 0 : index
    %569 = vector.load %arg7[%c2_169, %c0_170, %c0_171] : memref<5x256x64xbf16, #tpu.memory_space<vmem>>, vector<1x256x64xbf16>
    %570 = vector.shape_cast %569 : vector<1x256x64xbf16> to vector<256x64xbf16>
    %cst_172 = arith.constant dense<0.000000e+00> : vector<8x64xf32>
    %571 = tpu.matmul %568, %570, %cst_172 {dimension_numbers = #tpu.dot_dimension_numbers<[1], [0], [0], [1], [0, 0, 1, 1], [], []>} : vector<8x256xbf16>, vector<256x64xbf16>, vector<8x64xf32> -> vector<8x64xf32>
    %572 = vector.shape_cast %402 : vector<64xf32> to vector<1x64xf32>
    %573 = vector.broadcast %572 : vector<1x64xf32> to vector<8x64xf32>
    %574 = arith.addf %571, %573 : vector<8x64xf32>
    %575 = arith.addf %523, %574 : vector<8x64xf32>
    %c3_173 = arith.constant 3 : index
    %c0_174 = arith.constant 0 : index
    %c0_175 = arith.constant 0 : index
    %576 = vector.load %arg8[%c3_173, %c0_174, %c0_175] : memref<5x8x256xf32, #tpu.memory_space<vmem>>, vector<1x8x256xf32>
    %577 = vector.shape_cast %576 : vector<1x8x256xf32> to vector<8x256xf32>
    %578 = vector.extract_strided_slice %577 {offsets = [0, 0], sizes = [1, 64], strides = [1, 1]} : vector<8x256xf32> to vector<1x64xf32>
    %579 = vector.shape_cast %578 : vector<1x64xf32> to vector<64xf32>
    %580 = vector.extract_strided_slice %577 {offsets = [1, 0], sizes = [1, 64], strides = [1, 1]} : vector<8x256xf32> to vector<1x64xf32>
    %581 = vector.shape_cast %580 : vector<1x64xf32> to vector<64xf32>
    %582 = vector.extract_strided_slice %577 {offsets = [2, 0], sizes = [1, 64], strides = [1, 1]} : vector<8x256xf32> to vector<1x64xf32>
    %583 = vector.shape_cast %582 : vector<1x64xf32> to vector<64xf32>
    %584 = vector.extract_strided_slice %577 {offsets = [3, 0], sizes = [1, 64], strides = [1, 1]} : vector<8x256xf32> to vector<1x64xf32>
    %585 = vector.shape_cast %584 : vector<1x64xf32> to vector<64xf32>
    %586 = vector.extract_strided_slice %577 {offsets = [4, 0], sizes = [1, 64], strides = [1, 1]} : vector<8x256xf32> to vector<1x64xf32>
    %587 = vector.shape_cast %586 : vector<1x64xf32> to vector<64xf32>
    %588 = vector.extract_strided_slice %577 {offsets = [5, 0], sizes = [1, 64], strides = [1, 1]} : vector<8x256xf32> to vector<1x64xf32>
    %589 = vector.shape_cast %588 : vector<1x64xf32> to vector<64xf32>
    %590 = vector.extract_strided_slice %577 {offsets = [6, 0], sizes = [1, 192], strides = [1, 1]} : vector<8x256xf32> to vector<1x192xf32>
    %591 = vector.shape_cast %590 : vector<1x192xf32> to vector<192xf32>
    %592 = vector.extract_strided_slice %577 {offsets = [7, 0], sizes = [1, 256], strides = [1, 1]} : vector<8x256xf32> to vector<1x256xf32>
    %593 = vector.shape_cast %592 : vector<1x256xf32> to vector<256xf32>
    %cst_176 = arith.constant dense<0.000000e+00> : vector<8xf32>
    %594 = vector.multi_reduction <add>, %575, %cst_176 [1] : vector<8x64xf32> to vector<8xf32>
    %595 = vector.shape_cast %594 : vector<8xf32> to vector<8x1xf32>
    %cst_177 = arith.constant 6.400000e+01 : f32
    %596 = vector.broadcast %cst_177 : f32 to vector<8x1xf32>
    %597 = arith.divf %595, %596 : vector<8x1xf32>
    %598 = vector.broadcast %597 : vector<8x1xf32> to vector<8x64xf32>
    %599 = arith.subf %575, %598 : vector<8x64xf32>
    %600 = arith.mulf %599, %599 : vector<8x64xf32>
    %cst_178 = arith.constant dense<0.000000e+00> : vector<8xf32>
    %601 = vector.multi_reduction <add>, %600, %cst_178 [1] : vector<8x64xf32> to vector<8xf32>
    %602 = vector.shape_cast %601 : vector<8xf32> to vector<8x1xf32>
    %cst_179 = arith.constant 6.400000e+01 : f32
    %603 = vector.broadcast %cst_179 : f32 to vector<8x1xf32>
    %604 = arith.divf %602, %603 : vector<8x1xf32>
    %605 = vector.broadcast %597 : vector<8x1xf32> to vector<8x64xf32>
    %606 = arith.subf %575, %605 : vector<8x64xf32>
    %cst_180 = arith.constant 9.99999974E-6 : f32
    %607 = vector.broadcast %cst_180 : f32 to vector<8x1xf32>
    %608 = arith.addf %604, %607 : vector<8x1xf32>
    %609 = math.rsqrt %608 : vector<8x1xf32>
    %610 = vector.broadcast %609 : vector<8x1xf32> to vector<8x64xf32>
    %611 = arith.mulf %606, %610 : vector<8x64xf32>
    %612 = vector.shape_cast %579 : vector<64xf32> to vector<1x64xf32>
    %613 = vector.broadcast %612 : vector<1x64xf32> to vector<8x64xf32>
    %614 = arith.mulf %611, %613 : vector<8x64xf32>
    %615 = vector.shape_cast %581 : vector<64xf32> to vector<1x64xf32>
    %616 = vector.broadcast %615 : vector<1x64xf32> to vector<8x64xf32>
    %617 = arith.addf %614, %616 : vector<8x64xf32>
    %618 = arith.truncf %617 : vector<8x64xf32> to vector<8x64xbf16>
    %c3_181 = arith.constant 3 : index
    %c0_182 = arith.constant 0 : index
    %c0_183 = arith.constant 0 : index
    %619 = vector.load %arg4[%c3_181, %c0_182, %c0_183] : memref<5x64x192xbf16, #tpu.memory_space<vmem>>, vector<1x64x192xbf16>
    %620 = vector.shape_cast %619 : vector<1x64x192xbf16> to vector<64x192xbf16>
    %cst_184 = arith.constant dense<0.000000e+00> : vector<8x192xf32>
    %621 = tpu.matmul %618, %620, %cst_184 {dimension_numbers = #tpu.dot_dimension_numbers<[1], [0], [0], [1], [0, 0, 1, 1], [], []>} : vector<8x64xbf16>, vector<64x192xbf16>, vector<8x192xf32> -> vector<8x192xf32>
    %622 = vector.shape_cast %591 : vector<192xf32> to vector<1x192xf32>
    %623 = vector.broadcast %622 : vector<1x192xf32> to vector<8x192xf32>
    %624 = arith.addf %621, %623 : vector<8x192xf32>
    %625 = arith.truncf %624 : vector<8x192xf32> to vector<8x192xbf16>
    %626 = vector.extract_strided_slice %625 {offsets = [0, 0], sizes = [8, 16], strides = [1, 1]} : vector<8x192xbf16> to vector<8x16xbf16>
    %627 = vector.extract_strided_slice %625 {offsets = [0, 64], sizes = [8, 16], strides = [1, 1]} : vector<8x192xbf16> to vector<8x16xbf16>
    %628 = vector.extract_strided_slice %625 {offsets = [0, 128], sizes = [8, 16], strides = [1, 1]} : vector<8x192xbf16> to vector<8x16xbf16>
    %cst_185 = arith.constant dense<0.000000e+00> : vector<8x8xf32>
    %629 = tpu.matmul %626, %627, %cst_185 {dimension_numbers = #tpu.dot_dimension_numbers<[1], [1], [0], [0], [0, 0, 1, 0], [], []>} : vector<8x16xbf16>, vector<8x16xbf16>, vector<8x8xf32> -> vector<8x8xf32>
    %cst_186 = arith.constant 2.500000e-01 : f32
    %630 = vector.broadcast %cst_186 : f32 to vector<8x8xf32>
    %631 = arith.mulf %629, %630 : vector<8x8xf32>
    %632 = arith.addf %631, %8 : vector<8x8xf32>
    %cst_187 = arith.constant dense<0xFF800000> : vector<8xf32>
    %633 = vector.multi_reduction <maximumf>, %632, %cst_187 [1] : vector<8x8xf32> to vector<8xf32>
    %634 = vector.shape_cast %633 : vector<8xf32> to vector<8x1xf32>
    %635 = vector.broadcast %634 : vector<8x1xf32> to vector<8x8xf32>
    %636 = arith.subf %632, %635 : vector<8x8xf32>
    %637 = math.exp %636 : vector<8x8xf32>
    %cst_188 = arith.constant dense<0.000000e+00> : vector<8xf32>
    %638 = vector.multi_reduction <add>, %637, %cst_188 [1] : vector<8x8xf32> to vector<8xf32>
    %639 = vector.shape_cast %638 : vector<8xf32> to vector<8x1xf32>
    %640 = tpu.reciprocal %639 {approx = true} : vector<8x1xf32> -> vector<8x1xf32>
    %641 = vector.broadcast %640 : vector<8x1xf32> to vector<8x8xf32>
    %642 = arith.mulf %637, %641 : vector<8x8xf32>
    %643 = arith.truncf %642 : vector<8x8xf32> to vector<8x8xbf16>
    %cst_189 = arith.constant dense<0.000000e+00> : vector<8x16xf32>
    %644 = tpu.matmul %643, %628, %cst_189 {dimension_numbers = #tpu.dot_dimension_numbers<[1], [0], [0], [1], [0, 0, 1, 1], [], []>} : vector<8x8xbf16>, vector<8x16xbf16>, vector<8x16xf32> -> vector<8x16xf32>
    %645 = vector.extract_strided_slice %625 {offsets = [0, 16], sizes = [8, 16], strides = [1, 1]} : vector<8x192xbf16> to vector<8x16xbf16>
    %646 = vector.extract_strided_slice %625 {offsets = [0, 80], sizes = [8, 16], strides = [1, 1]} : vector<8x192xbf16> to vector<8x16xbf16>
    %647 = vector.extract_strided_slice %625 {offsets = [0, 144], sizes = [8, 16], strides = [1, 1]} : vector<8x192xbf16> to vector<8x16xbf16>
    %cst_190 = arith.constant dense<0.000000e+00> : vector<8x8xf32>
    %648 = tpu.matmul %645, %646, %cst_190 {dimension_numbers = #tpu.dot_dimension_numbers<[1], [1], [0], [0], [0, 0, 1, 0], [], []>} : vector<8x16xbf16>, vector<8x16xbf16>, vector<8x8xf32> -> vector<8x8xf32>
    %cst_191 = arith.constant 2.500000e-01 : f32
    %649 = vector.broadcast %cst_191 : f32 to vector<8x8xf32>
    %650 = arith.mulf %648, %649 : vector<8x8xf32>
    %651 = arith.addf %650, %8 : vector<8x8xf32>
    %cst_192 = arith.constant dense<0xFF800000> : vector<8xf32>
    %652 = vector.multi_reduction <maximumf>, %651, %cst_192 [1] : vector<8x8xf32> to vector<8xf32>
    %653 = vector.shape_cast %652 : vector<8xf32> to vector<8x1xf32>
    %654 = vector.broadcast %653 : vector<8x1xf32> to vector<8x8xf32>
    %655 = arith.subf %651, %654 : vector<8x8xf32>
    %656 = math.exp %655 : vector<8x8xf32>
    %cst_193 = arith.constant dense<0.000000e+00> : vector<8xf32>
    %657 = vector.multi_reduction <add>, %656, %cst_193 [1] : vector<8x8xf32> to vector<8xf32>
    %658 = vector.shape_cast %657 : vector<8xf32> to vector<8x1xf32>
    %659 = tpu.reciprocal %658 {approx = true} : vector<8x1xf32> -> vector<8x1xf32>
    %660 = vector.broadcast %659 : vector<8x1xf32> to vector<8x8xf32>
    %661 = arith.mulf %656, %660 : vector<8x8xf32>
    %662 = arith.truncf %661 : vector<8x8xf32> to vector<8x8xbf16>
    %cst_194 = arith.constant dense<0.000000e+00> : vector<8x16xf32>
    %663 = tpu.matmul %662, %647, %cst_194 {dimension_numbers = #tpu.dot_dimension_numbers<[1], [0], [0], [1], [0, 0, 1, 1], [], []>} : vector<8x8xbf16>, vector<8x16xbf16>, vector<8x16xf32> -> vector<8x16xf32>
    %664 = vector.extract_strided_slice %625 {offsets = [0, 32], sizes = [8, 16], strides = [1, 1]} : vector<8x192xbf16> to vector<8x16xbf16>
    %665 = vector.extract_strided_slice %625 {offsets = [0, 96], sizes = [8, 16], strides = [1, 1]} : vector<8x192xbf16> to vector<8x16xbf16>
    %666 = vector.extract_strided_slice %625 {offsets = [0, 160], sizes = [8, 16], strides = [1, 1]} : vector<8x192xbf16> to vector<8x16xbf16>
    %cst_195 = arith.constant dense<0.000000e+00> : vector<8x8xf32>
    %667 = tpu.matmul %664, %665, %cst_195 {dimension_numbers = #tpu.dot_dimension_numbers<[1], [1], [0], [0], [0, 0, 1, 0], [], []>} : vector<8x16xbf16>, vector<8x16xbf16>, vector<8x8xf32> -> vector<8x8xf32>
    %cst_196 = arith.constant 2.500000e-01 : f32
    %668 = vector.broadcast %cst_196 : f32 to vector<8x8xf32>
    %669 = arith.mulf %667, %668 : vector<8x8xf32>
    %670 = arith.addf %669, %8 : vector<8x8xf32>
    %cst_197 = arith.constant dense<0xFF800000> : vector<8xf32>
    %671 = vector.multi_reduction <maximumf>, %670, %cst_197 [1] : vector<8x8xf32> to vector<8xf32>
    %672 = vector.shape_cast %671 : vector<8xf32> to vector<8x1xf32>
    %673 = vector.broadcast %672 : vector<8x1xf32> to vector<8x8xf32>
    %674 = arith.subf %670, %673 : vector<8x8xf32>
    %675 = math.exp %674 : vector<8x8xf32>
    %cst_198 = arith.constant dense<0.000000e+00> : vector<8xf32>
    %676 = vector.multi_reduction <add>, %675, %cst_198 [1] : vector<8x8xf32> to vector<8xf32>
    %677 = vector.shape_cast %676 : vector<8xf32> to vector<8x1xf32>
    %678 = tpu.reciprocal %677 {approx = true} : vector<8x1xf32> -> vector<8x1xf32>
    %679 = vector.broadcast %678 : vector<8x1xf32> to vector<8x8xf32>
    %680 = arith.mulf %675, %679 : vector<8x8xf32>
    %681 = arith.truncf %680 : vector<8x8xf32> to vector<8x8xbf16>
    %cst_199 = arith.constant dense<0.000000e+00> : vector<8x16xf32>
    %682 = tpu.matmul %681, %666, %cst_199 {dimension_numbers = #tpu.dot_dimension_numbers<[1], [0], [0], [1], [0, 0, 1, 1], [], []>} : vector<8x8xbf16>, vector<8x16xbf16>, vector<8x16xf32> -> vector<8x16xf32>
    %683 = vector.extract_strided_slice %625 {offsets = [0, 48], sizes = [8, 16], strides = [1, 1]} : vector<8x192xbf16> to vector<8x16xbf16>
    %684 = vector.extract_strided_slice %625 {offsets = [0, 112], sizes = [8, 16], strides = [1, 1]} : vector<8x192xbf16> to vector<8x16xbf16>
    %685 = vector.extract_strided_slice %625 {offsets = [0, 176], sizes = [8, 16], strides = [1, 1]} : vector<8x192xbf16> to vector<8x16xbf16>
    %cst_200 = arith.constant dense<0.000000e+00> : vector<8x8xf32>
    %686 = tpu.matmul %683, %684, %cst_200 {dimension_numbers = #tpu.dot_dimension_numbers<[1], [1], [0], [0], [0, 0, 1, 0], [], []>} : vector<8x16xbf16>, vector<8x16xbf16>, vector<8x8xf32> -> vector<8x8xf32>
    %cst_201 = arith.constant 2.500000e-01 : f32
    %687 = vector.broadcast %cst_201 : f32 to vector<8x8xf32>
    %688 = arith.mulf %686, %687 : vector<8x8xf32>
    %689 = arith.addf %688, %8 : vector<8x8xf32>
    %cst_202 = arith.constant dense<0xFF800000> : vector<8xf32>
    %690 = vector.multi_reduction <maximumf>, %689, %cst_202 [1] : vector<8x8xf32> to vector<8xf32>
    %691 = vector.shape_cast %690 : vector<8xf32> to vector<8x1xf32>
    %692 = vector.broadcast %691 : vector<8x1xf32> to vector<8x8xf32>
    %693 = arith.subf %689, %692 : vector<8x8xf32>
    %694 = math.exp %693 : vector<8x8xf32>
    %cst_203 = arith.constant dense<0.000000e+00> : vector<8xf32>
    %695 = vector.multi_reduction <add>, %694, %cst_203 [1] : vector<8x8xf32> to vector<8xf32>
    %696 = vector.shape_cast %695 : vector<8xf32> to vector<8x1xf32>
    %697 = tpu.reciprocal %696 {approx = true} : vector<8x1xf32> -> vector<8x1xf32>
    %698 = vector.broadcast %697 : vector<8x1xf32> to vector<8x8xf32>
    %699 = arith.mulf %694, %698 : vector<8x8xf32>
    %700 = arith.truncf %699 : vector<8x8xf32> to vector<8x8xbf16>
    %cst_204 = arith.constant dense<0.000000e+00> : vector<8x16xf32>
    %701 = tpu.matmul %700, %685, %cst_204 {dimension_numbers = #tpu.dot_dimension_numbers<[1], [0], [0], [1], [0, 0, 1, 1], [], []>} : vector<8x8xbf16>, vector<8x16xbf16>, vector<8x16xf32> -> vector<8x16xf32>
    %702 = tpu.concatenate %644, %663, %682, %701 in 1 : vector<8x16xf32>, vector<8x16xf32>, vector<8x16xf32>, vector<8x16xf32> -> vector<8x64xf32>
    %703 = arith.truncf %702 : vector<8x64xf32> to vector<8x64xbf16>
    %c3_205 = arith.constant 3 : index
    %c0_206 = arith.constant 0 : index
    %c0_207 = arith.constant 0 : index
    %704 = vector.load %arg5[%c3_205, %c0_206, %c0_207] : memref<5x64x64xbf16, #tpu.memory_space<vmem>>, vector<1x64x64xbf16>
    %705 = vector.shape_cast %704 : vector<1x64x64xbf16> to vector<64x64xbf16>
    %cst_208 = arith.constant dense<0.000000e+00> : vector<8x64xf32>
    %706 = tpu.matmul %703, %705, %cst_208 {dimension_numbers = #tpu.dot_dimension_numbers<[1], [0], [0], [1], [0, 0, 1, 1], [], []>} : vector<8x64xbf16>, vector<64x64xbf16>, vector<8x64xf32> -> vector<8x64xf32>
    %707 = vector.shape_cast %587 : vector<64xf32> to vector<1x64xf32>
    %708 = vector.broadcast %707 : vector<1x64xf32> to vector<8x64xf32>
    %709 = arith.addf %706, %708 : vector<8x64xf32>
    %710 = arith.addf %575, %709 : vector<8x64xf32>
    %cst_209 = arith.constant dense<0.000000e+00> : vector<8xf32>
    %711 = vector.multi_reduction <add>, %710, %cst_209 [1] : vector<8x64xf32> to vector<8xf32>
    %712 = vector.shape_cast %711 : vector<8xf32> to vector<8x1xf32>
    %cst_210 = arith.constant 6.400000e+01 : f32
    %713 = vector.broadcast %cst_210 : f32 to vector<8x1xf32>
    %714 = arith.divf %712, %713 : vector<8x1xf32>
    %715 = vector.broadcast %714 : vector<8x1xf32> to vector<8x64xf32>
    %716 = arith.subf %710, %715 : vector<8x64xf32>
    %717 = arith.mulf %716, %716 : vector<8x64xf32>
    %cst_211 = arith.constant dense<0.000000e+00> : vector<8xf32>
    %718 = vector.multi_reduction <add>, %717, %cst_211 [1] : vector<8x64xf32> to vector<8xf32>
    %719 = vector.shape_cast %718 : vector<8xf32> to vector<8x1xf32>
    %cst_212 = arith.constant 6.400000e+01 : f32
    %720 = vector.broadcast %cst_212 : f32 to vector<8x1xf32>
    %721 = arith.divf %719, %720 : vector<8x1xf32>
    %722 = vector.broadcast %714 : vector<8x1xf32> to vector<8x64xf32>
    %723 = arith.subf %710, %722 : vector<8x64xf32>
    %cst_213 = arith.constant 9.99999974E-6 : f32
    %724 = vector.broadcast %cst_213 : f32 to vector<8x1xf32>
    %725 = arith.addf %721, %724 : vector<8x1xf32>
    %726 = math.rsqrt %725 : vector<8x1xf32>
    %727 = vector.broadcast %726 : vector<8x1xf32> to vector<8x64xf32>
    %728 = arith.mulf %723, %727 : vector<8x64xf32>
    %729 = vector.shape_cast %583 : vector<64xf32> to vector<1x64xf32>
    %730 = vector.broadcast %729 : vector<1x64xf32> to vector<8x64xf32>
    %731 = arith.mulf %728, %730 : vector<8x64xf32>
    %732 = vector.shape_cast %585 : vector<64xf32> to vector<1x64xf32>
    %733 = vector.broadcast %732 : vector<1x64xf32> to vector<8x64xf32>
    %734 = arith.addf %731, %733 : vector<8x64xf32>
    %735 = arith.truncf %734 : vector<8x64xf32> to vector<8x64xbf16>
    %c3_214 = arith.constant 3 : index
    %c0_215 = arith.constant 0 : index
    %c0_216 = arith.constant 0 : index
    %736 = vector.load %arg6[%c3_214, %c0_215, %c0_216] : memref<5x64x256xbf16, #tpu.memory_space<vmem>>, vector<1x64x256xbf16>
    %737 = vector.shape_cast %736 : vector<1x64x256xbf16> to vector<64x256xbf16>
    %cst_217 = arith.constant dense<0.000000e+00> : vector<8x256xf32>
    %738 = tpu.matmul %735, %737, %cst_217 {dimension_numbers = #tpu.dot_dimension_numbers<[1], [0], [0], [1], [0, 0, 1, 1], [], []>} : vector<8x64xbf16>, vector<64x256xbf16>, vector<8x256xf32> -> vector<8x256xf32>
    %739 = vector.shape_cast %593 : vector<256xf32> to vector<1x256xf32>
    %740 = vector.broadcast %739 : vector<1x256xf32> to vector<8x256xf32>
    %741 = arith.addf %738, %740 : vector<8x256xf32>
    %742 = arith.mulf %741, %741 : vector<8x256xf32>
    %743 = arith.mulf %741, %742 : vector<8x256xf32>
    %cst_218 = arith.constant 4.471500e-02 : f32
    %744 = vector.broadcast %cst_218 : f32 to vector<8x256xf32>
    %745 = arith.mulf %744, %743 : vector<8x256xf32>
    %746 = arith.addf %741, %745 : vector<8x256xf32>
    %cst_219 = arith.constant 0.797884583 : f32
    %747 = vector.broadcast %cst_219 : f32 to vector<8x256xf32>
    %748 = arith.mulf %747, %746 : vector<8x256xf32>
    %749 = math.tanh %748 : vector<8x256xf32>
    %cst_220 = arith.constant 1.000000e+00 : f32
    %750 = vector.broadcast %cst_220 : f32 to vector<8x256xf32>
    %751 = arith.addf %750, %749 : vector<8x256xf32>
    %cst_221 = arith.constant 5.000000e-01 : f32
    %752 = vector.broadcast %cst_221 : f32 to vector<8x256xf32>
    %753 = arith.mulf %752, %751 : vector<8x256xf32>
    %754 = arith.mulf %741, %753 : vector<8x256xf32>
    %755 = arith.truncf %754 : vector<8x256xf32> to vector<8x256xbf16>
    %c3_222 = arith.constant 3 : index
    %c0_223 = arith.constant 0 : index
    %c0_224 = arith.constant 0 : index
    %756 = vector.load %arg7[%c3_222, %c0_223, %c0_224] : memref<5x256x64xbf16, #tpu.memory_space<vmem>>, vector<1x256x64xbf16>
    %757 = vector.shape_cast %756 : vector<1x256x64xbf16> to vector<256x64xbf16>
    %cst_225 = arith.constant dense<0.000000e+00> : vector<8x64xf32>
    %758 = tpu.matmul %755, %757, %cst_225 {dimension_numbers = #tpu.dot_dimension_numbers<[1], [0], [0], [1], [0, 0, 1, 1], [], []>} : vector<8x256xbf16>, vector<256x64xbf16>, vector<8x64xf32> -> vector<8x64xf32>
    %759 = vector.shape_cast %589 : vector<64xf32> to vector<1x64xf32>
    %760 = vector.broadcast %759 : vector<1x64xf32> to vector<8x64xf32>
    %761 = arith.addf %758, %760 : vector<8x64xf32>
    %762 = arith.addf %710, %761 : vector<8x64xf32>
    %763 = tpu.concatenate %388, %762 in 0 : vector<8x64xf32>, vector<8x64xf32> -> vector<16x64xf32>
    %c4 = arith.constant 4 : index
    %c0_226 = arith.constant 0 : index
    %c0_227 = arith.constant 0 : index
    %764 = vector.load %arg8[%c4, %c0_226, %c0_227] : memref<5x8x256xf32, #tpu.memory_space<vmem>>, vector<1x8x256xf32>
    %765 = vector.shape_cast %764 : vector<1x8x256xf32> to vector<8x256xf32>
    %766 = vector.extract_strided_slice %765 {offsets = [0, 0], sizes = [1, 64], strides = [1, 1]} : vector<8x256xf32> to vector<1x64xf32>
    %767 = vector.shape_cast %766 : vector<1x64xf32> to vector<64xf32>
    %768 = vector.extract_strided_slice %765 {offsets = [1, 0], sizes = [1, 64], strides = [1, 1]} : vector<8x256xf32> to vector<1x64xf32>
    %769 = vector.shape_cast %768 : vector<1x64xf32> to vector<64xf32>
    %770 = vector.extract_strided_slice %765 {offsets = [2, 0], sizes = [1, 64], strides = [1, 1]} : vector<8x256xf32> to vector<1x64xf32>
    %771 = vector.shape_cast %770 : vector<1x64xf32> to vector<64xf32>
    %772 = vector.extract_strided_slice %765 {offsets = [3, 0], sizes = [1, 64], strides = [1, 1]} : vector<8x256xf32> to vector<1x64xf32>
    %773 = vector.shape_cast %772 : vector<1x64xf32> to vector<64xf32>
    %774 = vector.extract_strided_slice %765 {offsets = [4, 0], sizes = [1, 64], strides = [1, 1]} : vector<8x256xf32> to vector<1x64xf32>
    %775 = vector.shape_cast %774 : vector<1x64xf32> to vector<64xf32>
    %776 = vector.extract_strided_slice %765 {offsets = [5, 0], sizes = [1, 64], strides = [1, 1]} : vector<8x256xf32> to vector<1x64xf32>
    %777 = vector.shape_cast %776 : vector<1x64xf32> to vector<64xf32>
    %778 = vector.extract_strided_slice %765 {offsets = [6, 0], sizes = [1, 192], strides = [1, 1]} : vector<8x256xf32> to vector<1x192xf32>
    %779 = vector.shape_cast %778 : vector<1x192xf32> to vector<192xf32>
    %780 = vector.extract_strided_slice %765 {offsets = [7, 0], sizes = [1, 256], strides = [1, 1]} : vector<8x256xf32> to vector<1x256xf32>
    %781 = vector.shape_cast %780 : vector<1x256xf32> to vector<256xf32>
    %cst_228 = arith.constant dense<0.000000e+00> : vector<16xf32>
    %782 = vector.multi_reduction <add>, %763, %cst_228 [1] : vector<16x64xf32> to vector<16xf32>
    %783 = vector.shape_cast %782 : vector<16xf32> to vector<16x1xf32>
    %cst_229 = arith.constant 6.400000e+01 : f32
    %784 = vector.broadcast %cst_229 : f32 to vector<16x1xf32>
    %785 = arith.divf %783, %784 : vector<16x1xf32>
    %786 = vector.broadcast %785 : vector<16x1xf32> to vector<16x64xf32>
    %787 = arith.subf %763, %786 : vector<16x64xf32>
    %788 = arith.mulf %787, %787 : vector<16x64xf32>
    %cst_230 = arith.constant dense<0.000000e+00> : vector<16xf32>
    %789 = vector.multi_reduction <add>, %788, %cst_230 [1] : vector<16x64xf32> to vector<16xf32>
    %790 = vector.shape_cast %789 : vector<16xf32> to vector<16x1xf32>
    %cst_231 = arith.constant 6.400000e+01 : f32
    %791 = vector.broadcast %cst_231 : f32 to vector<16x1xf32>
    %792 = arith.divf %790, %791 : vector<16x1xf32>
    %793 = vector.broadcast %785 : vector<16x1xf32> to vector<16x64xf32>
    %794 = arith.subf %763, %793 : vector<16x64xf32>
    %cst_232 = arith.constant 9.99999974E-6 : f32
    %795 = vector.broadcast %cst_232 : f32 to vector<16x1xf32>
    %796 = arith.addf %792, %795 : vector<16x1xf32>
    %797 = math.rsqrt %796 : vector<16x1xf32>
    %798 = vector.broadcast %797 : vector<16x1xf32> to vector<16x64xf32>
    %799 = arith.mulf %794, %798 : vector<16x64xf32>
    %800 = vector.shape_cast %767 : vector<64xf32> to vector<1x64xf32>
    %801 = vector.broadcast %800 : vector<1x64xf32> to vector<16x64xf32>
    %802 = arith.mulf %799, %801 : vector<16x64xf32>
    %803 = vector.shape_cast %769 : vector<64xf32> to vector<1x64xf32>
    %804 = vector.broadcast %803 : vector<1x64xf32> to vector<16x64xf32>
    %805 = arith.addf %802, %804 : vector<16x64xf32>
    %806 = arith.truncf %805 : vector<16x64xf32> to vector<16x64xbf16>
    %c4_233 = arith.constant 4 : index
    %c0_234 = arith.constant 0 : index
    %c0_235 = arith.constant 0 : index
    %807 = vector.load %arg4[%c4_233, %c0_234, %c0_235] : memref<5x64x192xbf16, #tpu.memory_space<vmem>>, vector<1x64x192xbf16>
    %808 = vector.shape_cast %807 : vector<1x64x192xbf16> to vector<64x192xbf16>
    %cst_236 = arith.constant dense<0.000000e+00> : vector<16x192xf32>
    %809 = tpu.matmul %806, %808, %cst_236 {dimension_numbers = #tpu.dot_dimension_numbers<[1], [0], [0], [1], [0, 0, 1, 1], [], []>} : vector<16x64xbf16>, vector<64x192xbf16>, vector<16x192xf32> -> vector<16x192xf32>
    %810 = vector.shape_cast %779 : vector<192xf32> to vector<1x192xf32>
    %811 = vector.broadcast %810 : vector<1x192xf32> to vector<16x192xf32>
    %812 = arith.addf %809, %811 : vector<16x192xf32>
    %813 = arith.truncf %812 : vector<16x192xf32> to vector<16x192xbf16>
    %814 = vector.extract_strided_slice %813 {offsets = [0, 0], sizes = [16, 16], strides = [1, 1]} : vector<16x192xbf16> to vector<16x16xbf16>
    %815 = vector.extract_strided_slice %813 {offsets = [0, 64], sizes = [16, 16], strides = [1, 1]} : vector<16x192xbf16> to vector<16x16xbf16>
    %816 = vector.extract_strided_slice %813 {offsets = [0, 128], sizes = [16, 16], strides = [1, 1]} : vector<16x192xbf16> to vector<16x16xbf16>
    %cst_237 = arith.constant dense<0.000000e+00> : vector<16x16xf32>
    %817 = tpu.matmul %814, %815, %cst_237 {dimension_numbers = #tpu.dot_dimension_numbers<[1], [1], [0], [0], [0, 0, 1, 0], [], []>} : vector<16x16xbf16>, vector<16x16xbf16>, vector<16x16xf32> -> vector<16x16xf32>
    %cst_238 = arith.constant 2.500000e-01 : f32
    %818 = vector.broadcast %cst_238 : f32 to vector<16x16xf32>
    %819 = arith.mulf %817, %818 : vector<16x16xf32>
    %820 = arith.addf %819, %10 : vector<16x16xf32>
    %cst_239 = arith.constant dense<0xFF800000> : vector<16xf32>
    %821 = vector.multi_reduction <maximumf>, %820, %cst_239 [1] : vector<16x16xf32> to vector<16xf32>
    %822 = vector.shape_cast %821 : vector<16xf32> to vector<16x1xf32>
    %823 = vector.broadcast %822 : vector<16x1xf32> to vector<16x16xf32>
    %824 = arith.subf %820, %823 : vector<16x16xf32>
    %825 = math.exp %824 : vector<16x16xf32>
    %cst_240 = arith.constant dense<0.000000e+00> : vector<16xf32>
    %826 = vector.multi_reduction <add>, %825, %cst_240 [1] : vector<16x16xf32> to vector<16xf32>
    %827 = vector.shape_cast %826 : vector<16xf32> to vector<16x1xf32>
    %828 = tpu.reciprocal %827 {approx = true} : vector<16x1xf32> -> vector<16x1xf32>
    %829 = vector.broadcast %828 : vector<16x1xf32> to vector<16x16xf32>
    %830 = arith.mulf %825, %829 : vector<16x16xf32>
    %831 = arith.truncf %830 : vector<16x16xf32> to vector<16x16xbf16>
    %cst_241 = arith.constant dense<0.000000e+00> : vector<16x16xf32>
    %832 = tpu.matmul %831, %816, %cst_241 {dimension_numbers = #tpu.dot_dimension_numbers<[1], [0], [0], [1], [0, 0, 1, 1], [], []>} : vector<16x16xbf16>, vector<16x16xbf16>, vector<16x16xf32> -> vector<16x16xf32>
    %833 = vector.extract_strided_slice %813 {offsets = [0, 16], sizes = [16, 16], strides = [1, 1]} : vector<16x192xbf16> to vector<16x16xbf16>
    %834 = vector.extract_strided_slice %813 {offsets = [0, 80], sizes = [16, 16], strides = [1, 1]} : vector<16x192xbf16> to vector<16x16xbf16>
    %835 = vector.extract_strided_slice %813 {offsets = [0, 144], sizes = [16, 16], strides = [1, 1]} : vector<16x192xbf16> to vector<16x16xbf16>
    %cst_242 = arith.constant dense<0.000000e+00> : vector<16x16xf32>
    %836 = tpu.matmul %833, %834, %cst_242 {dimension_numbers = #tpu.dot_dimension_numbers<[1], [1], [0], [0], [0, 0, 1, 0], [], []>} : vector<16x16xbf16>, vector<16x16xbf16>, vector<16x16xf32> -> vector<16x16xf32>
    %cst_243 = arith.constant 2.500000e-01 : f32
    %837 = vector.broadcast %cst_243 : f32 to vector<16x16xf32>
    %838 = arith.mulf %836, %837 : vector<16x16xf32>
    %839 = arith.addf %838, %10 : vector<16x16xf32>
    %cst_244 = arith.constant dense<0xFF800000> : vector<16xf32>
    %840 = vector.multi_reduction <maximumf>, %839, %cst_244 [1] : vector<16x16xf32> to vector<16xf32>
    %841 = vector.shape_cast %840 : vector<16xf32> to vector<16x1xf32>
    %842 = vector.broadcast %841 : vector<16x1xf32> to vector<16x16xf32>
    %843 = arith.subf %839, %842 : vector<16x16xf32>
    %844 = math.exp %843 : vector<16x16xf32>
    %cst_245 = arith.constant dense<0.000000e+00> : vector<16xf32>
    %845 = vector.multi_reduction <add>, %844, %cst_245 [1] : vector<16x16xf32> to vector<16xf32>
    %846 = vector.shape_cast %845 : vector<16xf32> to vector<16x1xf32>
    %847 = tpu.reciprocal %846 {approx = true} : vector<16x1xf32> -> vector<16x1xf32>
    %848 = vector.broadcast %847 : vector<16x1xf32> to vector<16x16xf32>
    %849 = arith.mulf %844, %848 : vector<16x16xf32>
    %850 = arith.truncf %849 : vector<16x16xf32> to vector<16x16xbf16>
    %cst_246 = arith.constant dense<0.000000e+00> : vector<16x16xf32>
    %851 = tpu.matmul %850, %835, %cst_246 {dimension_numbers = #tpu.dot_dimension_numbers<[1], [0], [0], [1], [0, 0, 1, 1], [], []>} : vector<16x16xbf16>, vector<16x16xbf16>, vector<16x16xf32> -> vector<16x16xf32>
    %852 = vector.extract_strided_slice %813 {offsets = [0, 32], sizes = [16, 16], strides = [1, 1]} : vector<16x192xbf16> to vector<16x16xbf16>
    %853 = vector.extract_strided_slice %813 {offsets = [0, 96], sizes = [16, 16], strides = [1, 1]} : vector<16x192xbf16> to vector<16x16xbf16>
    %854 = vector.extract_strided_slice %813 {offsets = [0, 160], sizes = [16, 16], strides = [1, 1]} : vector<16x192xbf16> to vector<16x16xbf16>
    %cst_247 = arith.constant dense<0.000000e+00> : vector<16x16xf32>
    %855 = tpu.matmul %852, %853, %cst_247 {dimension_numbers = #tpu.dot_dimension_numbers<[1], [1], [0], [0], [0, 0, 1, 0], [], []>} : vector<16x16xbf16>, vector<16x16xbf16>, vector<16x16xf32> -> vector<16x16xf32>
    %cst_248 = arith.constant 2.500000e-01 : f32
    %856 = vector.broadcast %cst_248 : f32 to vector<16x16xf32>
    %857 = arith.mulf %855, %856 : vector<16x16xf32>
    %858 = arith.addf %857, %10 : vector<16x16xf32>
    %cst_249 = arith.constant dense<0xFF800000> : vector<16xf32>
    %859 = vector.multi_reduction <maximumf>, %858, %cst_249 [1] : vector<16x16xf32> to vector<16xf32>
    %860 = vector.shape_cast %859 : vector<16xf32> to vector<16x1xf32>
    %861 = vector.broadcast %860 : vector<16x1xf32> to vector<16x16xf32>
    %862 = arith.subf %858, %861 : vector<16x16xf32>
    %863 = math.exp %862 : vector<16x16xf32>
    %cst_250 = arith.constant dense<0.000000e+00> : vector<16xf32>
    %864 = vector.multi_reduction <add>, %863, %cst_250 [1] : vector<16x16xf32> to vector<16xf32>
    %865 = vector.shape_cast %864 : vector<16xf32> to vector<16x1xf32>
    %866 = tpu.reciprocal %865 {approx = true} : vector<16x1xf32> -> vector<16x1xf32>
    %867 = vector.broadcast %866 : vector<16x1xf32> to vector<16x16xf32>
    %868 = arith.mulf %863, %867 : vector<16x16xf32>
    %869 = arith.truncf %868 : vector<16x16xf32> to vector<16x16xbf16>
    %cst_251 = arith.constant dense<0.000000e+00> : vector<16x16xf32>
    %870 = tpu.matmul %869, %854, %cst_251 {dimension_numbers = #tpu.dot_dimension_numbers<[1], [0], [0], [1], [0, 0, 1, 1], [], []>} : vector<16x16xbf16>, vector<16x16xbf16>, vector<16x16xf32> -> vector<16x16xf32>
    %871 = vector.extract_strided_slice %813 {offsets = [0, 48], sizes = [16, 16], strides = [1, 1]} : vector<16x192xbf16> to vector<16x16xbf16>
    %872 = vector.extract_strided_slice %813 {offsets = [0, 112], sizes = [16, 16], strides = [1, 1]} : vector<16x192xbf16> to vector<16x16xbf16>
    %873 = vector.extract_strided_slice %813 {offsets = [0, 176], sizes = [16, 16], strides = [1, 1]} : vector<16x192xbf16> to vector<16x16xbf16>
    %cst_252 = arith.constant dense<0.000000e+00> : vector<16x16xf32>
    %874 = tpu.matmul %871, %872, %cst_252 {dimension_numbers = #tpu.dot_dimension_numbers<[1], [1], [0], [0], [0, 0, 1, 0], [], []>} : vector<16x16xbf16>, vector<16x16xbf16>, vector<16x16xf32> -> vector<16x16xf32>
    %cst_253 = arith.constant 2.500000e-01 : f32
    %875 = vector.broadcast %cst_253 : f32 to vector<16x16xf32>
    %876 = arith.mulf %874, %875 : vector<16x16xf32>
    %877 = arith.addf %876, %10 : vector<16x16xf32>
    %cst_254 = arith.constant dense<0xFF800000> : vector<16xf32>
    %878 = vector.multi_reduction <maximumf>, %877, %cst_254 [1] : vector<16x16xf32> to vector<16xf32>
    %879 = vector.shape_cast %878 : vector<16xf32> to vector<16x1xf32>
    %880 = vector.broadcast %879 : vector<16x1xf32> to vector<16x16xf32>
    %881 = arith.subf %877, %880 : vector<16x16xf32>
    %882 = math.exp %881 : vector<16x16xf32>
    %cst_255 = arith.constant dense<0.000000e+00> : vector<16xf32>
    %883 = vector.multi_reduction <add>, %882, %cst_255 [1] : vector<16x16xf32> to vector<16xf32>
    %884 = vector.shape_cast %883 : vector<16xf32> to vector<16x1xf32>
    %885 = tpu.reciprocal %884 {approx = true} : vector<16x1xf32> -> vector<16x1xf32>
    %886 = vector.broadcast %885 : vector<16x1xf32> to vector<16x16xf32>
    %887 = arith.mulf %882, %886 : vector<16x16xf32>
    %888 = arith.truncf %887 : vector<16x16xf32> to vector<16x16xbf16>
    %cst_256 = arith.constant dense<0.000000e+00> : vector<16x16xf32>
    %889 = tpu.matmul %888, %873, %cst_256 {dimension_numbers = #tpu.dot_dimension_numbers<[1], [0], [0], [1], [0, 0, 1, 1], [], []>} : vector<16x16xbf16>, vector<16x16xbf16>, vector<16x16xf32> -> vector<16x16xf32>
    %890 = tpu.concatenate %832, %851, %870, %889 in 1 : vector<16x16xf32>, vector<16x16xf32>, vector<16x16xf32>, vector<16x16xf32> -> vector<16x64xf32>
    %891 = arith.truncf %890 : vector<16x64xf32> to vector<16x64xbf16>
    %c4_257 = arith.constant 4 : index
    %c0_258 = arith.constant 0 : index
    %c0_259 = arith.constant 0 : index
    %892 = vector.load %arg5[%c4_257, %c0_258, %c0_259] : memref<5x64x64xbf16, #tpu.memory_space<vmem>>, vector<1x64x64xbf16>
    %893 = vector.shape_cast %892 : vector<1x64x64xbf16> to vector<64x64xbf16>
    %cst_260 = arith.constant dense<0.000000e+00> : vector<16x64xf32>
    %894 = tpu.matmul %891, %893, %cst_260 {dimension_numbers = #tpu.dot_dimension_numbers<[1], [0], [0], [1], [0, 0, 1, 1], [], []>} : vector<16x64xbf16>, vector<64x64xbf16>, vector<16x64xf32> -> vector<16x64xf32>
    %895 = vector.shape_cast %775 : vector<64xf32> to vector<1x64xf32>
    %896 = vector.broadcast %895 : vector<1x64xf32> to vector<16x64xf32>
    %897 = arith.addf %894, %896 : vector<16x64xf32>
    %898 = arith.addf %763, %897 : vector<16x64xf32>
    %cst_261 = arith.constant dense<0.000000e+00> : vector<16xf32>
    %899 = vector.multi_reduction <add>, %898, %cst_261 [1] : vector<16x64xf32> to vector<16xf32>
    %900 = vector.shape_cast %899 : vector<16xf32> to vector<16x1xf32>
    %cst_262 = arith.constant 6.400000e+01 : f32
    %901 = vector.broadcast %cst_262 : f32 to vector<16x1xf32>
    %902 = arith.divf %900, %901 : vector<16x1xf32>
    %903 = vector.broadcast %902 : vector<16x1xf32> to vector<16x64xf32>
    %904 = arith.subf %898, %903 : vector<16x64xf32>
    %905 = arith.mulf %904, %904 : vector<16x64xf32>
    %cst_263 = arith.constant dense<0.000000e+00> : vector<16xf32>
    %906 = vector.multi_reduction <add>, %905, %cst_263 [1] : vector<16x64xf32> to vector<16xf32>
    %907 = vector.shape_cast %906 : vector<16xf32> to vector<16x1xf32>
    %cst_264 = arith.constant 6.400000e+01 : f32
    %908 = vector.broadcast %cst_264 : f32 to vector<16x1xf32>
    %909 = arith.divf %907, %908 : vector<16x1xf32>
    %910 = vector.broadcast %902 : vector<16x1xf32> to vector<16x64xf32>
    %911 = arith.subf %898, %910 : vector<16x64xf32>
    %cst_265 = arith.constant 9.99999974E-6 : f32
    %912 = vector.broadcast %cst_265 : f32 to vector<16x1xf32>
    %913 = arith.addf %909, %912 : vector<16x1xf32>
    %914 = math.rsqrt %913 : vector<16x1xf32>
    %915 = vector.broadcast %914 : vector<16x1xf32> to vector<16x64xf32>
    %916 = arith.mulf %911, %915 : vector<16x64xf32>
    %917 = vector.shape_cast %771 : vector<64xf32> to vector<1x64xf32>
    %918 = vector.broadcast %917 : vector<1x64xf32> to vector<16x64xf32>
    %919 = arith.mulf %916, %918 : vector<16x64xf32>
    %920 = vector.shape_cast %773 : vector<64xf32> to vector<1x64xf32>
    %921 = vector.broadcast %920 : vector<1x64xf32> to vector<16x64xf32>
    %922 = arith.addf %919, %921 : vector<16x64xf32>
    %923 = arith.truncf %922 : vector<16x64xf32> to vector<16x64xbf16>
    %c4_266 = arith.constant 4 : index
    %c0_267 = arith.constant 0 : index
    %c0_268 = arith.constant 0 : index
    %924 = vector.load %arg6[%c4_266, %c0_267, %c0_268] : memref<5x64x256xbf16, #tpu.memory_space<vmem>>, vector<1x64x256xbf16>
    %925 = vector.shape_cast %924 : vector<1x64x256xbf16> to vector<64x256xbf16>
    %cst_269 = arith.constant dense<0.000000e+00> : vector<16x256xf32>
    %926 = tpu.matmul %923, %925, %cst_269 {dimension_numbers = #tpu.dot_dimension_numbers<[1], [0], [0], [1], [0, 0, 1, 1], [], []>} : vector<16x64xbf16>, vector<64x256xbf16>, vector<16x256xf32> -> vector<16x256xf32>
    %927 = vector.shape_cast %781 : vector<256xf32> to vector<1x256xf32>
    %928 = vector.broadcast %927 : vector<1x256xf32> to vector<16x256xf32>
    %929 = arith.addf %926, %928 : vector<16x256xf32>
    %930 = arith.mulf %929, %929 : vector<16x256xf32>
    %931 = arith.mulf %929, %930 : vector<16x256xf32>
    %cst_270 = arith.constant 4.471500e-02 : f32
    %932 = vector.broadcast %cst_270 : f32 to vector<16x256xf32>
    %933 = arith.mulf %932, %931 : vector<16x256xf32>
    %934 = arith.addf %929, %933 : vector<16x256xf32>
    %cst_271 = arith.constant 0.797884583 : f32
    %935 = vector.broadcast %cst_271 : f32 to vector<16x256xf32>
    %936 = arith.mulf %935, %934 : vector<16x256xf32>
    %937 = math.tanh %936 : vector<16x256xf32>
    %cst_272 = arith.constant 1.000000e+00 : f32
    %938 = vector.broadcast %cst_272 : f32 to vector<16x256xf32>
    %939 = arith.addf %938, %937 : vector<16x256xf32>
    %cst_273 = arith.constant 5.000000e-01 : f32
    %940 = vector.broadcast %cst_273 : f32 to vector<16x256xf32>
    %941 = arith.mulf %940, %939 : vector<16x256xf32>
    %942 = arith.mulf %929, %941 : vector<16x256xf32>
    %943 = arith.truncf %942 : vector<16x256xf32> to vector<16x256xbf16>
    %c4_274 = arith.constant 4 : index
    %c0_275 = arith.constant 0 : index
    %c0_276 = arith.constant 0 : index
    %944 = vector.load %arg7[%c4_274, %c0_275, %c0_276] : memref<5x256x64xbf16, #tpu.memory_space<vmem>>, vector<1x256x64xbf16>
    %945 = vector.shape_cast %944 : vector<1x256x64xbf16> to vector<256x64xbf16>
    %cst_277 = arith.constant dense<0.000000e+00> : vector<16x64xf32>
    %946 = tpu.matmul %943, %945, %cst_277 {dimension_numbers = #tpu.dot_dimension_numbers<[1], [0], [0], [1], [0, 0, 1, 1], [], []>} : vector<16x256xbf16>, vector<256x64xbf16>, vector<16x64xf32> -> vector<16x64xf32>
    %947 = vector.shape_cast %777 : vector<64xf32> to vector<1x64xf32>
    %948 = vector.broadcast %947 : vector<1x64xf32> to vector<16x64xf32>
    %949 = arith.addf %946, %948 : vector<16x64xf32>
    %950 = arith.addf %898, %949 : vector<16x64xf32>
    %c0_278 = arith.constant 0 : index
    %c0_279 = arith.constant 0 : index
    %951 = vector.load %arg10[%c0_278, %c0_279] : memref<5x128xf32, #tpu.memory_space<vmem>>, vector<1x64xf32>
    %952 = vector.shape_cast %951 : vector<1x64xf32> to vector<64xf32>
    %c1_280 = arith.constant 1 : index
    %c0_281 = arith.constant 0 : index
    %953 = vector.load %arg10[%c1_280, %c0_281] : memref<5x128xf32, #tpu.memory_space<vmem>>, vector<1x64xf32>
    %954 = vector.shape_cast %953 : vector<1x64xf32> to vector<64xf32>
    %c2_282 = arith.constant 2 : index
    %c0_283 = arith.constant 0 : index
    %955 = vector.load %arg10[%c2_282, %c0_283] : memref<5x128xf32, #tpu.memory_space<vmem>>, vector<1x64xf32>
    %956 = vector.shape_cast %955 : vector<1x64xf32> to vector<64xf32>
    %c3_284 = arith.constant 3 : index
    %c0_285 = arith.constant 0 : index
    %957 = vector.load %arg10[%c3_284, %c0_285] : memref<5x128xf32, #tpu.memory_space<vmem>>, vector<1x64xf32>
    %958 = vector.shape_cast %957 : vector<1x64xf32> to vector<64xf32>
    %c4_286 = arith.constant 4 : index
    %c0_287 = arith.constant 0 : index
    %959 = vector.load %arg10[%c4_286, %c0_287] : memref<5x128xf32, #tpu.memory_space<vmem>>, vector<1x128xf32>
    %960 = vector.shape_cast %959 : vector<1x128xf32> to vector<128xf32>
    %cst_288 = arith.constant dense<0.000000e+00> : vector<16xf32>
    %961 = vector.multi_reduction <add>, %950, %cst_288 [1] : vector<16x64xf32> to vector<16xf32>
    %962 = vector.shape_cast %961 : vector<16xf32> to vector<16x1xf32>
    %cst_289 = arith.constant 6.400000e+01 : f32
    %963 = vector.broadcast %cst_289 : f32 to vector<16x1xf32>
    %964 = arith.divf %962, %963 : vector<16x1xf32>
    %965 = vector.broadcast %964 : vector<16x1xf32> to vector<16x64xf32>
    %966 = arith.subf %950, %965 : vector<16x64xf32>
    %967 = arith.mulf %966, %966 : vector<16x64xf32>
    %cst_290 = arith.constant dense<0.000000e+00> : vector<16xf32>
    %968 = vector.multi_reduction <add>, %967, %cst_290 [1] : vector<16x64xf32> to vector<16xf32>
    %969 = vector.shape_cast %968 : vector<16xf32> to vector<16x1xf32>
    %cst_291 = arith.constant 6.400000e+01 : f32
    %970 = vector.broadcast %cst_291 : f32 to vector<16x1xf32>
    %971 = arith.divf %969, %970 : vector<16x1xf32>
    %972 = vector.broadcast %964 : vector<16x1xf32> to vector<16x64xf32>
    %973 = arith.subf %950, %972 : vector<16x64xf32>
    %cst_292 = arith.constant 9.99999974E-6 : f32
    %974 = vector.broadcast %cst_292 : f32 to vector<16x1xf32>
    %975 = arith.addf %971, %974 : vector<16x1xf32>
    %976 = math.rsqrt %975 : vector<16x1xf32>
    %977 = vector.broadcast %976 : vector<16x1xf32> to vector<16x64xf32>
    %978 = arith.mulf %973, %977 : vector<16x64xf32>
    %979 = vector.shape_cast %952 : vector<64xf32> to vector<1x64xf32>
    %980 = vector.broadcast %979 : vector<1x64xf32> to vector<16x64xf32>
    %981 = arith.mulf %978, %980 : vector<16x64xf32>
    %982 = vector.shape_cast %954 : vector<64xf32> to vector<1x64xf32>
    %983 = vector.broadcast %982 : vector<1x64xf32> to vector<16x64xf32>
    %984 = arith.addf %981, %983 : vector<16x64xf32>
    %cst_293 = arith.constant dense<0.000000e+00> : vector<2x64xf32>
    %985 = tpu.matmul %12, %984, %cst_293 {dimension_numbers = #tpu.dot_dimension_numbers<[1], [0], [0], [1], [0, 0, 1, 1], [], []>} : vector<2x16xf32>, vector<16x64xf32>, vector<2x64xf32> -> vector<2x64xf32>
    %cst_294 = arith.constant dense<0.000000e+00> : vector<2xf32>
    %986 = vector.multi_reduction <add>, %985, %cst_294 [1] : vector<2x64xf32> to vector<2xf32>
    %987 = vector.shape_cast %986 : vector<2xf32> to vector<2x1xf32>
    %cst_295 = arith.constant 6.400000e+01 : f32
    %988 = vector.broadcast %cst_295 : f32 to vector<2x1xf32>
    %989 = arith.divf %987, %988 : vector<2x1xf32>
    %990 = vector.broadcast %989 : vector<2x1xf32> to vector<2x64xf32>
    %991 = arith.subf %985, %990 : vector<2x64xf32>
    %992 = arith.mulf %991, %991 : vector<2x64xf32>
    %cst_296 = arith.constant dense<0.000000e+00> : vector<2xf32>
    %993 = vector.multi_reduction <add>, %992, %cst_296 [1] : vector<2x64xf32> to vector<2xf32>
    %994 = vector.shape_cast %993 : vector<2xf32> to vector<2x1xf32>
    %cst_297 = arith.constant 6.400000e+01 : f32
    %995 = vector.broadcast %cst_297 : f32 to vector<2x1xf32>
    %996 = arith.divf %994, %995 : vector<2x1xf32>
    %997 = vector.broadcast %989 : vector<2x1xf32> to vector<2x64xf32>
    %998 = arith.subf %985, %997 : vector<2x64xf32>
    %cst_298 = arith.constant 9.99999974E-6 : f32
    %999 = vector.broadcast %cst_298 : f32 to vector<2x1xf32>
    %1000 = arith.addf %996, %999 : vector<2x1xf32>
    %1001 = math.rsqrt %1000 : vector<2x1xf32>
    %1002 = vector.broadcast %1001 : vector<2x1xf32> to vector<2x64xf32>
    %1003 = arith.mulf %998, %1002 : vector<2x64xf32>
    %1004 = vector.shape_cast %956 : vector<64xf32> to vector<1x64xf32>
    %1005 = vector.broadcast %1004 : vector<1x64xf32> to vector<2x64xf32>
    %1006 = arith.mulf %1003, %1005 : vector<2x64xf32>
    %1007 = vector.shape_cast %958 : vector<64xf32> to vector<1x64xf32>
    %1008 = vector.broadcast %1007 : vector<1x64xf32> to vector<2x64xf32>
    %1009 = arith.addf %1006, %1008 : vector<2x64xf32>
    %1010 = arith.truncf %1009 : vector<2x64xf32> to vector<2x64xbf16>
    %c0_299 = arith.constant 0 : index
    %c0_300 = arith.constant 0 : index
    %1011 = vector.load %arg11[%c0_299, %c0_300] : memref<64x128xbf16, #tpu.memory_space<vmem>>, vector<64x128xbf16>
    %cst_301 = arith.constant dense<0.000000e+00> : vector<2x128xf32>
    %1012 = tpu.matmul %1010, %1011, %cst_301 {dimension_numbers = #tpu.dot_dimension_numbers<[1], [0], [0], [1], [0, 0, 1, 1], [], []>} : vector<2x64xbf16>, vector<64x128xbf16>, vector<2x128xf32> -> vector<2x128xf32>
    %1013 = vector.shape_cast %960 : vector<128xf32> to vector<1x128xf32>
    %1014 = vector.broadcast %1013 : vector<1x128xf32> to vector<2x128xf32>
    %1015 = arith.addf %1012, %1014 : vector<2x128xf32>
    %cst_302 = arith.constant dense<0xFF800000> : vector<2xf32>
    %1016 = vector.multi_reduction <maximumf>, %1015, %cst_302 [1] : vector<2x128xf32> to vector<2xf32>
    %1017 = vector.shape_cast %1016 : vector<2xf32> to vector<2x1xf32>
    %1018 = vector.broadcast %1017 : vector<2x1xf32> to vector<2x128xf32>
    %1019 = arith.subf %1015, %1018 : vector<2x128xf32>
    %1020 = math.exp %1019 : vector<2x128xf32>
    %cst_303 = arith.constant dense<0.000000e+00> : vector<2xf32>
    %1021 = vector.multi_reduction <add>, %1020, %cst_303 [1] : vector<2x128xf32> to vector<2xf32>
    %1022 = vector.shape_cast %1021 : vector<2xf32> to vector<2x1xf32>
    %1023 = vector.broadcast %1022 : vector<2x1xf32> to vector<2x128xf32>
    %1024 = arith.divf %1020, %1023 : vector<2x128xf32>
    %c0_304 = arith.constant 0 : index
    %c0_305 = arith.constant 0 : index
    %1025 = vector.load %arg12[%c0_304, %c0_305] : memref<2x128xf32, #tpu.memory_space<vmem>>, vector<2x128xf32>
    tpu.vector_store %arg12[%c0_304, %c0_305], %1024 {strides = array<i32>} : memref<2x128xf32, #tpu.memory_space<vmem>>, vector<2x128xf32>,
    return
  }
  func.func @transform_0(%arg0: i32) -> (i32, i32) {
    %c0_i32 = arith.constant 0 : i32
    %c0_i32_0 = arith.constant 0 : i32
    %c0_i32_1 = arith.constant 0 : i32
    return %c0_i32, %c0_i32_0 : i32, i32
  }
  func.func @transform_1(%arg0: i32) -> (i32, i32) {
    %c0_i32 = arith.constant 0 : i32
    %c0_i32_0 = arith.constant 0 : i32
    %c0_i32_1 = arith.constant 0 : i32
    return %c0_i32, %c0_i32_0 : i32, i32
  }
  func.func @transform_2(%arg0: i32) -> (i32, i32) {
    %c0_i32 = arith.constant 0 : i32
    %c0_i32_0 = arith.constant 0 : i32
    %c0_i32_1 = arith.constant 0 : i32
    return %c0_i32, %c0_i32_0 : i32, i32
  }
  func.func @transform_3(%arg0: i32) -> (i32, i32, i32) {
    %c0_i32 = arith.constant 0 : i32
    %c0_i32_0 = arith.constant 0 : i32
    %c0_i32_1 = arith.constant 0 : i32
    %c0_i32_2 = arith.constant 0 : i32
    return %c0_i32, %c0_i32_0, %c0_i32_1 : i32, i32, i32
  }
  func.func @transform_4(%arg0: i32) -> (i32, i32, i32) {
    %c0_i32 = arith.constant 0 : i32
    %c0_i32_0 = arith.constant 0 : i32
    %c0_i32_1 = arith.constant 0 : i32
    %c0_i32_2 = arith.constant 0 : i32
    return %c0_i32, %c0_i32_0, %c0_i32_1 : i32, i32, i32
  }
  func.func @transform_5(%arg0: i32) -> (i32, i32, i32) {
    %c0_i32 = arith.constant 0 : i32
    %c0_i32_0 = arith.constant 0 : i32
    %c0_i32_1 = arith.constant 0 : i32
    %c0_i32_2 = arith.constant 0 : i32
    return %c0_i32, %c0_i32_0, %c0_i32_1 : i32, i32, i32
  }
  func.func @transform_6(%arg0: i32) -> (i32, i32, i32) {
    %c0_i32 = arith.constant 0 : i32
    %c0_i32_0 = arith.constant 0 : i32
    %c0_i32_1 = arith.constant 0 : i32
    %c0_i32_2 = arith.constant 0 : i32
    return %c0_i32, %c0_i32_0, %c0_i32_1 : i32, i32, i32
  }
  func.func @transform_7(%arg0: i32) -> (i32, i32, i32) {
    %c0_i32 = arith.constant 0 : i32
    %c0_i32_0 = arith.constant 0 : i32
    %c0_i32_1 = arith.constant 0 : i32
    %c0_i32_2 = arith.constant 0 : i32
    return %c0_i32, %c0_i32_0, %c0_i32_1 : i32, i32, i32
  }
  func.func @transform_8(%arg0: i32) -> (i32, i32, i32) {
    %c0_i32 = arith.constant 0 : i32
    %c0_i32_0 = arith.constant 0 : i32
    %c0_i32_1 = arith.constant 0 : i32
    %c0_i32_2 = arith.constant 0 : i32
    return %c0_i32, %c0_i32_0, %c0_i32_1 : i32, i32, i32
  }
  func.func @transform_9(%arg0: i32) -> (i32, i32) {
    %c0_i32 = arith.constant 0 : i32
    %c0_i32_0 = arith.constant 0 : i32
    %c0_i32_1 = arith.constant 0 : i32
    return %c0_i32, %c0_i32_0 : i32, i32
  }
  func.func @transform_10(%arg0: i32) -> (i32, i32) {
    %c0_i32 = arith.constant 0 : i32
    %c0_i32_0 = arith.constant 0 : i32
    %c0_i32_1 = arith.constant 0 : i32
    return %c0_i32, %c0_i32_0 : i32, i32
  }
  func.func @transform_11(%arg0: i32) -> (i32, i32) {
    %c0_i32 = arith.constant 0 : i32
    %c0_i32_0 = arith.constant 0 : i32
    %c0_i32_1 = arith.constant 0 : i32
    return %c0_i32, %c0_i32_0 : i32, i32
  }
}

</mosaic_0001>

<bundles_post_ra>
// kernel: cavmae_ft_multimodal.1
= control target key start
LH: loop header
LB: loop body
LE: loop exit
PB: predicated region body
PF: predicated region fallthrough
CT: control target
= control target key end

     0   :  { %s9392_s0 = inlined_call_operand.vmem [shape: bf16[16,1024], index: 0, kind: input, shape index: {}]   ;;  %s9393_s1 = inlined_call_operand.vmem [shape: bf16[1024,64], index: 1, kind: input, shape index: {}]   ;;  %s9394_s2 = inlined_call_operand.vmem [shape: f32[16,64], index: 2, kind: input, shape index: {}]   ;;  %s9395_s3 = inlined_call_operand.vmem [shape: bf16[5,64,192], index: 3, kind: input, shape index: {}]   ;;  %s9396_s4 = inlined_call_operand.vmem [shape: bf16[5,64,64], index: 4, kind: input, shape index: {}]   ;;  %s9397_s5 = inlined_call_operand.vmem [shape: bf16[5,64,256], index: 5, kind: input, shape index: {}]   ;;  %s9398_s6 = inlined_call_operand.vmem [shape: bf16[5,256,64], index: 6, kind: input, shape index: {}]   ;;  %s9399_s7 = inlined_call_operand.vmem [shape: f32[5,8,256], index: 7, kind: input, shape index: {}]   ;;  %s9400_s8 = inlined_call_operand.vmem [shape: f32[4,16,16], index: 8, kind: input, shape index: {}]   ;;  %s9401_s9 = inlined_call_operand.vmem [shape: f32[5,128], index: 9, kind: input, shape index: {}]   ;;  %s9402_s10 = inlined_call_operand.vmem [shape: bf16[64,128], index: 10, kind: input, shape index: {}]   ;;  %s9403_s11 = inlined_call_operand.hbm [shape: f32[2,128], index: 11, kind: output, shape index: {}]  }
   0x1   :  { %v7315_v0 = vld [vmem:[%s9393_s1 + $0x78] sm:$0xff]   ;;  %v7319_v4 = vld [vmem:[%s9393_s1 + $0x70] sm:$0xff]   ;;  %v7323_v8 = vld [vmem:[%s9393_s1 + $0x68] sm:$0xff]  }
   0x2   :  { %v7316_v1 = vld [vmem:[%s9393_s1 + $0xf8] sm:$0xff]   ;;  %6659 = vmatprep.subr.bf16.mxu0 %v7315_v0  ;;  %v7320_v5 = vld [vmem:[%s9393_s1 + $0xf0] sm:$0xff]   ;;  %v7324_v9 = vld [vmem:[%s9393_s1 + $0xe8] sm:$0xff]  }
   0x3   :  { %v7317_v2 = vld [vmem:[%s9393_s1 + $0x38] sm:$0xff]   ;;  %6681 = vmatprep.subr.bf16.mxu1 %v7316_v1  ;;  %v7321_v6 = vld [vmem:[%s9393_s1 + $0x30] sm:$0xff]   ;;  %v7325_v10 = vld [vmem:[%s9393_s1 + $0x28] sm:$0xff]  }
   0x4   :  { %v7318_v3 = vld [vmem:[%s9393_s1 + $0xb8] sm:$0xff]   ;;  %6660 = vmatpush3.bf16.msra.mxu0 %v7317_v2  ;;  %v7322_v7 = vld [vmem:[%s9393_s1 + $0xb0] sm:$0xff]   ;;  %v7326_v11 = vld [vmem:[%s9393_s1 + $0xa8] sm:$0xff]  }
   0x5   :  { %6682 = vmatpush3.bf16.msra.mxu1 %v7318_v3  ;;  %6661 = vmatprep.subr.bf16.mxu0 %v7319_v4  ;;  %v7327_v12 = vld [vmem:[%s9393_s1 + $0x60] sm:$0xff]   ;;  %v7331_v16 = vld [vmem:[%s9393_s1 + $0x58] sm:$0xff]   ;;  %v7335_v20 = vld [vmem:[%s9393_s1 + $0x50] sm:$0xff]  }
   0x6   :  { %6683 = vmatprep.subr.bf16.mxu1 %v7320_v5  ;;  %v7328_v13 = vld [vmem:[%s9393_s1 + $0xe0] sm:$0xff]   ;;  %v7332_v17 = vld [vmem:[%s9393_s1 + $0xd8] sm:$0xff]   ;;  %v7336_v21 = vld [vmem:[%s9393_s1 + $0xd0] sm:$0xff]  }
   0x7   :  { %v7329_v14 = vld [vmem:[%s9393_s1 + $0x20] sm:$0xff]   ;;  %v7333_v18 = vld [vmem:[%s9393_s1 + $0x18] sm:$0xff]   ;;  %v7337_v22 = vld [vmem:[%s9393_s1 + $0x10] sm:$0xff]  }
   0x8   :  { %6662 = vmatpush3.bf16.msra.mxu0 %v7321_v6  ;;  %v7330_v15 = vld [vmem:[%s9393_s1 + $0xa0] sm:$0xff]   ;;  %v7334_v19 = vld [vmem:[%s9393_s1 + $0x98] sm:$0xff]   ;;  %v7338_v23 = vld [vmem:[%s9393_s1 + $0x90] sm:$0xff]  }
   0x9   :  { %6684 = vmatpush3.bf16.msra.mxu1 %v7322_v7  ;;  %6663 = vmatprep.subr.bf16.mxu0 %v7323_v8  ;;  %v7339_v24 = vld [vmem:[%s9393_s1 + $0x48] sm:$0xff]   ;;  %v7343_v28 = vld [vmem:[%s9393_s1 + $0x40] sm:$0xff]   ;;  %v7347_v40 = vld [vmem:[%s9393_s1 + $0x178] sm:$0xff]  }
   0xa   :  { %6685 = vmatprep.subr.bf16.mxu1 %v7324_v9  ;;  %v7340_v25 = vld [vmem:[%s9393_s1 + $0xc8] sm:$0xff]   ;;  %v7344_v29 = vld [vmem:[%s9393_s1 + $0xc0] sm:$0xff]   ;;  %v7348_v41 = vld [vmem:[%s9393_s1 + $0x1f8] sm:$0xff]  }
   0xb   :  { %v7341_v26 = vld [vmem:[%s9393_s1 + $0x8] sm:$0xff]   ;;  %v7345_v30 = vld [vmem:[%s9393_s1] sm:$0xff]   ;;  %v7349_v42 = vld [vmem:[%s9393_s1 + $0x138] sm:$0xff]  }
   0xc   :  { %6664 = vmatpush3.bf16.msra.mxu0 %v7325_v10  ;;  %v7342_v27 = vld [vmem:[%s9393_s1 + $0x88] sm:$0xff]   ;;  %v7346_v31 = vld [vmem:[%s9393_s1 + $0x80] sm:$0xff]   ;;  %v7350_v43 = vld [vmem:[%s9393_s1 + $0x1b8] sm:$0xff]  }
   0xd   :  { %6686 = vmatpush3.bf16.msra.mxu1 %v7326_v11  ;;  %6665 = vmatprep.subr.bf16.mxu0 %v7327_v12  ;;  %v40_v32 = vld [vmem:[%s9392_s0] sm:$0xff]  ;;  %v41_v34 = vld [vmem:[%s9392_s0 + $0x8] sm:$0xff]  ;;  %v7351_v44 = vld [vmem:[%s9393_s1 + $0x170] sm:$0xff]  }
   0xe   :  { %6687 = vmatprep.subr.bf16.mxu1 %v7328_v13  ;;  %v44_v33 = vld [vmem:[%s9392_s0 + $0x20] sm:$0xff]  ;;  %v45_v37 = vld [vmem:[%s9392_s0 + $0x28] sm:$0xff]  ;;  %v7352_v45 = vld [vmem:[%s9393_s1 + $0x1f0] sm:$0xff]  }
   0xf   :  { %v6105_v35 = vcombine.low %v40_v32, %v44_v33  ;;  %v6106_v36 = vcombine.high %v40_v32, %v44_v33  ;;  %v6107_v38 = vcombine.low %v41_v34, %v45_v37  ;;  %v6108_v39 = vcombine.high %v41_v34, %v45_v37  ;;  %v7353_v46 = vld [vmem:[%s9393_s1 + $0x130] sm:$0xff]   ;;  %v7355_v48 = vld [vmem:[%s9393_s1 + $0x168] sm:$0xff]   ;;  %v7359_v52 = vld [vmem:[%s9393_s1 + $0x160] sm:$0xff]  }
  0x10   :  { %6666 = vmatpush3.bf16.msra.mxu0 %v7329_v14  ;;  %v7354_v47 = vld [vmem:[%s9393_s1 + $0x1b0] sm:$0xff]   ;;  %v7356_v49 = vld [vmem:[%s9393_s1 + $0x1e8] sm:$0xff]   ;;  %v7360_v53 = vld [vmem:[%s9393_s1 + $0x1e0] sm:$0xff]  }
  0x11   :  { %6688 = vmatpush3.bf16.msra.mxu1 %v7330_v15  ;;  %6667 = vmatprep.subr.bf16.mxu0 %v7331_v16  ;;  %v7357_v50 = vld [vmem:[%s9393_s1 + $0x128] sm:$0xff]   ;;  %v7361_v54 = vld [vmem:[%s9393_s1 + $0x120] sm:$0xff]   ;;  %v7363_v56 = vld [vmem:[%s9393_s1 + $0x158] sm:$0xff]  }
  0x12   :  { %6689 = vmatprep.subr.bf16.mxu1 %v7332_v17  ;;  %634 = vmatprep.mubr.bf16.mxu0 %v6106_v36  ;;  %v7358_v51 = vld [vmem:[%s9393_s1 + $0x1a8] sm:$0xff]   ;;  %v7362_v55 = vld [vmem:[%s9393_s1 + $0x1a0] sm:$0xff]   ;;  %v7364_v57 = vld [vmem:[%s9393_s1 + $0x1d8] sm:$0xff]  }
  0x13   :  { %675 = vmatprep.mubr.bf16.mxu1 %v6108_v39  ;;  %v7365_v58 = vld [vmem:[%s9393_s1 + $0x118] sm:$0xff]   ;;  %v7367_v60 = vld [vmem:[%s9393_s1 + $0x150] sm:$0xff]   ;;  %v7371_v0 = vld [vmem:[%s9393_s1 + $0x148] sm:$0xff]  }
  0x14   :  { %6668 = vmatpush3.bf16.msra.mxu0 %v7333_v18  ;;  %v7366_v59 = vld [vmem:[%s9393_s1 + $0x198] sm:$0xff]   ;;  %v7368_v61 = vld [vmem:[%s9393_s1 + $0x1d0] sm:$0xff]   ;;  %v7372_v1 = vld [vmem:[%s9393_s1 + $0x1c8] sm:$0xff]  }
  0x15   :  { %6690 = vmatpush3.bf16.msra.mxu1 %v7334_v19  ;;  %6669 = vmatprep.subr.bf16.mxu0 %v7335_v20  ;;  %v7369_v62 = vld [vmem:[%s9393_s1 + $0x110] sm:$0xff]   ;;  %v7373_v2 = vld [vmem:[%s9393_s1 + $0x108] sm:$0xff]   ;;  %v7375_v4 = vld [vmem:[%s9393_s1 + $0x140] sm:$0xff]  }
  0x16   :  { %6691 = vmatprep.subr.bf16.mxu1 %v7336_v21  ;;  %v7370_v63 = vld [vmem:[%s9393_s1 + $0x190] sm:$0xff]   ;;  %v7374_v3 = vld [vmem:[%s9393_s1 + $0x188] sm:$0xff]   ;;  %v7376_v5 = vld [vmem:[%s9393_s1 + $0x1c0] sm:$0xff]  }
  0x17   :  { %v7377_v6 = vld [vmem:[%s9393_s1 + $0x100] sm:$0xff]   ;;  %v42_v8 = vld [vmem:[%s9392_s0 + $0x10] sm:$0xff]  ;;  %v43_v12 = vld [vmem:[%s9392_s0 + $0x18] sm:$0xff] }
  0x18   :  { %6670 = vmatpush3.bf16.msra.mxu0 %v7337_v22  ;;  %v7378_v7 = vld [vmem:[%s9393_s1 + $0x180] sm:$0xff]   ;;  %v46_v9 = vld [vmem:[%s9392_s0 + $0x30] sm:$0xff]  ;;  %v47_v13 = vld [vmem:[%s9392_s0 + $0x38] sm:$0xff] }
  0x19   :  { %6692 = vmatpush3.bf16.msra.mxu1 %v7338_v23  ;;  %6671 = vmatprep.subr.bf16.mxu0 %v7339_v24  ;;  %v6109_v10 = vcombine.low %v42_v8, %v46_v9  ;;  %v6110_v11 = vcombine.high %v42_v8, %v46_v9  ;;  %v6111_v14 = vcombine.low %v43_v12, %v47_v13 }
  0x1a   :  { %6693 = vmatprep.subr.bf16.mxu1 %v7340_v25  ;;  %v6112_v15 = vcombine.high %v43_v12, %v47_v13 }
  0x1c   :  { %6672 = vmatpush3.bf16.msra.mxu0 %v7341_v26 }
  0x1d   :  { %6694 = vmatpush3.bf16.msra.mxu1 %v7342_v27  ;;  %6673 = vmatprep.subr.bf16.mxu0 %v7343_v28 }
  0x1e   :  { %6695 = vmatprep.subr.bf16.mxu1 %v7344_v29 }
  0x20   :  { %6674 = vmatpush3.bf16.msra.mxu0 %v7345_v30 }
  0x21   :  { %6696 = vmatpush3.bf16.msra.mxu1 %v7346_v31  ;;  %6703 = vmatprep.subr.bf16.mxu0 %v7347_v40 }
  0x22   :  { %6725 = vmatprep.subr.bf16.mxu1 %v7348_v41 }
  0x23   :  { %635 = vmatmul.mubr.bf16.vlgmr.msra.gmra.mxu0 %v6105_v35 }
  0x24   :  { %676 = vmatmul.mubr.bf16.vlgmr.msra.gmra.mxu1 %v6107_v38  ;;  %6704 = vmatpush3.bf16.msra.mxu0 %v7349_v42 }
  0x25   :  { %6726 = vmatpush3.bf16.msra.mxu1 %v7350_v43  ;;  %6705 = vmatprep.subr.bf16.mxu0 %v7351_v44 }
  0x26   :  { %6727 = vmatprep.subr.bf16.mxu1 %v7352_v45  ;;  %716 = vmatprep.mubr.bf16.mxu0 %v6110_v11 }
  0x27   :  { %757 = vmatprep.mubr.bf16.mxu1 %v6112_v15 }
  0x28   :  { %6706 = vmatpush3.bf16.msra.mxu0 %v7353_v46 }
  0x29   :  { %6728 = vmatpush3.bf16.msra.mxu1 %v7354_v47  ;;  %6707 = vmatprep.subr.bf16.mxu0 %v7355_v48 }
  0x2a   :  { %6729 = vmatprep.subr.bf16.mxu1 %v7356_v49 }
  0x2c   :  { %6708 = vmatpush3.bf16.msra.mxu0 %v7357_v50 }
  0x2d   :  { %6730 = vmatpush3.bf16.msra.mxu1 %v7358_v51  ;;  %6709 = vmatprep.subr.bf16.mxu0 %v7359_v52 }
  0x2e   :  { %6731 = vmatprep.subr.bf16.mxu1 %v7360_v53 }
  0x30   :  { %6710 = vmatpush3.bf16.msra.mxu0 %v7361_v54 }
  0x31   :  { %6732 = vmatpush3.bf16.msra.mxu1 %v7362_v55  ;;  %6711 = vmatprep.subr.bf16.mxu0 %v7363_v56 }
  0x32   :  { %6733 = vmatprep.subr.bf16.mxu1 %v7364_v57 }
  0x34   :  { %6712 = vmatpush3.bf16.msra.mxu0 %v7365_v58 }
  0x35   :  { %6734 = vmatpush3.bf16.msra.mxu1 %v7366_v59  ;;  %6713 = vmatprep.subr.bf16.mxu0 %v7367_v60 }
  0x36   :  { %6735 = vmatprep.subr.bf16.mxu1 %v7368_v61 }
  0x38   :  { %6714 = vmatpush3.bf16.msra.mxu0 %v7369_v62 }
  0x39   :  { %6736 = vmatpush3.bf16.msra.mxu1 %v7370_v63  ;;  %6715 = vmatprep.subr.bf16.mxu0 %v7371_v0 }
  0x3a   :  { %6737 = vmatprep.subr.bf16.mxu1 %v7372_v1 }
  0x3c   :  { %6716 = vmatpush3.bf16.msra.mxu0 %v7373_v2 }
  0x3d   :  { %6738 = vmatpush3.bf16.msra.mxu1 %v7374_v3  ;;  %6717 = vmatprep.subr.bf16.mxu0 %v7375_v4 }
  0x3e   :  { %6739 = vmatprep.subr.bf16.mxu1 %v7376_v5 }
  0x40   :  { %6718 = vmatpush3.bf16.msra.mxu0 %v7377_v6 }
  0x41   :  { %6740 = vmatpush3.bf16.msra.mxu1 %v7378_v7 }
  0x43   :  { %717 = vmatmul.mubr.bf16.vlgmr.msra.gmra.mxu0 %v6109_v10 }
  0x44   :  { %758 = vmatmul.mubr.bf16.vlgmr.msra.gmra.mxu1 %v6111_v14 }
  0x45   :  { %16 = vsyncpa [#allocation3], 0  ;;  %v177_v22 = vld [vmem:[%s9394_s2 + $0x8] sm:$0xff]  ;;  %v176_v30 = vld [vmem:[%s9394_s2] sm:$0xff]  ;;  %vm776_vm0 = vcmask 523264   ;;  %v7780_v60 = vmov 0   ;;  %v791_v4 = vlaneseq }
  0x46   :  { %v7379_v56 = vld [vmem:[%s9395_s3 + $0x30] ss:$8 sps:$4 sm:$0xff]   ;;  %v7381_v57 = vld [vmem:[%s9395_s3 + $0x34] ss:$8 sps:$4 sm:$0xff]   ;;  %v7384_v58 = vld [vmem:[%s9395_s3 + $0x24] ss:$8 sps:$4 sm:$0xff]   ;;  %893 = vmatprep.mubr.bf16.mxu0 %v7780_v60 }
  0x47   :  { %869 = vmatprep.subr.bf16.mxu0 %v7381_v57  ;;  %v7382_v59 = vld [vmem:[%s9395_s3 + $0x20] ss:$8 sps:$4 sm:$0xff]   ;;  %v7387_v61 = vld [vmem:[%s9395_s3 + $0x14] ss:$8 sps:$4 sm:$0xff]   ;;  %v7385_v62 = vld [vmem:[%s9395_s3 + $0x10] ss:$8 sps:$4 sm:$0xff]  }
  0x48   :  { %870 = vmatpush1.bf16.msra.mxu0 %v7379_v56  ;;  %v7390_v63 = vld [vmem:[%s9395_s3 + $0x4] ss:$8 sps:$4 sm:$0xff]   ;;  %v7388_v0 = vld [vmem:[%s9395_s3] ss:$8 sps:$4 sm:$0xff]   ;;  %v8106_v5 = vshrl.u32 %v791_v4, 7  ;;  %vm7782_vm1 = vmmov 0  }
  0x49   :  { %871 = vmatprep.subr.bf16.mxu0 %v7384_v58  ;;  %v8114_v7 = vld [vmem:[%s9399_s7] sm:$0xff]  ;;  %s7783_s1 = smov 112   ;;  %s7784_s28 = smov 64   ;;  %vm907_vm2 = vcmask 130048   ;;  %vm972_vm3 = vcmask 1043456   ;;  %vm956_vm4 = vcmask 64512  }
  0x4a   :  { %v8109_v6 = vsub.s32 0, %v8106_v5  ;;  %v8117_v8 = vsub.s32 1, %v8106_v5  ;;  %s7785_s0 = smov 48   ;;  %s7786_s29 = smov 32   ;;  %vm1366_vm5 = vcmask 261120   ;;  %vm1368_vm6 = vcmask 392192  }
  0x4b   :  { %s7787_s2 = smov 96   ;;  %s7788_s30 = smov 16   ;;  %vm5974_vm7 = vcmask 517120   ;;  %vm6078_vm8 = vcmask 1041408  }
  0x4c   :  { %872 = vmatpush1.bf16.msra.mxu0 %v7382_v59  ;;  %v794_v9 = vrot.slane %v8114_v7, %v8109_v6  ;;  %v799_v12 = vrot.slane %v8114_v7, %v8117_v8  ;;  %s7789_s12 = smov 80  }
  0x4d   :  { %873 = vmatprep.subr.bf16.mxu0 %v7387_v61 }
  0x50   :  { %874 = vmatpush1.bf16.msra.mxu0 %v7385_v62 }
  0x51   :  { %875 = vmatprep.subr.bf16.mxu0 %v7390_v63 }
  0x54   :  { %876 = vmatpush1.bf16.msra.mxu0 %v7388_v0 }
  0xe3   :  { %v6675_v16 = vpop.f32.mrf.mxu0 }
  0xe4   :  { %v6697_v17 = vpop.f32.mrf.mxu1 }
  0xe5   :  { %v6676_v18 = vpop.f32.mrf.mxu0 }
  0xe6   :  { %v6698_v19 = vpop.f32.mrf.mxu1  ;;  %v6677_v29 = vadd.f32 %v6676_v18, %v6675_v16  ;;  %v8125_v16 = vsub.s32 6, %v8106_v5 }
  0xe7   :  { %v6678_v20 = vpop.f32.mrf.mxu0  ;;  %v6699_v32 = vadd.f32 %v6698_v19, %v6697_v17  ;;  %v7781_v17 = vmov 0.0  }
  0xe8   :  { %v6700_v21 = vpop.f32.mrf.mxu1  ;;  %v637_v31 = vadd.f32 %v6677_v29, %v176_v30  ;;  %6970 = vmatprep.subr.bf16.mxu1 %v7781_v17  ;;  %6982 = vmatprep.subr.bf16.mxu0 %v7781_v17  ;;  %v813_v18 = vrot.slane %v8114_v7, %v8125_v16 }
  0xe9   :  { %v6679_v23 = vpop.f32.mrf.mxu0  ;;  %6972 = vmatprep.mubr.msk.bf16.mxu1 %vm7782_vm1, %v7781_v17 }
  0xea   :  { %v6680_v24 = vadd.f32 %v6679_v23, %v6678_v20  ;;  %v6701_v25 = vpop.f32.mrf.mxu1  ;;  %v678_v36 = vadd.f32 %v6699_v32, %v637_v31 }
  0xeb   :  { %v6702_v27 = vadd.f32 %v6701_v25, %v6700_v21  ;;  %v8145_v25 = vld [vmem:[%s9399_s7 + $0x8] sm:$0xff] }
  0xec   :  { %v640_v26 = vadd.f32 %v6680_v24, %v177_v22 }
  0xee   :  { %v681_v28 = vadd.f32 %v6702_v27, %v640_v26  ;;  %v817_v26 = vrot.slane %v8145_v25, %v8125_v16 }
 0x103   :  { %v6719_v33 = vpop.f32.mrf.mxu0 }
 0x104   :  { %v6741_v34 = vpop.f32.mrf.mxu1 }
 0x105   :  { %v6720_v35 = vpop.f32.mrf.mxu0 }
 0x106   :  { %v6721_v37 = vadd.f32 %v6720_v35, %v6719_v33  ;;  %v6742_v38 = vpop.f32.mrf.mxu1 }
 0x107   :  { %v6722_v39 = vpop.f32.mrf.mxu0  ;;  %v6743_v41 = vadd.f32 %v6742_v38, %v6741_v34 }
 0x108   :  { %v719_v40 = vadd.f32 %v6721_v37, %v678_v36  ;;  %v6744_v42 = vpop.f32.mrf.mxu1 }
 0x109   :  { %v6723_v43 = vpop.f32.mrf.mxu0 }
 0x10a   :  { %v8073_v44 = vadd.f32 %v6743_v41, %v719_v40  ;;  %v6724_v45 = vadd.f32 %v6723_v43, %v6722_v39  ;;  %v6745_v46 = vpop.f32.mrf.mxu1 }
 0x10b   :  { %v6746_v48 = vadd.f32 %v6745_v46, %v6744_v42  ;;  %v8177_v42 = vld [vmem:[%s9400_s8] sm:$0xff] }
 0x10c   :  { %v722_v47 = vadd.f32 %v6724_v45, %v681_v28  ;;  %v777_v49 = vsel %vm776_vm0, %v8073_v44, 0.0 }
 0x10d   :  { %778 = vadd.xlane.f32.xlu0 %v777_v49 }
 0x10e   :  { %v8077_v50 = vadd.f32 %v6746_v48, %v722_v47 }
 0x196   :  { %v779_v51 = vpop.xlane.xlu0 %778 }
 0x197   :  { %v781_v52 = vmul.f32 0.015625, %v779_v51 }
 0x199   :  { %v782_v53 = vsub.f32 %v8073_v44, %v781_v52 }
 0x19b   :  { %v783_v54 = vmul.f32 %v782_v53, %v782_v53 }
 0x19d   :  { %v784_v55 = vsel %vm776_vm0, %v783_v54, 0.0 }
 0x19e   :  { %785 = vadd.xlane.f32.xlu0 %v784_v55 }
 0x227   :  { %v786_v1 = vpop.xlane.xlu0 %785 }
 0x228   :  { %v787_v2 = vmul.f32 0.015625, %v786_v1 }
 0x22a   :  { %v788_v3 = vadd.f32 1e-05, %v787_v2 }
 0x22c   :  { %7603 = vrsqrt.f32 %v788_v3 }
 0x239   :  { %v7604_v10 = vpop.eup %7603 }
 0x23a   :  { %v790_v11 = vmul.f32 %v7604_v10, %v782_v53 }
 0x23c   :  { %v795_v13 = vmul.f32 %v794_v9, %v790_v11 }
 0x23e   :  { %v800_v14 = vadd.f32 %v799_v12, %v795_v13 }
 0x240   :  { %v801_v15 = vpack.c.bf16 %v800_v14, %v800_v14 }
 0x242   :  { %6189 = vmatmul.mubr.msk.bf16.vlgmr.msra.gmra.mxu0 %vm776_vm0, %v801_v15 }
 0x243   :  { %6984 = vmatprep.mubr.msk.bf16.mxu0 %vm7782_vm1, %v7781_v17 }
 0x302   :  { %v895_v19 = vpop.f32.mrf.mxu0 }
 0x303   :  { %v896_v20 = vadd.f32 %v895_v19, %v813_v18 }
 0x304   :  { %v897_v21 = vpop.f32.mrf.mxu0 }
 0x305   :  { %v902_v22 = vpack.c.bf16 %v896_v20, %v896_v20  ;;  %v898_v28 = vadd.f32 %v897_v21, %v817_v26 }
 0x306   :  { %v899_v23 = vpop.f32.mrf.mxu0 }
 0x307   :  { %1016 = vrot.lane.b32.xlu0 %v902_v22, %s7783_s1  ;;  %905 = vrot.lane.b32.xlu1 %v902_v22, %s7784_s28  ;;  %v8151_v31 = vpack.c.bf16 %v898_v28, %v898_v28 }
 0x308   :  { %v900_v24 = vpop.f32.mrf.mxu0 }
 0x309   :  { %v974_v34 = vsel %vm972_vm3, %v8151_v31, 0 }
 0x30b   :  { %1018 = vrot.lane.b32.xlu1 %v902_v22, %s7785_s0 }
 0x30f   :  { %1131 = vrot.lane.b32.xlu1 %v902_v22, %s7786_s29 }
 0x313   :  { %1129 = vrot.lane.b32.xlu1 %v902_v22, %s7787_s2 }
 0x317   :  { %1243 = vrot.lane.b32.xlu1 %v902_v22, %s7788_s30 }
 0x31b   :  { %1241 = vrot.lane.b32.xlu1 %v902_v22, %s7789_s12 }
 0x379   :  { %v906_v27 = vpop.permute.xlu1 %905  ;;  %v1017_v35 = vpop.permute.xlu0 %1016 }
 0x37a   :  { %v912_v29 = vsel %vm907_vm2, %v906_v27, 0 }
 0x37b   :  { %6971 = vmatpush3.bf16.xpose.msra.mxu1 %v912_v29 }
 0x37c   :  { %6976 = vmatprep.subr.bf16.mxu1 %v7781_v17 }
 0x37d   :  { %v1019_v30 = vpop.permute.xlu1 %1018 }
 0x37e   :  { %v1024_v32 = vsel %vm907_vm2, %v1019_v30, 0 }
 0x37f   :  { %6983 = vmatpush3.bf16.xpose.msra.mxu0 %v1024_v32 }
 0x380   :  { %6994 = vmatprep.subr.bf16.mxu0 %v7781_v17 }
 0x381   :  { %v1132_v33 = vpop.permute.xlu1 %1131 }
 0x382   :  { %6973 = vmatmul.mubr.msk.bf16.vlgmr.msra.gmra.mxu1 %vm907_vm2, %v902_v22  ;;  %v1137_v37 = vsel %vm907_vm2, %v1132_v33, 0 }
 0x383   :  { %6977 = vmatpush3.bf16.msra.mxu1 %v974_v34  ;;  %6978 = vmatprep.mubr.msk.bf16.mxu1 %vm7782_vm1, %v7781_v17 }
 0x384   :  { %6988 = vmatprep.subr.bf16.mxu1 %v7781_v17 }
 0x385   :  { %v1130_v36 = vpop.permute.xlu1 %1129 }
 0x386   :  { %6985 = vmatmul.mubr.msk.bf16.vlgmr.msra.gmra.mxu0 %vm907_vm2, %v1017_v35 }
 0x387   :  { %6995 = vmatpush3.bf16.xpose.msra.mxu0 %v1137_v37  ;;  %6996 = vmatprep.mubr.msk.bf16.mxu0 %vm7782_vm1, %v7781_v17 }
 0x388   :  { %7006 = vmatprep.subr.bf16.mxu0 %v7781_v17 }
 0x389   :  { %v1244_v38 = vpop.permute.xlu1 %1243 }
 0x38a   :  { %v1249_v39 = vsel %vm907_vm2, %v1244_v38, 0 }
 0x38d   :  { %v1242_v40 = vpop.permute.xlu1 %1241 }
 0x38e   :  { %6997 = vmatmul.mubr.msk.bf16.vlgmr.msra.gmra.mxu0 %vm907_vm2, %v1130_v36 }
 0x38f   :  { %7007 = vmatpush3.bf16.xpose.msra.mxu0 %v1249_v39  ;;  %7008 = vmatprep.mubr.msk.bf16.mxu0 %vm7782_vm1, %v7781_v17 }
 0x390   :  { %7018 = vmatprep.subr.bf16.mxu0 %v7781_v17 }
 0x396   :  { %7009 = vmatmul.mubr.msk.bf16.vlgmr.msra.gmra.mxu0 %vm907_vm2, %v1242_v40 }
 0x397   :  { %7026 = vmatprep.mubr.msk.bf16.mxu0 %vm7782_vm1, %v7781_v17 }
 0x442   :  { %v948_v41 = vpop.f32.mrf.mxu1 }
 0x443   :  { %v954_v43 = vmul.f32 0.25, %v948_v41 }
 0x444   :  { %v6974_v45 = vpop.f32.mrf.mxu1 }
 0x445   :  { %v955_v46 = vadd.f32 %v954_v43, %v8177_v42 }
 0x446   :  { %v951_v47 = vpop.f32.mrf.mxu1  ;;  %v1060_v48 = vpop.f32.mrf.mxu0 }
 0x447   :  { %v1066_v49 = vmul.f32 0.25, %v1060_v48  ;;  %v957_v51 = vsel %vm956_vm4, %v955_v46, -inf }
 0x448   :  { %958 = vmax.xlane.f32.xlu1 %v957_v51  ;;  %v6975_v52 = vpop.f32.mrf.mxu1  ;;  %v6986_v53 = vpop.f32.mrf.mxu0 }
 0x449   :  { %v1067_v54 = vadd.f32 %v1066_v49, %v8177_v42 }
 0x44a   :  { %v1063_v55 = vpop.f32.mrf.mxu0 }
 0x44b   :  { %v1068_v56 = vsel %vm956_vm4, %v1067_v54, -inf }
 0x44c   :  { %1069 = vmax.xlane.f32.xlu0 %v1068_v56  ;;  %v6987_v57 = vpop.f32.mrf.mxu0 }
 0x44e   :  { %v1173_v58 = vpop.f32.mrf.mxu0 }
 0x44f   :  { %v1179_v59 = vmul.f32 0.25, %v1173_v58 }
 0x450   :  { %v6998_v61 = vpop.f32.mrf.mxu0 }
 0x451   :  { %v1180_v62 = vadd.f32 %v1179_v59, %v8177_v42 }
 0x452   :  { %v1176_v63 = vpop.f32.mrf.mxu0 }
 0x453   :  { %v1181_v0 = vsel %vm956_vm4, %v1180_v62, -inf }
 0x454   :  { %1182 = vmax.xlane.f32.xlu1 %v1181_v0  ;;  %v6999_v1 = vpop.f32.mrf.mxu0 }
 0x456   :  { %v1285_v2 = vpop.f32.mrf.mxu0 }
 0x457   :  { %v1291_v3 = vmul.f32 0.25, %v1285_v2 }
 0x458   :  { %v7010_v4 = vpop.f32.mrf.mxu0 }
 0x459   :  { %v1292_v9 = vadd.f32 %v1291_v3, %v8177_v42 }
 0x45a   :  { %v1288_v10 = vpop.f32.mrf.mxu0 }
 0x45b   :  { %v1293_v11 = vsel %vm956_vm4, %v1292_v9, -inf }
 0x45c   :  { %1294 = vmax.xlane.f32.xlu0 %v1293_v11  ;;  %v7011_v12 = vpop.f32.mrf.mxu0  ;;  %v7392_v11 = vld [vmem:[%s9396_s4 + $0x10] sm:$0xff]  }
 0x45d   :  { %v7393_v12 = vld [vmem:[%s9396_s4 + $0x8] sm:$0xff]  }
 0x4d1   :  { %v959_v13 = vpop.xlane.xlu1 %958 }
 0x4d2   :  { %v960_v14 = vsub.f32 %v955_v46, %v959_v13  ;;  %v7394_v13 = vld [vmem:[%s9396_s4] sm:$0xff]  }
 0x4d4   :  { %v961_v15 = vmul.f32 1.442695, %v960_v14 }
 0x4d5   :  { %v1070_v18 = vpop.xlane.xlu0 %1069 }
 0x4d6   :  { %7605 = vpow2.f32 %v961_v15  ;;  %v1071_v19 = vsub.f32 %v1067_v54, %v1070_v18 }
 0x4d8   :  { %v1072_v20 = vmul.f32 1.442695, %v1071_v19 }
 0x4da   :  { %7607 = vpow2.f32 %v1072_v20 }
 0x4dd   :  { %v1183_v32 = vpop.xlane.xlu1 %1182 }
 0x4de   :  { %v1184_v33 = vsub.f32 %v1180_v62, %v1183_v32  ;;  %v7391_v62 = vld [vmem:[%s9396_s4 + $0x18] sm:$0xff]  }
 0x4df   :  { %7019 = vmatpush3.bf16.msra.mxu0 %v7391_v62 }
 0x4e0   :  { %v1185_v34 = vmul.f32 1.442695, %v1184_v33  ;;  %7020 = vmatprep.subr.bf16.mxu0 %v7781_v17  ;;  %v8236_v33 = vsub.s32 4, %v8106_v5 }
 0x4e3   :  { %v7606_v21 = vpop.eup %7605  ;;  %7021 = vmatpush3.bf16.msra.mxu0 %v7392_v11  ;;  %v7409_v11 = vld [vmem:[%s9398_s6 + $0x70] sm:$0xff]  }
 0x4e4   :  { %v963_v22 = vsel %vm956_vm4, %v7606_v21, 0.0  ;;  %7022 = vmatprep.subr.bf16.mxu0 %v7781_v17 }
 0x4e5   :  { %v1295_v23 = vpop.xlane.xlu0 %1294  ;;  %964 = vadd.xlane.f32.xlu1 %v963_v22 }
 0x4e6   :  { %v1296_v24 = vsub.f32 %v1292_v9, %v1295_v23 }
 0x4e7   :  { %v7608_v26 = vpop.eup %7607  ;;  %7023 = vmatpush3.bf16.msra.mxu0 %v7393_v12  ;;  %v7410_v12 = vld [vmem:[%s9398_s6 + $0x30] sm:$0xff]  }
 0x4e8   :  { %v1297_v27 = vmul.f32 1.442695, %v1296_v24  ;;  %v1074_v28 = vsel %vm956_vm4, %v7608_v26, 0.0  ;;  %7024 = vmatprep.subr.bf16.mxu0 %v7781_v17 }
 0x4e9   :  { %1075 = vadd.xlane.f32.xlu0 %v1074_v28 }
 0x4ea   :  { %7609 = vpow2.f32 %v1297_v27 }
 0x4eb   :  { %7611 = vpow2.f32 %v1185_v34  ;;  %7025 = vmatpush3.bf16.msra.mxu0 %v7394_v13  ;;  %v1382_v34 = vrot.slane %v8114_v7, %v8236_v33  ;;  %v7411_v13 = vld [vmem:[%s9398_s6 + $0x68] sm:$0xff]  }
 0x4f6   :  { %1081 = vrot.lane.b32.xlu1 %v8151_v31, %s7783_s1 }
 0x4f7   :  { %v7610_v29 = vpop.eup %7609 }
 0x4f8   :  { %v1299_v30 = vsel %vm956_vm4, %v7610_v29, 0.0  ;;  %v7612_v35 = vpop.eup %7611 }
 0x4f9   :  { %1300 = vadd.xlane.f32.xlu0 %v1299_v30  ;;  %v1187_v36 = vsel %vm956_vm4, %v7612_v35, 0.0 }
 0x50f   :  { %1193 = vrot.lane.b32.xlu0 %v8151_v31, %s7787_s2 }
 0x51a   :  { %1188 = vadd.xlane.f32.xlu1 %v1187_v36 }
 0x52b   :  { %1305 = vrot.lane.b32.xlu1 %v8151_v31, %s7789_s12 }
 0x56e   :  { %v965_v37 = vpop.xlane.xlu1 %964 }
 0x56f   :  { %7613 = vrcp.f32 %v965_v37 }
 0x572   :  { %v1076_v38 = vpop.xlane.xlu0 %1075  ;;  %v1082_v41 = vpop.permute.xlu1 %1081 }
 0x573   :  { %7615 = vrcp.f32 %v1076_v38  ;;  %v1087_v46 = vsel %vm972_vm3, %v1082_v41, 0 }
 0x57c   :  { %v7614_v39 = vpop.eup %7613 }
 0x57d   :  { %v967_v40 = vmul.f32 %v7614_v39, %v7606_v21 }
 0x57f   :  { %v968_v43 = vpack.c.bf16 %v967_v40, %v967_v40 }
 0x580   :  { %v7616_v45 = vpop.eup %7615 }
 0x581   :  { %6979 = vmatmul.mubr.msk.bf16.vlgmr.msra.gmra.mxu1 %vm956_vm4, %v968_v43  ;;  %v1078_v31 = vmul.f32 %v7616_v45, %v7608_v26 }
 0x582   :  { %6989 = vmatpush3.bf16.msra.mxu1 %v1087_v46  ;;  %v1301_v47 = vpop.xlane.xlu0 %1300  ;;  %6990 = vmatprep.mubr.msk.bf16.mxu1 %vm7782_vm1, %v7781_v17 }
 0x583   :  { %7000 = vmatprep.subr.bf16.mxu1 %v7781_v17  ;;  %v1079_v51 = vpack.c.bf16 %v1078_v31, %v1078_v31 }
 0x586   :  { %v1194_v48 = vpop.permute.xlu0 %1193 }
 0x587   :  { %v1199_v49 = vsel %vm972_vm3, %v1194_v48, 0  ;;  %v7395_v48 = vld [vmem:[%s9397_s5 + $0x30] ss:$8 sps:$4 sm:$0xff]  }
 0x589   :  { %6991 = vmatmul.mubr.msk.bf16.vlgmr.msra.gmra.mxu1 %vm956_vm4, %v1079_v51  ;;  %v7398_v51 = vld [vmem:[%s9397_s5 + $0x20] ss:$8 sps:$4 sm:$0xff]  }
 0x58a   :  { %7001 = vmatpush3.bf16.msra.mxu1 %v1199_v49  ;;  %7002 = vmatprep.mubr.msk.bf16.mxu1 %vm7782_vm1, %v7781_v17  ;;  %v7400_v49 = vld [vmem:[%s9397_s5 + $0x24] ss:$8 sps:$4 sm:$0xff]  }
 0x58b   :  { %7012 = vmatprep.subr.bf16.mxu1 %v7781_v17 }
 0x5a3   :  { %v1189_v52 = vpop.xlane.xlu1 %1188 }
 0x5a4   :  { %7617 = vrcp.f32 %v1189_v52  ;;  %v7403_v52 = vld [vmem:[%s9397_s5 + $0x14] ss:$8 sps:$4 sm:$0xff]  }
 0x5a5   :  { %7619 = vrcp.f32 %v1301_v47 }
 0x5a7   :  { %v1306_v55 = vpop.permute.xlu1 %1305 }
 0x5a8   :  { %v1311_v58 = vsel %vm972_vm3, %v1306_v55, 0  ;;  %v7404_v55 = vld [vmem:[%s9397_s5] ss:$8 sps:$4 sm:$0xff]  }
 0x5b1   :  { %v7618_v53 = vpop.eup %7617 }
 0x5b2   :  { %v1191_v54 = vmul.f32 %v7618_v53, %v7612_v35  ;;  %v7620_v57 = vpop.eup %7619  ;;  %v7401_v53 = vld [vmem:[%s9397_s5 + $0x10] ss:$8 sps:$4 sm:$0xff]  }
 0x5b3   :  { %v1303_v59 = vmul.f32 %v7620_v57, %v7610_v29 }
 0x5b4   :  { %v1192_v56 = vpack.c.bf16 %v1191_v54, %v1191_v54  ;;  %v7406_v54 = vld [vmem:[%s9397_s5 + $0x4] ss:$8 sps:$4 sm:$0xff]  }
 0x5b5   :  { %v1304_v61 = vpack.c.bf16 %v1303_v59, %v1303_v59  ;;  %v8272_v59 = vsub.s32 2, %v8106_v5 }
 0x5b6   :  { %7003 = vmatmul.mubr.msk.bf16.vlgmr.msra.gmra.mxu1 %vm956_vm4, %v1192_v56 }
 0x5b7   :  { %7013 = vmatpush3.bf16.msra.mxu1 %v1311_v58  ;;  %7014 = vmatprep.mubr.msk.bf16.mxu1 %vm7782_vm1, %v7781_v17  ;;  %v1467_v62 = vrot.slane %v8114_v7, %v8272_v59 }
 0x5be   :  { %7015 = vmatmul.mubr.msk.bf16.vlgmr.msra.gmra.mxu1 %vm956_vm4, %v1304_v61  ;;  %v8275_v61 = vsub.s32 3, %v8106_v5 }
 0x5bf   :  { %1566 = vmatprep.mubr.bf16.mxu1 %v7780_v60 }
 0x641   :  { %v1010_v63 = vpop.f32.mrf.mxu1 }
 0x643   :  { %v6980_v0 = vpop.f32.mrf.mxu1 }
 0x645   :  { %v1013_v1 = vpop.f32.mrf.mxu1 }
 0x646   :  { %v1472_v1 = vrot.slane %v8114_v7, %v8275_v61 }
 0x647   :  { %v6981_v2 = vpop.f32.mrf.mxu1 }
 0x649   :  { %v1123_v3 = vpop.f32.mrf.mxu1 }
 0x64a   :  { %1354 = vrot.lane.b32.xlu1 %v1123_v3, %s7788_s30 }
 0x64b   :  { %v6992_v4 = vpop.f32.mrf.mxu1 }
 0x64d   :  { %v1126_v9 = vpop.f32.mrf.mxu1 }
 0x64e   :  { %v7407_v9 = vld [vmem:[%s9398_s6 + $0x78] sm:$0xff]  }
 0x64f   :  { %v6993_v10 = vpop.f32.mrf.mxu1  ;;  %6768 = vmatprep.subr.bf16.mxu0 %v7407_v9 }
 0x650   :  { %v7408_v10 = vld [vmem:[%s9398_s6 + $0x38] sm:$0xff]  }
 0x676   :  { %v1235_v14 = vpop.f32.mrf.mxu1 }
 0x677   :  { %1358 = vrot.lane.b32.xlu0 %v1235_v14, %s7786_s29  ;;  %v7412_v14 = vld [vmem:[%s9398_s6 + $0x28] sm:$0xff]  }
 0x678   :  { %v7004_v15 = vpop.f32.mrf.mxu1 }
 0x679   :  { %v7413_v15 = vld [vmem:[%s9398_s6 + $0x60] sm:$0xff]  }
 0x67a   :  { %v1238_v18 = vpop.f32.mrf.mxu1 }
 0x67b   :  { %v7414_v18 = vld [vmem:[%s9398_s6 + $0x20] sm:$0xff]  }
 0x67c   :  { %v7005_v19 = vpop.f32.mrf.mxu1 }
 0x67d   :  { %v7415_v19 = vld [vmem:[%s9398_s6 + $0x58] sm:$0xff]  }
 0x67e   :  { %v1347_v20 = vpop.f32.mrf.mxu1 }
 0x67f   :  { %1362 = vrot.lane.b32.xlu1 %v1347_v20, %s7785_s0  ;;  %v7416_v20 = vld [vmem:[%s9398_s6 + $0x18] sm:$0xff]  }
 0x680   :  { %v7016_v21 = vpop.f32.mrf.mxu1 }
 0x681   :  { %v7417_v21 = vld [vmem:[%s9398_s6 + $0x50] sm:$0xff]  }
 0x682   :  { %v1350_v22 = vpop.f32.mrf.mxu1 }
 0x683   :  { %v7418_v22 = vld [vmem:[%s9398_s6 + $0x10] sm:$0xff]  }
 0x684   :  { %v7017_v23 = vpop.f32.mrf.mxu1 }
 0x685   :  { %v7419_v23 = vld [vmem:[%s9398_s6 + $0x48] sm:$0xff]  }
 0x6bc   :  { %v1355_v24 = vpop.permute.xlu1 %1354 }
 0x6bd   :  { %v1365_v27 = vsel %vm907_vm2, %v1010_v63, %v1355_v24  ;;  %v7420_v24 = vld [vmem:[%s9398_s6 + $0x8] sm:$0xff]  }
 0x6e9   :  { %v1359_v26 = vpop.permute.xlu0 %1358 }
 0x6ea   :  { %v1367_v28 = vsel %vm1366_vm5, %v1365_v27, %v1359_v26  ;;  %v7421_v26 = vld [vmem:[%s9398_s6 + $0x40] sm:$0xff]  }
 0x6eb   :  { %v7422_v27 = vld [vmem:[%s9398_s6] sm:$0xff]  }
 0x6f1   :  { %v1363_v29 = vpop.permute.xlu1 %1362 }
 0x6f2   :  { %v1369_v30 = vsel %vm1368_vm6, %v1367_v28, %v1363_v29  ;;  %v8333_v28 = vsub.s32 7, %v8106_v5 }
 0x6f3   :  { %v1370_v32 = vpack.c.bf16 %v1369_v30, %v1369_v30 }
 0x6f4   :  { %v1486_v29 = vrot.slane %v8114_v7, %v8333_v28  ;;  %v1490_v30 = vrot.slane %v8145_v25, %v8333_v28 }
 0x6f5   :  { %7027 = vmatmul.mubr.msk.bf16.vlgmr.msra.gmra.mxu0 %vm776_vm0, %v1370_v32 }
 0x6f6   :  { %6769 = vmatpush3.bf16.msra.mxu0 %v7408_v10 }
 0x6f7   :  { %6770 = vmatprep.subr.bf16.mxu0 %v7409_v11 }
 0x6fa   :  { %6771 = vmatpush3.bf16.msra.mxu0 %v7410_v12 }
 0x6fb   :  { %6772 = vmatprep.subr.bf16.mxu0 %v7411_v13 }
 0x6fe   :  { %6773 = vmatpush3.bf16.msra.mxu0 %v7412_v14 }
 0x6ff   :  { %6774 = vmatprep.subr.bf16.mxu0 %v7413_v15 }
 0x702   :  { %6775 = vmatpush3.bf16.msra.mxu0 %v7414_v18 }
 0x703   :  { %6776 = vmatprep.subr.bf16.mxu0 %v7415_v19  ;;  %v7428_v19 = vld [vmem:[%s9395_s3 + $0x64] ss:$8 sps:$4 sm:$0xff]  }
 0x706   :  { %6777 = vmatpush3.bf16.msra.mxu0 %v7416_v20  ;;  %v7426_v20 = vld [vmem:[%s9395_s3 + $0x60] ss:$8 sps:$4 sm:$0xff]  }
 0x707   :  { %6778 = vmatprep.subr.bf16.mxu0 %v7417_v21  ;;  %v7431_v21 = vld [vmem:[%s9395_s3 + $0x54] ss:$8 sps:$4 sm:$0xff]  }
 0x70a   :  { %6779 = vmatpush3.bf16.msra.mxu0 %v7418_v22  ;;  %v7429_v22 = vld [vmem:[%s9395_s3 + $0x50] ss:$8 sps:$4 sm:$0xff]  }
 0x70b   :  { %6780 = vmatprep.subr.bf16.mxu0 %v7419_v23  ;;  %v7434_v23 = vld [vmem:[%s9395_s3 + $0x44] ss:$8 sps:$4 sm:$0xff]  }
 0x70e   :  { %6781 = vmatpush3.bf16.msra.mxu0 %v7420_v24  ;;  %v7432_v24 = vld [vmem:[%s9395_s3 + $0x40] ss:$8 sps:$4 sm:$0xff]  }
 0x70f   :  { %6782 = vmatprep.subr.bf16.mxu0 %v7421_v26 }
 0x712   :  { %6783 = vmatpush3.bf16.msra.mxu0 %v7422_v27 }
 0x713   :  { %7042 = vmatprep.subr.bf16.mxu0 %v7781_v17 }
 0x7b5   :  { %v1444_v35 = vpop.f32.mrf.mxu0 }
 0x7b6   :  { %v1445_v36 = vadd.f32 %v1444_v35, %v1382_v34 }
 0x7b7   :  { %v7028_v37 = vpop.f32.mrf.mxu0 }
 0x7b8   :  { %v8241_v38 = vadd.f32 %v1445_v36, %v8073_v44  ;;  %v7397_v44 = vld [vmem:[%s9397_s5 + $0x34] ss:$8 sps:$4 sm:$0xff]  }
 0x7b9   :  { %v1447_v39 = vpop.f32.mrf.mxu0  ;;  %1542 = vmatprep.subr.bf16.mxu1 %v7397_v44 }
 0x7ba   :  { %v1451_v40 = vsel %vm776_vm0, %v8241_v38, 0.0  ;;  %1543 = vmatpush1.bf16.msra.mxu1 %v7395_v48 }
 0x7bb   :  { %1452 = vadd.xlane.f32.xlu0 %v1451_v40  ;;  %v7029_v41 = vpop.f32.mrf.mxu0  ;;  %1544 = vmatprep.subr.bf16.mxu1 %v7400_v49 }
 0x7be   :  { %1545 = vmatpush1.bf16.msra.mxu1 %v7398_v51 }
 0x7bf   :  { %1546 = vmatprep.subr.bf16.mxu1 %v7403_v52 }
 0x7c2   :  { %1547 = vmatpush1.bf16.msra.mxu1 %v7401_v53 }
 0x7c3   :  { %1548 = vmatprep.subr.bf16.mxu1 %v7406_v54 }
 0x7c6   :  { %1549 = vmatpush1.bf16.msra.mxu1 %v7404_v55 }
 0x844   :  { %v1453_v43 = vpop.xlane.xlu0 %1452 }
 0x845   :  { %v1454_v45 = vmul.f32 0.015625, %v1453_v43 }
 0x847   :  { %v1455_v46 = vsub.f32 %v8241_v38, %v1454_v45 }
 0x849   :  { %v1456_v47 = vmul.f32 %v1455_v46, %v1455_v46 }
 0x84b   :  { %v1457_v31 = vsel %vm776_vm0, %v1456_v47, 0.0 }
 0x84c   :  { %1458 = vadd.xlane.f32.xlu1 %v1457_v31 }
 0x8d5   :  { %v1459_v56 = vpop.xlane.xlu1 %1458 }
 0x8d6   :  { %v1460_v57 = vmul.f32 0.015625, %v1459_v56 }
 0x8d8   :  { %v1461_v58 = vadd.f32 1e-05, %v1460_v57 }
 0x8da   :  { %7621 = vrsqrt.f32 %v1461_v58 }
 0x8e7   :  { %v7622_v63 = vpop.eup %7621 }
 0x8e8   :  { %v1463_v0 = vmul.f32 %v7622_v63, %v1455_v46  ;;  %v8342_v63 = vsub.s32 5, %v8106_v5 }
 0x8ea   :  { %v1468_v2 = vmul.f32 %v1467_v62, %v1463_v0 }
 0x8ec   :  { %v1473_v3 = vadd.f32 %v1472_v1, %v1468_v2  ;;  %v1630_v1 = vrot.slane %v8114_v7, %v8342_v63  ;;  %v7423_v7 = vld [vmem:[%s9395_s3 + $0x70] ss:$8 sps:$4 sm:$0xff]  }
 0x8ee   :  { %v1474_v4 = vpack.c.bf16 %v1473_v3, %v1473_v3 }
 0x8f0   :  { %6211 = vmatmul.mubr.msk.bf16.vlgmr.msra.gmra.mxu1 %vm776_vm0, %v1474_v4 }
 0x8f1   :  { %1887 = vmatprep.mubr.bf16.mxu1 %v7780_v60 }
 0x9b0   :  { %v1568_v32 = vpop.f32.mrf.mxu1 }
 0x9b1   :  { %v1569_v34 = vadd.f32 %v1568_v32, %v1486_v29 }
 0x9b2   :  { %v1570_v35 = vpop.f32.mrf.mxu1 }
 0x9b3   :  { %v1575_v36 = vmul.f32 %v1569_v34, %v1569_v34  ;;  %v1571_v37 = vadd.f32 %v1570_v35, %v1490_v30  ;;  %v8381_v30 = vld [vmem:[%s9399_s7 + $0x10] sm:$0xff] }
 0x9b4   :  { %v1572_v39 = vpop.f32.mrf.mxu1  ;;  %v1787_v32 = vrot.slane %v8381_v30, %v8109_v6 }
 0x9b5   :  { %v1577_v40 = vmul.f32 %v1575_v36, %v1569_v34  ;;  %v1576_v41 = vmul.f32 %v1571_v37, %v1571_v37  ;;  %v1792_v36 = vrot.slane %v8381_v30, %v8117_v8 }
 0x9b6   :  { %v1573_v43 = vpop.f32.mrf.mxu1 }
 0x9b7   :  { %v1579_v45 = vmul.f32 0.044715, %v1577_v40  ;;  %v1578_v46 = vmul.f32 %v1576_v41, %v1571_v37  ;;  %v1807_v41 = vrot.slane %v8381_v30, %v8125_v16 }
 0x9b9   :  { %v1581_v47 = vadd.f32 %v1579_v45, %v1569_v34  ;;  %v1580_v31 = vmul.f32 0.044715, %v1578_v46 }
 0x9bb   :  { %v1583_v48 = vmul.f32 0.7978846, %v1581_v47  ;;  %v1582_v44 = vadd.f32 %v1580_v31, %v1571_v37 }
 0x9bd   :  { %7623 = vtanh.f32 %v1583_v48  ;;  %v1584_v49 = vmul.f32 0.7978846, %v1582_v44  ;;  %v8402_v44 = vld [vmem:[%s9399_s7 + $0x18] sm:$0xff] }
 0x9bf   :  { %7625 = vtanh.f32 %v1584_v49  ;;  %v1811_v49 = vrot.slane %v8402_v44, %v8125_v16 }
 0x9ca   :  { %v7624_v51 = vpop.eup %7623 }
 0x9cb   :  { %v1587_v25 = vadd.f32 1.0, %v7624_v51 }
 0x9cc   :  { %v7626_v52 = vpop.eup %7625 }
 0x9cd   :  { %v1588_v53 = vadd.f32 1.0, %v7626_v52  ;;  %v1589_v54 = vmul.f32 0.5, %v1587_v25 }
 0x9cf   :  { %v1590_v55 = vmul.f32 0.5, %v1588_v53  ;;  %v1591_v56 = vmul.f32 %v1589_v54, %v1569_v34 }
 0x9d1   :  { %v1592_v57 = vmul.f32 %v1590_v55, %v1571_v37  ;;  %v1593_v62 = vpack.c.bf16 %v1591_v56, %v1591_v56 }
 0x9d3   :  { %v1594_v58 = vpack.c.bf16 %v1592_v57, %v1592_v57 }
 0x9d5   :  { %1759 = vmatprep.mubr.bf16.mxu0 %v1594_v58 }
 0x9d6   :  { %1760 = vmatmul.mubr.bf16.vlgmr.msra.gmra.mxu0 %v1593_v62 }
 0x9d7   :  { %7044 = vmatprep.mubr.msk.bf16.mxu0 %vm7782_vm1, %v7781_v17 }
 0xa96   :  { %v6784_v0 = vpop.f32.mrf.mxu0 }
 0xa98   :  { %v6785_v2 = vpop.f32.mrf.mxu0 }
 0xa99   :  { %v6786_v3 = vadd.f32 %v6785_v2, %v6784_v0 }
 0xa9a   :  { %v6787_v4 = vpop.f32.mrf.mxu0 }
 0xa9b   :  { %v1762_v9 = vadd.f32 %v6786_v3, %v1630_v1 }
 0xa9c   :  { %v6788_v10 = vpop.f32.mrf.mxu0 }
 0xa9d   :  { %v8347_v11 = vadd.f32 %v1762_v9, %v8241_v38  ;;  %v7425_v38 = vld [vmem:[%s9395_s3 + $0x74] ss:$8 sps:$4 sm:$0xff]  }
 0xa9e   :  { %1863 = vmatprep.subr.bf16.mxu1 %v7425_v38 }
 0xa9f   :  { %v1771_v12 = vsel %vm776_vm0, %v8347_v11, 0.0  ;;  %1864 = vmatpush1.bf16.msra.mxu1 %v7423_v7 }
 0xaa0   :  { %1772 = vadd.xlane.f32.xlu0 %v1771_v12  ;;  %1865 = vmatprep.subr.bf16.mxu1 %v7428_v19 }
 0xaa3   :  { %1866 = vmatpush1.bf16.msra.mxu1 %v7426_v20 }
 0xaa4   :  { %1867 = vmatprep.subr.bf16.mxu1 %v7431_v21 }
 0xaa7   :  { %1868 = vmatpush1.bf16.msra.mxu1 %v7429_v22 }
 0xaa8   :  { %1869 = vmatprep.subr.bf16.mxu1 %v7434_v23 }
 0xaab   :  { %1870 = vmatpush1.bf16.msra.mxu1 %v7432_v24 }
 0xaac   :  { %7030 = vmatprep.subr.bf16.mxu1 %v7781_v17 }
 0xb29   :  { %v1773_v13 = vpop.xlane.xlu0 %1772 }
 0xb2a   :  { %v1774_v14 = vmul.f32 0.015625, %v1773_v13 }
 0xb2c   :  { %v1775_v5 = vsub.f32 %v8347_v11, %v1774_v14 }
 0xb2e   :  { %v1776_v15 = vmul.f32 %v1775_v5, %v1775_v5 }
 0xb30   :  { %v1777_v18 = vsel %vm776_vm0, %v1776_v15, 0.0 }
 0xb31   :  { %1778 = vadd.xlane.f32.xlu0 %v1777_v18 }
 0xbba   :  { %v1779_v26 = vpop.xlane.xlu0 %1778 }
 0xbbb   :  { %v1780_v27 = vmul.f32 0.015625, %v1779_v26 }
 0xbbd   :  { %v1781_v29 = vadd.f32 1e-05, %v1780_v27 }
 0xbbf   :  { %7627 = vrsqrt.f32 %v1781_v29 }
 0xbcc   :  { %v7628_v34 = vpop.eup %7627 }
 0xbcd   :  { %v1783_v35 = vmul.f32 %v7628_v34, %v1775_v5 }
 0xbcf   :  { %v1788_v37 = vmul.f32 %v1787_v32, %v1783_v35 }
 0xbd1   :  { %v1793_v39 = vadd.f32 %v1792_v36, %v1788_v37 }
 0xbd3   :  { %v1794_v40 = vpack.c.bf16 %v1793_v39, %v1793_v39 }
 0xbd5   :  { %6246 = vmatmul.mubr.msk.bf16.vlgmr.msra.gmra.mxu1 %vm776_vm0, %v1794_v40 }
 0xbd6   :  { %7032 = vmatprep.mubr.msk.bf16.mxu1 %vm7782_vm1, %v7781_v17 }
 0xc95   :  { %v1889_v43 = vpop.f32.mrf.mxu1 }
 0xc96   :  { %v1890_v45 = vadd.f32 %v1889_v43, %v1807_v41 }
 0xc97   :  { %v1891_v46 = vpop.f32.mrf.mxu1 }
 0xc98   :  { %v1896_v47 = vpack.c.bf16 %v1890_v45, %v1890_v45  ;;  %v1892_v52 = vadd.f32 %v1891_v46, %v1811_v49 }
 0xc99   :  { %v1893_v31 = vpop.f32.mrf.mxu1 }
 0xc9a   :  { %2009 = vrot.lane.b32.xlu0 %v1896_v47, %s7785_s0  ;;  %1899 = vrot.lane.b32.xlu1 %v1896_v47, %s7784_s28  ;;  %v8410_v56 = vpack.c.bf16 %v1892_v52, %v1892_v52 }
 0xc9b   :  { %v1894_v48 = vpop.f32.mrf.mxu1 }
 0xc9c   :  { %v1965_v62 = vsel %vm972_vm3, %v8410_v56, 0 }
 0xc9e   :  { %2120 = vrot.lane.b32.xlu0 %v1896_v47, %s7787_s2  ;;  %2007 = vrot.lane.b32.xlu1 %v1896_v47, %s7783_s1 }
 0xca2   :  { %2232 = vrot.lane.b32.xlu0 %v1896_v47, %s7789_s12  ;;  %2122 = vrot.lane.b32.xlu1 %v1896_v47, %s7786_s29 }
 0xca6   :  { %2234 = vrot.lane.b32.xlu1 %v1896_v47, %s7788_s30 }
 0xd0c   :  { %v2010_v51 = vpop.permute.xlu0 %2009  ;;  %v1900_v25 = vpop.permute.xlu1 %1899 }
 0xd0d   :  { %v2015_v53 = vsel %vm907_vm2, %v2010_v51, 0  ;;  %v1905_v54 = vsel %vm907_vm2, %v1900_v25, 0 }
 0xd0e   :  { %7031 = vmatpush3.bf16.xpose.msra.mxu1 %v1905_v54  ;;  %7043 = vmatpush3.bf16.xpose.msra.mxu0 %v2015_v53 }
 0xd0f   :  { %7036 = vmatprep.subr.bf16.mxu1 %v7781_v17  ;;  %7054 = vmatprep.subr.bf16.mxu0 %v7781_v17 }
 0xd10   :  { %v2008_v55 = vpop.permute.xlu1 %2007  ;;  %v2121_v1 = vpop.permute.xlu0 %2120 }
 0xd14   :  { %v2123_v57 = vpop.permute.xlu1 %2122  ;;  %v2233_v3 = vpop.permute.xlu0 %2232 }
 0xd15   :  { %v2128_v58 = vsel %vm907_vm2, %v2123_v57, 0  ;;  %7033 = vmatmul.mubr.msk.bf16.vlgmr.msra.gmra.mxu1 %vm907_vm2, %v1896_v47  ;;  %7045 = vmatmul.mubr.msk.bf16.vlgmr.msra.gmra.mxu0 %vm907_vm2, %v2008_v55 }
 0xd16   :  { %7037 = vmatpush3.bf16.msra.mxu1 %v1965_v62  ;;  %7055 = vmatpush3.bf16.xpose.msra.mxu0 %v2128_v58 }
 0xd17   :  { %7056 = vmatprep.mubr.msk.bf16.mxu0 %vm7782_vm1, %v7781_v17  ;;  %7066 = vmatprep.subr.bf16.mxu0 %v7781_v17 }
 0xd18   :  { %7038 = vmatprep.mubr.msk.bf16.mxu1 %vm7782_vm1, %v7781_v17  ;;  %7048 = vmatprep.subr.bf16.mxu1 %v7781_v17  ;;  %v2235_v0 = vpop.permute.xlu1 %2234 }
 0xd19   :  { %v2240_v2 = vsel %vm907_vm2, %v2235_v0, 0 }
 0xd1d   :  { %7057 = vmatmul.mubr.msk.bf16.vlgmr.msra.gmra.mxu0 %vm907_vm2, %v2121_v1 }
 0xd1e   :  { %7067 = vmatpush3.bf16.xpose.msra.mxu0 %v2240_v2  ;;  %7068 = vmatprep.mubr.msk.bf16.mxu0 %vm7782_vm1, %v7781_v17 }
 0xd1f   :  { %7078 = vmatprep.subr.bf16.mxu0 %v7781_v17 }
 0xd25   :  { %7069 = vmatmul.mubr.msk.bf16.vlgmr.msra.gmra.mxu0 %vm907_vm2, %v2233_v3 }
 0xd26   :  { %7086 = vmatprep.mubr.msk.bf16.mxu0 %vm7782_vm1, %v7781_v17 }
 0xdd5   :  { %v1941_v4 = vpop.f32.mrf.mxu1  ;;  %v2051_v9 = vpop.f32.mrf.mxu0 }
 0xdd6   :  { %v1947_v10 = vmul.f32 0.25, %v1941_v4  ;;  %v2057_v12 = vmul.f32 0.25, %v2051_v9 }
 0xdd7   :  { %v7034_v13 = vpop.f32.mrf.mxu1  ;;  %v7046_v14 = vpop.f32.mrf.mxu0 }
 0xdd8   :  { %v1948_v5 = vadd.f32 %v1947_v10, %v8177_v42  ;;  %v2058_v15 = vadd.f32 %v2057_v12, %v8177_v42 }
 0xdd9   :  { %v1944_v18 = vpop.f32.mrf.mxu1  ;;  %v2054_v7 = vpop.f32.mrf.mxu0 }
 0xdda   :  { %v1949_v38 = vsel %vm956_vm4, %v1948_v5, -inf  ;;  %v2059_v19 = vsel %vm956_vm4, %v2058_v15, -inf }
 0xddb   :  { %1950 = vmax.xlane.f32.xlu1 %v1949_v38  ;;  %v7035_v20 = vpop.f32.mrf.mxu1  ;;  %2060 = vmax.xlane.f32.xlu0 %v2059_v19  ;;  %v7047_v21 = vpop.f32.mrf.mxu0 }
 0xddd   :  { %v2164_v22 = vpop.f32.mrf.mxu0 }
 0xdde   :  { %v2170_v23 = vmul.f32 0.25, %v2164_v22 }
 0xddf   :  { %v7058_v24 = vpop.f32.mrf.mxu0 }
 0xde0   :  { %v2171_v26 = vadd.f32 %v2170_v23, %v8177_v42 }
 0xde1   :  { %v2167_v27 = vpop.f32.mrf.mxu0 }
 0xde2   :  { %v2172_v29 = vsel %vm956_vm4, %v2171_v26, -inf }
 0xde3   :  { %2173 = vmax.xlane.f32.xlu0 %v2172_v29  ;;  %v7059_v32 = vpop.f32.mrf.mxu0 }
 0xde5   :  { %v2276_v34 = vpop.f32.mrf.mxu0 }
 0xde6   :  { %v2282_v35 = vmul.f32 0.25, %v2276_v34 }
 0xde7   :  { %v7070_v36 = vpop.f32.mrf.mxu0 }
 0xde8   :  { %v2283_v37 = vadd.f32 %v2282_v35, %v8177_v42  ;;  %v7435_v36 = vld [vmem:[%s9396_s4 + $0x38] sm:$0xff]  }
 0xde9   :  { %v2279_v39 = vpop.f32.mrf.mxu0  ;;  %7079 = vmatpush3.bf16.msra.mxu0 %v7435_v36  ;;  %v7453_v36 = vld [vmem:[%s9395_s3 + $0xb4] ss:$8 sps:$4 sm:$0xff]  }
 0xdea   :  { %v2284_v40 = vsel %vm956_vm4, %v2283_v37, -inf  ;;  %v7436_v39 = vld [vmem:[%s9396_s4 + $0x30] sm:$0xff]   ;;  %7080 = vmatprep.subr.bf16.mxu0 %v7781_v17 }
 0xdeb   :  { %2285 = vmax.xlane.f32.xlu1 %v2284_v40  ;;  %v7071_v41 = vpop.f32.mrf.mxu0 }
 0xded   :  { %7081 = vmatpush3.bf16.msra.mxu0 %v7436_v39 }
 0xdee   :  { %7082 = vmatprep.subr.bf16.mxu0 %v7781_v17 }
 0xe64   :  { %v2061_v43 = vpop.xlane.xlu0 %2060  ;;  %v1951_v45 = vpop.xlane.xlu1 %1950 }
 0xe65   :  { %v2062_v46 = vsub.f32 %v2058_v15, %v2061_v43  ;;  %v1952_v47 = vsub.f32 %v1948_v5, %v1951_v45  ;;  %v7437_v43 = vld [vmem:[%s9396_s4 + $0x28] sm:$0xff]  }
 0xe66   :  { %7083 = vmatpush3.bf16.msra.mxu0 %v7437_v43 }
 0xe67   :  { %v2063_v31 = vmul.f32 1.442695, %v2062_v46  ;;  %v1953_v48 = vmul.f32 1.442695, %v1952_v47  ;;  %7084 = vmatprep.subr.bf16.mxu0 %v7781_v17 }
 0xe69   :  { %7629 = vpow2.f32 %v2063_v31 }
 0xe6a   :  { %7631 = vpow2.f32 %v1953_v48 }
 0xe6c   :  { %v2174_v49 = vpop.xlane.xlu0 %2173 }
 0xe6d   :  { %v2175_v51 = vsub.f32 %v2171_v26, %v2174_v49 }
 0xe6f   :  { %v2176_v25 = vmul.f32 1.442695, %v2175_v51  ;;  %v7438_v51 = vld [vmem:[%s9396_s4 + $0x20] sm:$0xff]  }
 0xe70   :  { %7085 = vmatpush3.bf16.msra.mxu0 %v7438_v51 }
 0xe71   :  { %7633 = vpow2.f32 %v2176_v25 }
 0xe74   :  { %v2286_v58 = vpop.xlane.xlu1 %2285 }
 0xe75   :  { %v2287_v62 = vsub.f32 %v2283_v37, %v2286_v58 }
 0xe76   :  { %v7630_v52 = vpop.eup %7629 }
 0xe77   :  { %v7632_v53 = vpop.eup %7631  ;;  %v2065_v42 = vsel %vm956_vm4, %v7630_v52, 0.0  ;;  %v2288_v0 = vmul.f32 1.442695, %v2287_v62 }
 0xe78   :  { %2066 = vadd.xlane.f32.xlu1 %v2065_v42  ;;  %v1955_v54 = vsel %vm956_vm4, %v7632_v53, 0.0 }
 0xe79   :  { %1956 = vadd.xlane.f32.xlu0 %v1955_v54  ;;  %7635 = vpow2.f32 %v2288_v0  ;;  %v2763_v54 = vsel %vm776_vm0, %v8077_v50, 0.0 }
 0xe7e   :  { %v7634_v55 = vpop.eup %7633 }
 0xe7f   :  { %v2178_v57 = vsel %vm956_vm4, %v7634_v55, 0.0 }
 0xe80   :  { %2179 = vadd.xlane.f32.xlu0 %v2178_v57 }
 0xe86   :  { %v7636_v1 = vpop.eup %7635 }
 0xe87   :  { %v2290_v2 = vsel %vm956_vm4, %v7636_v1, 0.0 }
 0xe89   :  { %2184 = vrot.lane.b32.xlu1 %v8410_v56, %s7787_s2 }
 0xe96   :  { %2072 = vrot.lane.b32.xlu0 %v8410_v56, %s7783_s1 }
 0xead   :  { %2291 = vadd.xlane.f32.xlu1 %v2290_v2 }
 0xebe   :  { %2296 = vrot.lane.b32.xlu1 %v8410_v56, %s7789_s12 }
 0xf01   :  { %v2067_v4 = vpop.xlane.xlu1 %2066 }
 0xf02   :  { %v1957_v3 = vpop.xlane.xlu0 %1956 }
 0xf03   :  { %7637 = vrcp.f32 %v1957_v3 }
 0xf04   :  { %7639 = vrcp.f32 %v2067_v4 }
 0xf05   :  { %v2185_v18 = vpop.permute.xlu1 %2184 }
 0xf06   :  { %v2190_v19 = vsel %vm972_vm3, %v2185_v18, 0 }
 0xf09   :  { %v2180_v9 = vpop.xlane.xlu0 %2179 }
 0xf0a   :  { %7641 = vrcp.f32 %v2180_v9  ;;  %v2372_v9 = vrot.slane %v8381_v30, %v8236_v33 }
 0xf0d   :  { %v2073_v13 = vpop.permute.xlu0 %2072 }
 0xf0e   :  { %v2078_v15 = vsel %vm972_vm3, %v2073_v13, 0 }
 0xf10   :  { %v7638_v10 = vpop.eup %7637 }
 0xf11   :  { %v1959_v12 = vmul.f32 %v7638_v10, %v7632_v53  ;;  %v7640_v5 = vpop.eup %7639 }
 0xf12   :  { %v2069_v56 = vmul.f32 %v7640_v5, %v7630_v52 }
 0xf13   :  { %v1960_v14 = vpack.c.bf16 %v1959_v12, %v1959_v12 }
 0xf14   :  { %v2070_v7 = vpack.c.bf16 %v2069_v56, %v2069_v56 }
 0xf15   :  { %7039 = vmatmul.mubr.msk.bf16.vlgmr.msra.gmra.mxu1 %vm956_vm4, %v1960_v14 }
 0xf16   :  { %7049 = vmatpush3.bf16.msra.mxu1 %v2078_v15  ;;  %7050 = vmatprep.mubr.msk.bf16.mxu1 %vm7782_vm1, %v7781_v17 }
 0xf17   :  { %7060 = vmatprep.subr.bf16.mxu1 %v7781_v17  ;;  %v7642_v38 = vpop.eup %7641 }
 0xf18   :  { %v2182_v20 = vmul.f32 %v7642_v38, %v7634_v55 }
 0xf1a   :  { %v2183_v21 = vpack.c.bf16 %v2182_v20, %v2182_v20 }
 0xf1d   :  { %7051 = vmatmul.mubr.msk.bf16.vlgmr.msra.gmra.mxu1 %vm956_vm4, %v2070_v7 }
 0xf1e   :  { %7061 = vmatpush3.bf16.msra.mxu1 %v2190_v19  ;;  %7062 = vmatprep.mubr.msk.bf16.mxu1 %vm7782_vm1, %v7781_v17 }
 0xf1f   :  { %7072 = vmatprep.subr.bf16.mxu1 %v7781_v17 }
 0xf25   :  { %7063 = vmatmul.mubr.msk.bf16.vlgmr.msra.gmra.mxu1 %vm956_vm4, %v2183_v21 }
 0xf26   :  { %7074 = vmatprep.mubr.msk.bf16.mxu1 %vm7782_vm1, %v7781_v17 }
 0xf36   :  { %v2292_v22 = vpop.xlane.xlu1 %2291 }
 0xf37   :  { %7643 = vrcp.f32 %v2292_v22 }
 0xf3a   :  { %v2297_v23 = vpop.permute.xlu1 %2296 }
 0xf3b   :  { %v2302_v24 = vsel %vm972_vm3, %v2297_v23, 0 }
 0xf3c   :  { %7073 = vmatpush3.bf16.msra.mxu1 %v2302_v24  ;;  %v7439_v24 = vld [vmem:[%s9397_s5 + $0x70] ss:$8 sps:$4 sm:$0xff]  }
 0xf44   :  { %v7644_v26 = vpop.eup %7643 }
 0xf45   :  { %v2294_v27 = vmul.f32 %v7644_v26, %v7636_v1  ;;  %v7444_v26 = vld [vmem:[%s9397_s5 + $0x64] ss:$8 sps:$4 sm:$0xff]  }
 0xf47   :  { %v2295_v29 = vpack.c.bf16 %v2294_v27, %v2294_v27  ;;  %v7442_v27 = vld [vmem:[%s9397_s5 + $0x60] ss:$8 sps:$4 sm:$0xff]  }
 0xf49   :  { %7075 = vmatmul.mubr.msk.bf16.vlgmr.msra.gmra.mxu1 %vm956_vm4, %v2295_v29  ;;  %v7447_v29 = vld [vmem:[%s9397_s5 + $0x54] ss:$8 sps:$4 sm:$0xff]  }
 0xf4a   :  { %2557 = vmatprep.mubr.bf16.mxu1 %v7780_v60 }
 0xfd5   :  { %v2001_v32 = vpop.f32.mrf.mxu1 }
 0xfd7   :  { %v7040_v34 = vpop.f32.mrf.mxu1 }
 0xfd8   :  { %v7450_v34 = vld [vmem:[%s9397_s5 + $0x44] ss:$8 sps:$4 sm:$0xff]  }
 0xfd9   :  { %v2004_v35 = vpop.f32.mrf.mxu1 }
 0xfda   :  { %v7448_v35 = vld [vmem:[%s9397_s5 + $0x40] ss:$8 sps:$4 sm:$0xff]  }
 0xfdb   :  { %v7041_v37 = vpop.f32.mrf.mxu1 }
 0xfdd   :  { %v2114_v40 = vpop.f32.mrf.mxu1 }
 0xfde   :  { %2345 = vrot.lane.b32.xlu0 %v2114_v40, %s7788_s30 }
 0xfdf   :  { %v7052_v41 = vpop.f32.mrf.mxu1 }
 0xfe1   :  { %v2117_v45 = vpop.f32.mrf.mxu1 }
 0xfe3   :  { %v7053_v46 = vpop.f32.mrf.mxu1 }
 0xfe4   :  { %v2457_v46 = vrot.slane %v8381_v30, %v8272_v59 }
 0xfe5   :  { %v2226_v47 = vpop.f32.mrf.mxu1 }
 0xfe6   :  { %2349 = vrot.lane.b32.xlu1 %v2226_v47, %s7786_s29 }
 0xfe7   :  { %v7064_v31 = vpop.f32.mrf.mxu1 }
 0xfe9   :  { %v2229_v48 = vpop.f32.mrf.mxu1 }
 0xfea   :  { %v2462_v48 = vrot.slane %v8381_v30, %v8275_v61 }
 0xfeb   :  { %v7065_v49 = vpop.f32.mrf.mxu1 }
0x1009   :  { %v2338_v25 = vpop.f32.mrf.mxu1 }
0x100a   :  { %2353 = vrot.lane.b32.xlu0 %v2338_v25, %s7785_s0  ;;  %v7451_v25 = vld [vmem:[%s9395_s3 + $0xb0] ss:$8 sps:$4 sm:$0xff]  }
0x100b   :  { %v7076_v52 = vpop.f32.mrf.mxu1 }
0x100d   :  { %v2341_v53 = vpop.f32.mrf.mxu1 }
0x100e   :  { %v7456_v53 = vld [vmem:[%s9395_s3 + $0xa4] ss:$8 sps:$4 sm:$0xff]  }
0x100f   :  { %v7077_v42 = vpop.f32.mrf.mxu1 }
0x1029   :  { %2764 = vadd.xlane.f32.xlu0 %v2763_v54  ;;  %v8540_v54 = vld [vmem:[%s9399_s7 + $0x20] sm:$0xff] }
0x1050   :  { %v2346_v55 = vpop.permute.xlu0 %2345 }
0x1051   :  { %v2356_v58 = vsel %vm907_vm2, %v2001_v32, %v2346_v55  ;;  %v7445_v32 = vld [vmem:[%s9397_s5 + $0x50] ss:$8 sps:$4 sm:$0xff]   ;;  %v7454_v55 = vld [vmem:[%s9395_s3 + $0xa0] ss:$8 sps:$4 sm:$0xff]  }
0x1058   :  { %v2350_v57 = vpop.permute.xlu1 %2349 }
0x1059   :  { %v2357_v62 = vsel %vm1366_vm5, %v2356_v58, %v2350_v57  ;;  %v7459_v58 = vld [vmem:[%s9395_s3 + $0x94] ss:$8 sps:$4 sm:$0xff]  }
0x107c   :  { %v2354_v0 = vpop.permute.xlu0 %2353 }
0x107d   :  { %v2358_v1 = vsel %vm1368_vm6, %v2357_v62, %v2354_v0  ;;  %v2779_v62 = vrot.slane %v8540_v54, %v8109_v6  ;;  %v7457_v0 = vld [vmem:[%s9395_s3 + $0x90] ss:$8 sps:$4 sm:$0xff]  }
0x107e   :  { %v2359_v2 = vpack.c.bf16 %v2358_v1, %v2358_v1  ;;  %v7462_v1 = vld [vmem:[%s9395_s3 + $0x84] ss:$8 sps:$4 sm:$0xff]  }
0x1080   :  { %7087 = vmatmul.mubr.msk.bf16.vlgmr.msra.gmra.mxu0 %vm776_vm0, %v2359_v2 }
0x10b2   :  { %v2765_v3 = vpop.xlane.xlu0 %2764 }
0x10b3   :  { %v2766_v4 = vmul.f32 0.015625, %v2765_v3  ;;  %v2784_v3 = vrot.slane %v8540_v54, %v8117_v8 }
0x10b5   :  { %v2767_v12 = vsub.f32 %v8077_v50, %v2766_v4  ;;  %v7460_v4 = vld [vmem:[%s9395_s3 + $0x80] ss:$8 sps:$4 sm:$0xff]  }
0x10b7   :  { %v2768_v18 = vmul.f32 %v2767_v12, %v2767_v12 }
0x10b9   :  { %v2769_v38 = vsel %vm776_vm0, %v2768_v18, 0.0  ;;  %v7468_v18 = vld [vmem:[%s9398_s6 + $0xa8] sm:$0xff]  }
0x1140   :  { %v2434_v10 = vpop.f32.mrf.mxu0 }
0x1141   :  { %v2435_v13 = vadd.f32 %v2434_v10, %v2372_v9 }
0x1142   :  { %v7088_v14 = vpop.f32.mrf.mxu0 }
0x1143   :  { %v8493_v5 = vadd.f32 %v2435_v13, %v8347_v11  ;;  %v7441_v11 = vld [vmem:[%s9397_s5 + $0x74] ss:$8 sps:$4 sm:$0xff]  }
0x1144   :  { %v2437_v15 = vpop.f32.mrf.mxu0  ;;  %2533 = vmatprep.subr.bf16.mxu1 %v7441_v11  ;;  %v7464_v13 = vld [vmem:[%s9398_s6 + $0xb8] sm:$0xff]   ;;  %v7465_v14 = vld [vmem:[%s9398_s6 + $0xf0] sm:$0xff]   ;;  %v7476_v11 = vld [vmem:[%s9398_s6 + $0x88] sm:$0xff]  }
0x1145   :  { %v2441_v56 = vsel %vm776_vm0, %v8493_v5, 0.0  ;;  %2534 = vmatpush1.bf16.msra.mxu1 %v7439_v24  ;;  %v7466_v15 = vld [vmem:[%s9398_s6 + $0xb0] sm:$0xff]   ;;  %v7477_v24 = vld [vmem:[%s9398_s6 + $0xc0] sm:$0xff]  }
0x1146   :  { %2442 = vadd.xlane.f32.xlu1 %v2441_v56  ;;  %v7089_v7 = vpop.f32.mrf.mxu0  ;;  %2535 = vmatprep.subr.bf16.mxu1 %v7444_v26  ;;  %v7467_v56 = vld [vmem:[%s9398_s6 + $0xe8] sm:$0xff]   ;;  %v7478_v26 = vld [vmem:[%s9398_s6 + $0x80] sm:$0xff]  }
0x1147   :  { %v7469_v7 = vld [vmem:[%s9398_s6 + $0xe0] sm:$0xff]  }
0x1149   :  { %2536 = vmatpush1.bf16.msra.mxu1 %v7442_v27  ;;  %v2477_v27 = vrot.slane %v8381_v30, %v8333_v28 }
0x114a   :  { %2770 = vadd.xlane.f32.xlu1 %v2769_v38  ;;  %2537 = vmatprep.subr.bf16.mxu1 %v7447_v29  ;;  %v7470_v38 = vld [vmem:[%s9398_s6 + $0xa0] sm:$0xff]   ;;  %v2481_v29 = vrot.slane %v8402_v44, %v8333_v28  ;;  %v2799_v44 = vrot.slane %v8540_v54, %v8125_v16 }
0x114d   :  { %2538 = vmatpush1.bf16.msra.mxu1 %v7445_v32 }
0x114e   :  { %2539 = vmatprep.subr.bf16.mxu1 %v7450_v34 }
0x1151   :  { %2540 = vmatpush1.bf16.msra.mxu1 %v7448_v35 }
0x1152   :  { %2855 = vmatprep.subr.bf16.mxu1 %v7453_v36 }
0x11cf   :  { %v2443_v19 = vpop.xlane.xlu1 %2442 }
0x11d0   :  { %v2444_v20 = vmul.f32 0.015625, %v2443_v19  ;;  %v7471_v19 = vld [vmem:[%s9398_s6 + $0xd8] sm:$0xff]  }
0x11d2   :  { %v2445_v21 = vsub.f32 %v8493_v5, %v2444_v20  ;;  %v7472_v20 = vld [vmem:[%s9398_s6 + $0x98] sm:$0xff]  }
0x11d3   :  { %v2771_v40 = vpop.xlane.xlu1 %2770 }
0x11d4   :  { %v2446_v22 = vmul.f32 %v2445_v21, %v2445_v21  ;;  %v2772_v43 = vmul.f32 0.015625, %v2771_v40 }
0x11d6   :  { %v2447_v23 = vsel %vm776_vm0, %v2446_v22, 0.0  ;;  %v2773_v45 = vadd.f32 1e-05, %v2772_v43  ;;  %v7474_v22 = vld [vmem:[%s9398_s6 + $0x90] sm:$0xff]  }
0x11d7   :  { %2448 = vadd.xlane.f32.xlu0 %v2447_v23  ;;  %v7475_v23 = vld [vmem:[%s9398_s6 + $0xc8] sm:$0xff]  }
0x1260   :  { %v2449_v37 = vpop.xlane.xlu0 %2448 }
0x1261   :  { %v2450_v39 = vmul.f32 0.015625, %v2449_v37 }
0x1263   :  { %v2451_v41 = vadd.f32 1e-05, %v2450_v39 }
0x1265   :  { %7645 = vrsqrt.f32 %v2451_v41 }
0x1266   :  { %7647 = vrsqrt.f32 %v2773_v45 }
0x1272   :  { %v7646_v47 = vpop.eup %7645 }
0x1273   :  { %v2453_v31 = vmul.f32 %v7646_v47, %v2445_v21  ;;  %v7648_v42 = vpop.eup %7647  ;;  %v7473_v21 = vld [vmem:[%s9398_s6 + $0xd0] sm:$0xff]  }
0x1274   :  { %v2775_v57 = vmul.f32 %v7648_v42, %v2767_v12  ;;  %v7463_v12 = vld [vmem:[%s9398_s6 + $0xf8] sm:$0xff]  }
0x1275   :  { %v2458_v49 = vmul.f32 %v2457_v46, %v2453_v31  ;;  %6811 = vmatprep.subr.bf16.mxu0 %v7463_v12  ;;  %v8634_v12 = vld [vmem:[%s9399_s7 + $0x28] sm:$0xff] }
0x1276   :  { %v2780_v2 = vmul.f32 %v2779_v62, %v2775_v57  ;;  %6812 = vmatpush3.bf16.msra.mxu0 %v7464_v13  ;;  %v2803_v13 = vrot.slane %v8634_v12, %v8125_v16 }
0x1277   :  { %v2463_v51 = vadd.f32 %v2462_v48, %v2458_v49  ;;  %6813 = vmatprep.subr.bf16.mxu0 %v7465_v14 }
0x1278   :  { %v2785_v9 = vadd.f32 %v2784_v3, %v2780_v2 }
0x1279   :  { %v2464_v52 = vpack.c.bf16 %v2463_v51, %v2463_v51 }
0x127a   :  { %v2786_v10 = vpack.c.bf16 %v2785_v9, %v2785_v9  ;;  %6814 = vmatpush3.bf16.msra.mxu0 %v7466_v15 }
0x127b   :  { %6284 = vmatmul.mubr.msk.bf16.vlgmr.msra.gmra.mxu1 %vm776_vm0, %v2464_v52  ;;  %6815 = vmatprep.subr.bf16.mxu0 %v7467_v56 }
0x127c   :  { %2856 = vmatpush1.bf16.msra.mxu1 %v7451_v25  ;;  %2879 = vmatprep.mubr.bf16.mxu1 %v7780_v60 }
0x127d   :  { %2857 = vmatprep.subr.bf16.mxu1 %v7456_v53 }
0x127e   :  { %6816 = vmatpush3.bf16.msra.mxu0 %v7468_v18 }
0x127f   :  { %6817 = vmatprep.subr.bf16.mxu0 %v7469_v7 }
0x1280   :  { %2858 = vmatpush1.bf16.msra.mxu1 %v7454_v55 }
0x1281   :  { %2859 = vmatprep.subr.bf16.mxu1 %v7459_v58 }
0x1282   :  { %6818 = vmatpush3.bf16.msra.mxu0 %v7470_v38 }
0x1283   :  { %6819 = vmatprep.subr.bf16.mxu0 %v7471_v19 }
0x1284   :  { %2860 = vmatpush1.bf16.msra.mxu1 %v7457_v0 }
0x1285   :  { %2861 = vmatprep.subr.bf16.mxu1 %v7462_v1 }
0x1286   :  { %6820 = vmatpush3.bf16.msra.mxu0 %v7472_v20 }
0x1287   :  { %6821 = vmatprep.subr.bf16.mxu0 %v7473_v21 }
0x1288   :  { %2862 = vmatpush1.bf16.msra.mxu1 %v7460_v4 }
0x1289   :  { %7090 = vmatprep.subr.bf16.mxu1 %v7781_v17 }
0x128a   :  { %6822 = vmatpush3.bf16.msra.mxu0 %v7474_v22 }
0x128b   :  { %6351 = vmatmul.mubr.msk.bf16.vlgmr.msra.gmra.mxu1 %vm776_vm0, %v2786_v10  ;;  %6823 = vmatprep.subr.bf16.mxu0 %v7475_v23 }
0x128c   :  { %7092 = vmatprep.mubr.msk.bf16.mxu1 %vm7782_vm1, %v7781_v17 }
0x128e   :  { %6824 = vmatpush3.bf16.msra.mxu0 %v7476_v11 }
0x128f   :  { %6825 = vmatprep.subr.bf16.mxu0 %v7477_v24 }
0x1292   :  { %6826 = vmatpush3.bf16.msra.mxu0 %v7478_v26 }
0x1293   :  { %7102 = vmatprep.subr.bf16.mxu0 %v7781_v17 }
0x133b   :  { %v2559_v32 = vpop.f32.mrf.mxu1 }
0x133c   :  { %v2560_v34 = vadd.f32 %v2559_v32, %v2477_v27 }
0x133d   :  { %v2561_v35 = vpop.f32.mrf.mxu1 }
0x133e   :  { %v2566_v36 = vmul.f32 %v2560_v34, %v2560_v34  ;;  %v2562_v37 = vadd.f32 %v2561_v35, %v2481_v29 }
0x133f   :  { %v2563_v39 = vpop.f32.mrf.mxu1 }
0x1340   :  { %v2568_v40 = vmul.f32 %v2566_v36, %v2560_v34  ;;  %v2567_v41 = vmul.f32 %v2562_v37, %v2562_v37  ;;  %v8668_v39 = vld [vmem:[%s9400_s8 + $0x10] sm:$0xff] }
0x1341   :  { %v2564_v43 = vpop.f32.mrf.mxu1 }
0x1342   :  { %v2570_v45 = vmul.f32 0.044715, %v2568_v40  ;;  %v2569_v46 = vmul.f32 %v2567_v41, %v2562_v37 }
0x1344   :  { %v2572_v47 = vadd.f32 %v2570_v45, %v2560_v34  ;;  %v2571_v31 = vmul.f32 0.044715, %v2569_v46 }
0x1346   :  { %v2574_v48 = vmul.f32 0.7978846, %v2572_v47  ;;  %v2573_v49 = vadd.f32 %v2571_v31, %v2562_v37 }
0x1348   :  { %7649 = vtanh.f32 %v2574_v48  ;;  %v2575_v30 = vmul.f32 0.7978846, %v2573_v49 }
0x134a   :  { %7651 = vtanh.f32 %v2575_v30 }
0x134b   :  { %v2881_v51 = vpop.f32.mrf.mxu1 }
0x134c   :  { %v2882_v25 = vadd.f32 %v2881_v51, %v2799_v44 }
0x134d   :  { %v2883_v52 = vpop.f32.mrf.mxu1 }
0x134e   :  { %v2888_v53 = vpack.c.bf16 %v2882_v25, %v2882_v25  ;;  %v2884_v56 = vadd.f32 %v2883_v52, %v2803_v13 }
0x134f   :  { %v2885_v42 = vpop.f32.mrf.mxu1 }
0x1350   :  { %3001 = vrot.lane.b32.xlu1 %v2888_v53, %s7785_s0  ;;  %2891 = vrot.lane.b32.xlu0 %v2888_v53, %s7784_s28  ;;  %v8642_v38 = vpack.c.bf16 %v2884_v56, %v2884_v56 }
0x1351   :  { %v2886_v55 = vpop.f32.mrf.mxu1 }
0x1352   :  { %v2957_v22 = vsel %vm972_vm3, %v8642_v38, 0 }
0x1354   :  { %2999 = vrot.lane.b32.xlu1 %v2888_v53, %s7783_s1  ;;  %3114 = vrot.lane.b32.xlu0 %v2888_v53, %s7786_s29 }
0x1355   :  { %v7650_v57 = vpop.eup %7649 }
0x1356   :  { %v2578_v58 = vadd.f32 1.0, %v7650_v57 }
0x1357   :  { %v7652_v62 = vpop.eup %7651 }
0x1358   :  { %3112 = vrot.lane.b32.xlu1 %v2888_v53, %s7787_s2  ;;  %3226 = vrot.lane.b32.xlu0 %v2888_v53, %s7788_s30  ;;  %v2579_v0 = vadd.f32 1.0, %v7652_v62  ;;  %v2580_v1 = vmul.f32 0.5, %v2578_v58 }
0x135a   :  { %v2581_v2 = vmul.f32 0.5, %v2579_v0  ;;  %v2582_v3 = vmul.f32 %v2580_v1, %v2560_v34 }
0x135c   :  { %3224 = vrot.lane.b32.xlu1 %v2888_v53, %s7789_s12  ;;  %v2583_v4 = vmul.f32 %v2581_v2, %v2562_v37  ;;  %v2584_v10 = vpack.c.bf16 %v2582_v3, %v2582_v3 }
0x135e   :  { %v2585_v9 = vpack.c.bf16 %v2583_v4, %v2583_v4 }
0x1360   :  { %2751 = vmatprep.mubr.bf16.mxu0 %v2585_v9 }
0x1361   :  { %2752 = vmatmul.mubr.bf16.vlgmr.msra.gmra.mxu0 %v2584_v10 }
0x1362   :  { %7104 = vmatprep.mubr.msk.bf16.mxu0 %vm7782_vm1, %v7781_v17 }
0x13c2   :  { %v3002_v14 = vpop.permute.xlu1 %3001  ;;  %v2892_v15 = vpop.permute.xlu0 %2891 }
0x13c3   :  { %v3007_v18 = vsel %vm907_vm2, %v3002_v14, 0  ;;  %v2897_v7 = vsel %vm907_vm2, %v2892_v15, 0 }
0x13c4   :  { %7091 = vmatpush3.bf16.xpose.msra.mxu1 %v2897_v7  ;;  %7103 = vmatpush3.bf16.xpose.msra.mxu0 %v3007_v18 }
0x13c5   :  { %7096 = vmatprep.subr.bf16.mxu1 %v7781_v17  ;;  %7114 = vmatprep.subr.bf16.mxu0 %v7781_v17 }
0x13c6   :  { %v3115_v19 = vpop.permute.xlu0 %3114  ;;  %v3000_v20 = vpop.permute.xlu1 %2999 }
0x13c7   :  { %v3120_v21 = vsel %vm907_vm2, %v3115_v19, 0 }
0x13ca   :  { %v3227_v23 = vpop.permute.xlu0 %3226  ;;  %v3113_v11 = vpop.permute.xlu1 %3112 }
0x13cb   :  { %7093 = vmatmul.mubr.msk.bf16.vlgmr.msra.gmra.mxu1 %vm907_vm2, %v2888_v53  ;;  %7105 = vmatmul.mubr.msk.bf16.vlgmr.msra.gmra.mxu0 %vm907_vm2, %v3000_v20  ;;  %v3232_v24 = vsel %vm907_vm2, %v3227_v23, 0 }
0x13cc   :  { %7097 = vmatpush3.bf16.msra.mxu1 %v2957_v22  ;;  %7115 = vmatpush3.bf16.xpose.msra.mxu0 %v3120_v21 }
0x13cd   :  { %7116 = vmatprep.mubr.msk.bf16.mxu0 %vm7782_vm1, %v7781_v17  ;;  %7126 = vmatprep.subr.bf16.mxu0 %v7781_v17 }
0x13ce   :  { %7098 = vmatprep.mubr.msk.bf16.mxu1 %vm7782_vm1, %v7781_v17  ;;  %7108 = vmatprep.subr.bf16.mxu1 %v7781_v17  ;;  %v3225_v26 = vpop.permute.xlu1 %3224 }
0x13d3   :  { %7117 = vmatmul.mubr.msk.bf16.vlgmr.msra.gmra.mxu0 %vm907_vm2, %v3113_v11 }
0x13d4   :  { %7127 = vmatpush3.bf16.xpose.msra.mxu0 %v3232_v24  ;;  %7128 = vmatprep.mubr.msk.bf16.mxu0 %vm7782_vm1, %v7781_v17 }
0x13d5   :  { %7138 = vmatprep.subr.bf16.mxu0 %v7781_v17 }
0x13db   :  { %7129 = vmatmul.mubr.msk.bf16.vlgmr.msra.gmra.mxu0 %vm907_vm2, %v3225_v26 }
0x13dc   :  { %7146 = vmatprep.mubr.msk.bf16.mxu0 %vm7782_vm1, %v7781_v17 }
0x1421   :  { %v6827_v27 = vpop.f32.mrf.mxu0 }
0x1423   :  { %v6828_v29 = vpop.f32.mrf.mxu0 }
0x1424   :  { %v8663_v32 = vadd.f32 %v6828_v29, %v6827_v27 }
0x1425   :  { %v6830_v34 = vpop.f32.mrf.mxu0 }
0x1427   :  { %v6831_v35 = vpop.f32.mrf.mxu0 }
0x148b   :  { %v2933_v36 = vpop.f32.mrf.mxu1  ;;  %v3043_v37 = vpop.f32.mrf.mxu0 }
0x148c   :  { %v2939_v40 = vmul.f32 0.25, %v2933_v36  ;;  %v3049_v41 = vmul.f32 0.25, %v3043_v37 }
0x148d   :  { %v7094_v43 = vpop.f32.mrf.mxu1  ;;  %v7106_v45 = vpop.f32.mrf.mxu0 }
0x148e   :  { %v2940_v46 = vadd.f32 %v8668_v39, %v2939_v40  ;;  %v3050_v47 = vadd.f32 %v8668_v39, %v3049_v41 }
0x148f   :  { %v2936_v31 = vpop.f32.mrf.mxu1  ;;  %v3046_v48 = vpop.f32.mrf.mxu0 }
0x1490   :  { %v2941_v49 = vsel %vm956_vm4, %v2940_v46, -inf  ;;  %v3051_v30 = vsel %vm956_vm4, %v3050_v47, -inf }
0x1491   :  { %2942 = vmax.xlane.f32.xlu0 %v2941_v49  ;;  %v7095_v44 = vpop.f32.mrf.mxu1  ;;  %3052 = vmax.xlane.f32.xlu1 %v3051_v30  ;;  %v7107_v51 = vpop.f32.mrf.mxu0 }
0x1493   :  { %v3156_v25 = vpop.f32.mrf.mxu0 }
0x1494   :  { %v3162_v52 = vmul.f32 0.25, %v3156_v25 }
0x1495   :  { %v7118_v53 = vpop.f32.mrf.mxu0 }
0x1496   :  { %v3163_v42 = vadd.f32 %v8668_v39, %v3162_v52 }
0x1497   :  { %v3159_v55 = vpop.f32.mrf.mxu0 }
0x1498   :  { %v3164_v57 = vsel %vm956_vm4, %v3163_v42, -inf }
0x1499   :  { %3165 = vmax.xlane.f32.xlu0 %v3164_v57  ;;  %v7119_v58 = vpop.f32.mrf.mxu0 }
0x149b   :  { %v3268_v62 = vpop.f32.mrf.mxu0 }
0x149c   :  { %v3274_v0 = vmul.f32 0.25, %v3268_v62 }
0x149d   :  { %v7130_v1 = vpop.f32.mrf.mxu0 }
0x149e   :  { %v3275_v2 = vadd.f32 %v8668_v39, %v3274_v0  ;;  %v7479_v0 = vld [vmem:[%s9396_s4 + $0x58] sm:$0xff]  }
0x149f   :  { %v3271_v3 = vpop.f32.mrf.mxu0  ;;  %7139 = vmatpush3.bf16.msra.mxu0 %v7479_v0 }
0x14a0   :  { %v3276_v4 = vsel %vm956_vm4, %v3275_v2, -inf  ;;  %7140 = vmatprep.subr.bf16.mxu0 %v7781_v17 }
0x14a1   :  { %3277 = vmax.xlane.f32.xlu0 %v3276_v4  ;;  %v7131_v9 = vpop.f32.mrf.mxu0 }
0x151a   :  { %v2943_v10 = vpop.xlane.xlu0 %2942  ;;  %v3053_v13 = vpop.xlane.xlu1 %3052 }
0x151b   :  { %v2944_v14 = vsub.f32 %v2940_v46, %v2943_v10  ;;  %v3054_v15 = vsub.f32 %v3050_v47, %v3053_v13 }
0x151d   :  { %v2945_v56 = vmul.f32 1.442695, %v2944_v14  ;;  %v3055_v18 = vmul.f32 1.442695, %v3054_v15  ;;  %v7480_v15 = vld [vmem:[%s9396_s4 + $0x50] sm:$0xff]  }
0x151e   :  { %7141 = vmatpush3.bf16.msra.mxu0 %v7480_v15  ;;  %v7495_v15 = vld [vmem:[%s9398_s6 + $0x178] sm:$0xff]  }
0x151f   :  { %7653 = vpow2.f32 %v2945_v56  ;;  %v7481_v56 = vld [vmem:[%s9396_s4 + $0x48] sm:$0xff]   ;;  %7142 = vmatprep.subr.bf16.mxu0 %v7781_v17 }
0x1520   :  { %7655 = vpow2.f32 %v3055_v18  ;;  %v7482_v18 = vld [vmem:[%s9396_s4 + $0x40] sm:$0xff]  }
0x1522   :  { %v3166_v7 = vpop.xlane.xlu0 %3165  ;;  %7143 = vmatpush3.bf16.msra.mxu0 %v7481_v56  ;;  %v7496_v56 = vld [vmem:[%s9398_s6 + $0x138] sm:$0xff]  }
0x1523   :  { %v3167_v29 = vsub.f32 %v3163_v42, %v3166_v7  ;;  %7144 = vmatprep.subr.bf16.mxu0 %v7781_v17 }
0x1525   :  { %v3168_v34 = vmul.f32 1.442695, %v3167_v29 }
0x1526   :  { %7145 = vmatpush3.bf16.msra.mxu0 %v7482_v18  ;;  %v7497_v18 = vld [vmem:[%s9398_s6 + $0x170] sm:$0xff]  }
0x1527   :  { %6854 = vmatprep.subr.bf16.mxu0 %v7495_v15 }
0x152a   :  { %v3278_v19 = vpop.xlane.xlu0 %3277 }
0x152b   :  { %v3279_v20 = vsub.f32 %v3275_v2, %v3278_v19 }
0x152c   :  { %v7654_v21 = vpop.eup %7653 }
0x152d   :  { %v7656_v22 = vpop.eup %7655  ;;  %v3280_v23 = vmul.f32 1.442695, %v3279_v20  ;;  %v2947_v11 = vsel %vm956_vm4, %v7654_v21, 0.0 }
0x152e   :  { %2948 = vadd.xlane.f32.xlu1 %v2947_v11  ;;  %v3057_v24 = vsel %vm956_vm4, %v7656_v22, 0.0 }
0x152f   :  { %7657 = vpow2.f32 %v3280_v23  ;;  %3058 = vadd.xlane.f32.xlu0 %v3057_v24 }
0x1530   :  { %7659 = vpow2.f32 %v3168_v34 }
0x153c   :  { %v7658_v26 = vpop.eup %7657 }
0x153d   :  { %v3282_v27 = vsel %vm956_vm4, %v7658_v26, 0.0  ;;  %v7660_v35 = vpop.eup %7659 }
0x153e   :  { %3283 = vadd.xlane.f32.xlu0 %v3282_v27  ;;  %v3170_v36 = vsel %vm956_vm4, %v7660_v35, 0.0 }
0x153f   :  { %3064 = vrot.lane.b32.xlu1 %v8642_v38, %s7783_s1 }
0x1554   :  { %3176 = vrot.lane.b32.xlu0 %v8642_v38, %s7787_s2 }
0x1563   :  { %3171 = vadd.xlane.f32.xlu1 %v3170_v36 }
0x1574   :  { %3288 = vrot.lane.b32.xlu1 %v8642_v38, %s7789_s12 }
0x15b7   :  { %v2949_v37 = vpop.xlane.xlu1 %2948 }
0x15b8   :  { %7661 = vrcp.f32 %v2949_v37  ;;  %v3059_v40 = vpop.xlane.xlu0 %3058 }
0x15b9   :  { %7663 = vrcp.f32 %v3059_v40  ;;  %v3364_v40 = vrot.slane %v8540_v54, %v8236_v33 }
0x15bb   :  { %v3065_v45 = vpop.permute.xlu1 %3064 }
0x15bc   :  { %v3070_v48 = vsel %vm972_vm3, %v3065_v45, 0 }
0x15c5   :  { %v7662_v41 = vpop.eup %7661 }
0x15c6   :  { %v2951_v43 = vmul.f32 %v7662_v41, %v7654_v21  ;;  %v7664_v47 = vpop.eup %7663 }
0x15c7   :  { %v3284_v31 = vpop.xlane.xlu0 %3283  ;;  %v3061_v38 = vmul.f32 %v7664_v47, %v7656_v22 }
0x15c8   :  { %v2952_v46 = vpack.c.bf16 %v2951_v43, %v2951_v43 }
0x15c9   :  { %v3062_v30 = vpack.c.bf16 %v3061_v38, %v3061_v38 }
0x15ca   :  { %7099 = vmatmul.mubr.msk.bf16.vlgmr.msra.gmra.mxu1 %vm956_vm4, %v2952_v46 }
0x15cb   :  { %7109 = vmatpush3.bf16.msra.mxu1 %v3070_v48  ;;  %7110 = vmatprep.mubr.msk.bf16.mxu1 %vm7782_vm1, %v7781_v17  ;;  %v3177_v49 = vpop.permute.xlu0 %3176 }
0x15cc   :  { %7120 = vmatprep.subr.bf16.mxu1 %v7781_v17  ;;  %v3182_v44 = vsel %vm972_vm3, %v3177_v49, 0 }
0x15d2   :  { %7111 = vmatmul.mubr.msk.bf16.vlgmr.msra.gmra.mxu1 %vm956_vm4, %v3062_v30 }
0x15d3   :  { %7121 = vmatpush3.bf16.msra.mxu1 %v3182_v44  ;;  %7122 = vmatprep.mubr.msk.bf16.mxu1 %vm7782_vm1, %v7781_v17 }
0x15d4   :  { %7132 = vmatprep.subr.bf16.mxu1 %v7781_v17 }
0x15ec   :  { %v3172_v51 = vpop.xlane.xlu1 %3171 }
0x15ed   :  { %7665 = vrcp.f32 %v3172_v51 }
0x15ee   :  { %7667 = vrcp.f32 %v3284_v31 }
0x15f0   :  { %v3289_v53 = vpop.permute.xlu1 %3288 }
0x15f1   :  { %v3294_v57 = vsel %vm972_vm3, %v3289_v53, 0  ;;  %v7486_v53 = vld [vmem:[%s9397_s5 + $0xa0] ss:$8 sps:$4 sm:$0xff]  }
0x15fa   :  { %v7666_v25 = vpop.eup %7665 }
0x15fb   :  { %v3174_v52 = vmul.f32 %v7666_v25, %v7660_v35  ;;  %v7668_v55 = vpop.eup %7667  ;;  %v7485_v25 = vld [vmem:[%s9397_s5 + $0xb4] ss:$8 sps:$4 sm:$0xff]  }
0x15fc   :  { %v3286_v58 = vmul.f32 %v7668_v55, %v7658_v26  ;;  %v7489_v55 = vld [vmem:[%s9397_s5 + $0x90] ss:$8 sps:$4 sm:$0xff]  }
0x15fd   :  { %v3175_v42 = vpack.c.bf16 %v3174_v52, %v3174_v52  ;;  %v7488_v52 = vld [vmem:[%s9397_s5 + $0xa4] ss:$8 sps:$4 sm:$0xff]  }
0x15fe   :  { %v3287_v62 = vpack.c.bf16 %v3286_v58, %v3286_v58  ;;  %v7492_v58 = vld [vmem:[%s9397_s5 + $0x80] ss:$8 sps:$4 sm:$0xff]  }
0x15ff   :  { %7123 = vmatmul.mubr.msk.bf16.vlgmr.msra.gmra.mxu1 %vm956_vm4, %v3175_v42  ;;  %v7491_v42 = vld [vmem:[%s9397_s5 + $0x94] ss:$8 sps:$4 sm:$0xff]  }
0x1600   :  { %7133 = vmatpush3.bf16.msra.mxu1 %v3294_v57  ;;  %7134 = vmatprep.mubr.msk.bf16.mxu1 %vm7782_vm1, %v7781_v17  ;;  %v7494_v57 = vld [vmem:[%s9397_s5 + $0x84] ss:$8 sps:$4 sm:$0xff]  }
0x1601   :  { %3525 = vmatprep.subr.bf16.mxu1 %v7485_v25 }
0x1607   :  { %7135 = vmatmul.mubr.msk.bf16.vlgmr.msra.gmra.mxu1 %vm956_vm4, %v3287_v62 }
0x1608   :  { %3549 = vmatprep.mubr.bf16.mxu1 %v7780_v60 }
0x168a   :  { %v2993_v1 = vpop.f32.mrf.mxu1 }
0x168c   :  { %v7100_v2 = vpop.f32.mrf.mxu1 }
0x168d   :  { %v3449_v2 = vrot.slane %v8540_v54, %v8272_v59 }
0x168e   :  { %v2996_v3 = vpop.f32.mrf.mxu1 }
0x1690   :  { %v7101_v4 = vpop.f32.mrf.mxu1 }
0x1692   :  { %v3106_v9 = vpop.f32.mrf.mxu1 }
0x1693   :  { %3337 = vrot.lane.b32.xlu1 %v3106_v9, %s7788_s30  ;;  %v3454_v9 = vrot.slane %v8540_v54, %v8275_v61 }
0x1694   :  { %v7112_v10 = vpop.f32.mrf.mxu1 }
0x1696   :  { %v3109_v13 = vpop.f32.mrf.mxu1 }
0x1698   :  { %v7113_v14 = vpop.f32.mrf.mxu1 }
0x16bf   :  { %v3218_v7 = vpop.f32.mrf.mxu1 }
0x16c0   :  { %3341 = vrot.lane.b32.xlu0 %v3218_v7, %s7786_s29  ;;  %v7498_v7 = vld [vmem:[%s9398_s6 + $0x130] sm:$0xff]  }
0x16c1   :  { %v7124_v19 = vpop.f32.mrf.mxu1 }
0x16c2   :  { %v7499_v19 = vld [vmem:[%s9398_s6 + $0x168] sm:$0xff]  }
0x16c3   :  { %v3221_v20 = vpop.f32.mrf.mxu1 }
0x16c4   :  { %v7500_v20 = vld [vmem:[%s9398_s6 + $0x128] sm:$0xff]  }
0x16c5   :  { %v7125_v21 = vpop.f32.mrf.mxu1 }
0x16c6   :  { %v7501_v21 = vld [vmem:[%s9398_s6 + $0x160] sm:$0xff]  }
0x16c7   :  { %v3330_v22 = vpop.f32.mrf.mxu1 }
0x16c8   :  { %3345 = vrot.lane.b32.xlu1 %v3330_v22, %s7785_s0  ;;  %v7502_v22 = vld [vmem:[%s9398_s6 + $0x120] sm:$0xff]  }
0x16c9   :  { %v7136_v23 = vpop.f32.mrf.mxu1 }
0x16ca   :  { %v7503_v23 = vld [vmem:[%s9398_s6 + $0x158] sm:$0xff]  }
0x16cb   :  { %v3333_v11 = vpop.f32.mrf.mxu1 }
0x16cc   :  { %v7504_v11 = vld [vmem:[%s9398_s6 + $0x118] sm:$0xff]  }
0x16cd   :  { %v7137_v24 = vpop.f32.mrf.mxu1 }
0x16ce   :  { %v7505_v24 = vld [vmem:[%s9398_s6 + $0x150] sm:$0xff]  }
0x1705   :  { %v3338_v26 = vpop.permute.xlu1 %3337 }
0x1706   :  { %v3348_v29 = vsel %vm907_vm2, %v2993_v1, %v3338_v26  ;;  %v7506_v26 = vld [vmem:[%s9398_s6 + $0x110] sm:$0xff]  }
0x1732   :  { %v3342_v27 = vpop.permute.xlu0 %3341 }
0x1733   :  { %v3349_v34 = vsel %vm1366_vm5, %v3348_v29, %v3342_v27  ;;  %v7507_v27 = vld [vmem:[%s9398_s6 + $0x148] sm:$0xff]  }
0x1734   :  { %v7508_v29 = vld [vmem:[%s9398_s6 + $0x108] sm:$0xff]  }
0x173a   :  { %v3346_v35 = vpop.permute.xlu1 %3345 }
0x173b   :  { %v3350_v36 = vsel %vm1368_vm6, %v3349_v34, %v3346_v35  ;;  %v7509_v34 = vld [vmem:[%s9398_s6 + $0x140] sm:$0xff]  }
0x173c   :  { %v3351_v37 = vpack.c.bf16 %v3350_v36, %v3350_v36  ;;  %v7510_v35 = vld [vmem:[%s9398_s6 + $0x100] sm:$0xff]   ;;  %v3469_v36 = vrot.slane %v8540_v54, %v8333_v28 }
0x173e   :  { %7147 = vmatmul.mubr.msk.bf16.vlgmr.msra.gmra.mxu0 %vm776_vm0, %v3351_v37  ;;  %v3473_v37 = vrot.slane %v8634_v12, %v8333_v28 }
0x173f   :  { %6855 = vmatpush3.bf16.msra.mxu0 %v7496_v56 }
0x1740   :  { %6856 = vmatprep.subr.bf16.mxu0 %v7497_v18 }
0x1743   :  { %6857 = vmatpush3.bf16.msra.mxu0 %v7498_v7 }
0x1744   :  { %6858 = vmatprep.subr.bf16.mxu0 %v7499_v19 }
0x1747   :  { %6859 = vmatpush3.bf16.msra.mxu0 %v7500_v20 }
0x1748   :  { %6860 = vmatprep.subr.bf16.mxu0 %v7501_v21 }
0x174b   :  { %6861 = vmatpush3.bf16.msra.mxu0 %v7502_v22 }
0x174c   :  { %6862 = vmatprep.subr.bf16.mxu0 %v7503_v23 }
0x174f   :  { %6863 = vmatpush3.bf16.msra.mxu0 %v7504_v11  ;;  %v7516_v11 = vld [vmem:[%s9395_s3 + $0xe4] ss:$8 sps:$4 sm:$0xff]  }
0x1750   :  { %6864 = vmatprep.subr.bf16.mxu0 %v7505_v24  ;;  %v7514_v24 = vld [vmem:[%s9395_s3 + $0xe0] ss:$8 sps:$4 sm:$0xff]  }
0x1753   :  { %6865 = vmatpush3.bf16.msra.mxu0 %v7506_v26  ;;  %v7519_v26 = vld [vmem:[%s9395_s3 + $0xd4] ss:$8 sps:$4 sm:$0xff]  }
0x1754   :  { %6866 = vmatprep.subr.bf16.mxu0 %v7507_v27  ;;  %v7517_v27 = vld [vmem:[%s9395_s3 + $0xd0] ss:$8 sps:$4 sm:$0xff]  }
0x1757   :  { %6867 = vmatpush3.bf16.msra.mxu0 %v7508_v29  ;;  %v7522_v29 = vld [vmem:[%s9395_s3 + $0xc4] ss:$8 sps:$4 sm:$0xff]  }
0x1758   :  { %6868 = vmatprep.subr.bf16.mxu0 %v7509_v34  ;;  %v7520_v34 = vld [vmem:[%s9395_s3 + $0xc0] ss:$8 sps:$4 sm:$0xff]  }
0x175b   :  { %6869 = vmatpush3.bf16.msra.mxu0 %v7510_v35 }
0x175c   :  { %7162 = vmatprep.subr.bf16.mxu0 %v7781_v17 }
0x17fe   :  { %v3426_v41 = vpop.f32.mrf.mxu0 }
0x17ff   :  { %v3427_v43 = vadd.f32 %v3426_v41, %v3364_v40 }
0x1800   :  { %v7148_v45 = vpop.f32.mrf.mxu0 }
0x1801   :  { %v8729_v46 = vadd.f32 %v3427_v43, %v8077_v50  ;;  %v7483_v50 = vld [vmem:[%s9397_s5 + $0xb0] ss:$8 sps:$4 sm:$0xff]  }
0x1802   :  { %v3429_v47 = vpop.f32.mrf.mxu0  ;;  %3526 = vmatpush1.bf16.msra.mxu1 %v7483_v50 }
0x1803   :  { %v3433_v31 = vsel %vm776_vm0, %v8729_v46, 0.0  ;;  %3527 = vmatprep.subr.bf16.mxu1 %v7488_v52 }
0x1804   :  { %3434 = vadd.xlane.f32.xlu0 %v3433_v31  ;;  %v7149_v48 = vpop.f32.mrf.mxu0 }
0x1806   :  { %3528 = vmatpush1.bf16.msra.mxu1 %v7486_v53 }
0x1807   :  { %3529 = vmatprep.subr.bf16.mxu1 %v7491_v42 }
0x180a   :  { %3530 = vmatpush1.bf16.msra.mxu1 %v7489_v55 }
0x180b   :  { %3531 = vmatprep.subr.bf16.mxu1 %v7494_v57 }
0x180e   :  { %3532 = vmatpush1.bf16.msra.mxu1 %v7492_v58 }
0x188d   :  { %v3435_v38 = vpop.xlane.xlu0 %3434 }
0x188e   :  { %v3436_v49 = vmul.f32 0.015625, %v3435_v38 }
0x1890   :  { %v3437_v30 = vsub.f32 %v8729_v46, %v3436_v49 }
0x1892   :  { %v3438_v44 = vmul.f32 %v3437_v30, %v3437_v30 }
0x1894   :  { %v3439_v51 = vsel %vm776_vm0, %v3438_v44, 0.0 }
0x1895   :  { %3440 = vadd.xlane.f32.xlu1 %v3439_v51 }
0x191e   :  { %v3441_v62 = vpop.xlane.xlu1 %3440 }
0x191f   :  { %v3442_v0 = vmul.f32 0.015625, %v3441_v62 }
0x1921   :  { %v3443_v1 = vadd.f32 1e-05, %v3442_v0 }
0x1923   :  { %7669 = vrsqrt.f32 %v3443_v1 }
0x1930   :  { %v7670_v3 = vpop.eup %7669 }
0x1931   :  { %v3445_v4 = vmul.f32 %v7670_v3, %v3437_v30 }
0x1933   :  { %v3450_v10 = vmul.f32 %v3449_v2, %v3445_v4 }
0x1935   :  { %v3455_v13 = vadd.f32 %v3454_v9, %v3450_v10  ;;  %v3614_v9 = vrot.slane %v8540_v54, %v8342_v63  ;;  %v7513_v54 = vld [vmem:[%s9395_s3 + $0xf4] ss:$8 sps:$4 sm:$0xff]  }
0x1936   :  { %3847 = vmatprep.subr.bf16.mxu1 %v7513_v54 }
0x1937   :  { %v3456_v14 = vpack.c.bf16 %v3455_v13, %v3455_v13 }
0x1939   :  { %6389 = vmatmul.mubr.msk.bf16.vlgmr.msra.gmra.mxu1 %vm776_vm0, %v3456_v14 }
0x193a   :  { %3871 = vmatprep.mubr.bf16.mxu1 %v7780_v60 }
0x19f9   :  { %v3551_v40 = vpop.f32.mrf.mxu1 }
0x19fa   :  { %v3552_v41 = vadd.f32 %v3551_v40, %v3469_v36  ;;  %v8857_v40 = vld [vmem:[%s9399_s7 + $0x30] sm:$0xff] }
0x19fb   :  { %v3553_v43 = vpop.f32.mrf.mxu1 }
0x19fc   :  { %v3558_v45 = vmul.f32 %v3552_v41, %v3552_v41  ;;  %v3554_v47 = vadd.f32 %v3553_v43, %v3473_v37 }
0x19fd   :  { %v3555_v31 = vpop.f32.mrf.mxu1 }
0x19fe   :  { %v3560_v48 = vmul.f32 %v3558_v45, %v3552_v41  ;;  %v3559_v38 = vmul.f32 %v3554_v47, %v3554_v47 }
0x19ff   :  { %v3556_v49 = vpop.f32.mrf.mxu1 }
0x1a00   :  { %v3562_v30 = vmul.f32 0.044715, %v3560_v48  ;;  %v3561_v44 = vmul.f32 %v3559_v38, %v3554_v47  ;;  %v3791_v49 = vrot.slane %v8857_v40, %v8125_v16 }
0x1a02   :  { %v3564_v51 = vadd.f32 %v3562_v30, %v3552_v41  ;;  %v3563_v25 = vmul.f32 0.044715, %v3561_v44 }
0x1a04   :  { %v3566_v50 = vmul.f32 0.7978846, %v3564_v51  ;;  %v3565_v52 = vadd.f32 %v3563_v25, %v3554_v47 }
0x1a06   :  { %7671 = vtanh.f32 %v3566_v50  ;;  %v3567_v53 = vmul.f32 0.7978846, %v3565_v52 }
0x1a08   :  { %7673 = vtanh.f32 %v3567_v53  ;;  %v8878_v53 = vld [vmem:[%s9399_s7 + $0x38] sm:$0xff] }
0x1a13   :  { %v7672_v42 = vpop.eup %7671 }
0x1a14   :  { %v3570_v12 = vadd.f32 1.0, %v7672_v42  ;;  %v3795_v42 = vrot.slane %v8878_v53, %v8125_v16 }
0x1a15   :  { %v7674_v55 = vpop.eup %7673 }
0x1a16   :  { %v3571_v57 = vadd.f32 1.0, %v7674_v55  ;;  %v3572_v58 = vmul.f32 0.5, %v3570_v12 }
0x1a18   :  { %v3573_v62 = vmul.f32 0.5, %v3571_v57  ;;  %v3574_v0 = vmul.f32 %v3572_v58, %v3552_v41  ;;  %v3771_v41 = vrot.slane %v8857_v40, %v8109_v6 }
0x1a1a   :  { %v3575_v1 = vmul.f32 %v3573_v62, %v3554_v47  ;;  %v3576_v3 = vpack.c.bf16 %v3574_v0, %v3574_v0  ;;  %v3776_v47 = vrot.slane %v8857_v40, %v8117_v8 }
0x1a1c   :  { %v3577_v2 = vpack.c.bf16 %v3575_v1, %v3575_v1 }
0x1a1e   :  { %3743 = vmatprep.mubr.bf16.mxu0 %v3577_v2 }
0x1a1f   :  { %3744 = vmatmul.mubr.bf16.vlgmr.msra.gmra.mxu0 %v3576_v3 }
0x1a20   :  { %7164 = vmatprep.mubr.msk.bf16.mxu0 %vm7782_vm1, %v7781_v17 }
0x1adf   :  { %v6870_v4 = vpop.f32.mrf.mxu0 }
0x1ae1   :  { %v6871_v10 = vpop.f32.mrf.mxu0 }
0x1ae2   :  { %v6872_v13 = vadd.f32 %v6871_v10, %v6870_v4 }
0x1ae3   :  { %v6873_v14 = vpop.f32.mrf.mxu0 }
0x1ae4   :  { %v3746_v15 = vadd.f32 %v6872_v13, %v3614_v9 }
0x1ae5   :  { %v6874_v56 = vpop.f32.mrf.mxu0 }
0x1ae6   :  { %v8823_v18 = vadd.f32 %v3746_v15, %v8729_v46  ;;  %v7511_v46 = vld [vmem:[%s9395_s3 + $0xf0] ss:$8 sps:$4 sm:$0xff]  }
0x1ae7   :  { %3848 = vmatpush1.bf16.msra.mxu1 %v7511_v46 }
0x1ae8   :  { %v3755_v7 = vsel %vm776_vm0, %v8823_v18, 0.0  ;;  %3849 = vmatprep.subr.bf16.mxu1 %v7516_v11 }
0x1ae9   :  { %3756 = vadd.xlane.f32.xlu0 %v3755_v7 }
0x1aeb   :  { %3850 = vmatpush1.bf16.msra.mxu1 %v7514_v24 }
0x1aec   :  { %3851 = vmatprep.subr.bf16.mxu1 %v7519_v26 }
0x1aef   :  { %3852 = vmatpush1.bf16.msra.mxu1 %v7517_v27 }
0x1af0   :  { %3853 = vmatprep.subr.bf16.mxu1 %v7522_v29 }
0x1af3   :  { %3854 = vmatpush1.bf16.msra.mxu1 %v7520_v34 }
0x1af4   :  { %7150 = vmatprep.subr.bf16.mxu1 %v7781_v17 }
0x1b72   :  { %v3757_v19 = vpop.xlane.xlu0 %3756 }
0x1b73   :  { %v3758_v20 = vmul.f32 0.015625, %v3757_v19 }
0x1b75   :  { %v3759_v21 = vsub.f32 %v8823_v18, %v3758_v20 }
0x1b77   :  { %v3760_v22 = vmul.f32 %v3759_v21, %v3759_v21 }
0x1b79   :  { %v3761_v23 = vsel %vm776_vm0, %v3760_v22, 0.0 }
0x1b7a   :  { %3762 = vadd.xlane.f32.xlu0 %v3761_v23 }
0x1c03   :  { %v3763_v35 = vpop.xlane.xlu0 %3762 }
0x1c04   :  { %v3764_v36 = vmul.f32 0.015625, %v3763_v35 }
0x1c06   :  { %v3765_v37 = vadd.f32 1e-05, %v3764_v36 }
0x1c08   :  { %7675 = vrsqrt.f32 %v3765_v37 }
0x1c15   :  { %v7676_v43 = vpop.eup %7675 }
0x1c16   :  { %v3767_v45 = vmul.f32 %v7676_v43, %v3759_v21 }
0x1c18   :  { %v3772_v31 = vmul.f32 %v3771_v41, %v3767_v45 }
0x1c1a   :  { %v3777_v48 = vadd.f32 %v3776_v47, %v3772_v31 }
0x1c1c   :  { %v3778_v38 = vpack.c.bf16 %v3777_v48, %v3777_v48 }
0x1c1e   :  { %6456 = vmatmul.mubr.msk.bf16.vlgmr.msra.gmra.mxu1 %vm776_vm0, %v3778_v38 }
0x1c1f   :  { %7152 = vmatprep.mubr.msk.bf16.mxu1 %vm7782_vm1, %v7781_v17 }
0x1cde   :  { %v3873_v30 = vpop.f32.mrf.mxu1 }
0x1cdf   :  { %v3874_v44 = vadd.f32 %v3873_v30, %v3791_v49 }
0x1ce0   :  { %v3875_v51 = vpop.f32.mrf.mxu1 }
0x1ce1   :  { %v3880_v25 = vpack.c.bf16 %v3874_v44, %v3874_v44  ;;  %v3876_v57 = vadd.f32 %v3875_v51, %v3795_v42 }
0x1ce2   :  { %v3877_v50 = vpop.f32.mrf.mxu1 }
0x1ce3   :  { %3993 = vrot.lane.b32.xlu0 %v3880_v25, %s7785_s0  ;;  %3883 = vrot.lane.b32.xlu1 %v3880_v25, %s7784_s28  ;;  %v8886_v1 = vpack.c.bf16 %v3876_v57, %v3876_v57 }
0x1ce4   :  { %v3878_v52 = vpop.f32.mrf.mxu1 }
0x1ce5   :  { %v3949_v4 = vsel %vm972_vm3, %v8886_v1, 0 }
0x1ce7   :  { %4104 = vrot.lane.b32.xlu0 %v3880_v25, %s7787_s2  ;;  %3991 = vrot.lane.b32.xlu1 %v3880_v25, %s7783_s1 }
0x1ceb   :  { %4216 = vrot.lane.b32.xlu0 %v3880_v25, %s7789_s12  ;;  %4106 = vrot.lane.b32.xlu1 %v3880_v25, %s7786_s29 }
0x1cef   :  { %4218 = vrot.lane.b32.xlu1 %v3880_v25, %s7788_s30 }
0x1d55   :  { %v3994_v12 = vpop.permute.xlu0 %3993  ;;  %v3884_v55 = vpop.permute.xlu1 %3883 }
0x1d56   :  { %v3999_v58 = vsel %vm907_vm2, %v3994_v12, 0  ;;  %v3889_v62 = vsel %vm907_vm2, %v3884_v55, 0 }
0x1d57   :  { %7151 = vmatpush3.bf16.xpose.msra.mxu1 %v3889_v62  ;;  %7163 = vmatpush3.bf16.xpose.msra.mxu0 %v3999_v58 }
0x1d58   :  { %7156 = vmatprep.subr.bf16.mxu1 %v7781_v17  ;;  %7174 = vmatprep.subr.bf16.mxu0 %v7781_v17 }
0x1d59   :  { %v3992_v0 = vpop.permute.xlu1 %3991  ;;  %v4105_v10 = vpop.permute.xlu0 %4104 }
0x1d5d   :  { %v4107_v2 = vpop.permute.xlu1 %4106  ;;  %v4217_v14 = vpop.permute.xlu0 %4216 }
0x1d5e   :  { %v4112_v3 = vsel %vm907_vm2, %v4107_v2, 0  ;;  %7153 = vmatmul.mubr.msk.bf16.vlgmr.msra.gmra.mxu1 %vm907_vm2, %v3880_v25  ;;  %7165 = vmatmul.mubr.msk.bf16.vlgmr.msra.gmra.mxu0 %vm907_vm2, %v3992_v0 }
0x1d5f   :  { %7157 = vmatpush3.bf16.msra.mxu1 %v3949_v4  ;;  %7175 = vmatpush3.bf16.xpose.msra.mxu0 %v4112_v3 }
0x1d60   :  { %7176 = vmatprep.mubr.msk.bf16.mxu0 %vm7782_vm1, %v7781_v17  ;;  %7186 = vmatprep.subr.bf16.mxu0 %v7781_v17 }
0x1d61   :  { %7158 = vmatprep.mubr.msk.bf16.mxu1 %vm7782_vm1, %v7781_v17  ;;  %7168 = vmatprep.subr.bf16.mxu1 %v7781_v17  ;;  %v4219_v9 = vpop.permute.xlu1 %4218 }
0x1d62   :  { %v4224_v13 = vsel %vm907_vm2, %v4219_v9, 0 }
0x1d66   :  { %7177 = vmatmul.mubr.msk.bf16.vlgmr.msra.gmra.mxu0 %vm907_vm2, %v4105_v10 }
0x1d67   :  { %7187 = vmatpush3.bf16.xpose.msra.mxu0 %v4224_v13  ;;  %7188 = vmatprep.mubr.msk.bf16.mxu0 %vm7782_vm1, %v7781_v17 }
0x1d68   :  { %7198 = vmatprep.subr.bf16.mxu0 %v7781_v17 }
0x1d6e   :  { %7189 = vmatmul.mubr.msk.bf16.vlgmr.msra.gmra.mxu0 %vm907_vm2, %v4217_v14 }
0x1d6f   :  { %7206 = vmatprep.mubr.msk.bf16.mxu0 %vm7782_vm1, %v7781_v17 }
0x1e1e   :  { %v3925_v15 = vpop.f32.mrf.mxu1  ;;  %v4035_v56 = vpop.f32.mrf.mxu0 }
0x1e1f   :  { %v3931_v7 = vmul.f32 0.25, %v3925_v15  ;;  %v4041_v19 = vmul.f32 0.25, %v4035_v56 }
0x1e20   :  { %v7154_v20 = vpop.f32.mrf.mxu1  ;;  %v7166_v21 = vpop.f32.mrf.mxu0 }
0x1e21   :  { %v3932_v22 = vadd.f32 %v8668_v39, %v3931_v7  ;;  %v4042_v23 = vadd.f32 %v8668_v39, %v4041_v19 }
0x1e22   :  { %v3928_v54 = vpop.f32.mrf.mxu1  ;;  %v4038_v46 = vpop.f32.mrf.mxu0 }
0x1e23   :  { %v3933_v11 = vsel %vm956_vm4, %v3932_v22, -inf  ;;  %v4043_v24 = vsel %vm956_vm4, %v4042_v23, -inf }
0x1e24   :  { %3934 = vmax.xlane.f32.xlu1 %v3933_v11  ;;  %v7155_v26 = vpop.f32.mrf.mxu1  ;;  %4044 = vmax.xlane.f32.xlu0 %v4043_v24  ;;  %v7167_v27 = vpop.f32.mrf.mxu0 }
0x1e26   :  { %v4148_v29 = vpop.f32.mrf.mxu0 }
0x1e27   :  { %v4154_v34 = vmul.f32 0.25, %v4148_v29 }
0x1e28   :  { %v7178_v35 = vpop.f32.mrf.mxu0 }
0x1e29   :  { %v4155_v36 = vadd.f32 %v8668_v39, %v4154_v34 }
0x1e2a   :  { %v4151_v37 = vpop.f32.mrf.mxu0 }
0x1e2b   :  { %v4156_v41 = vsel %vm956_vm4, %v4155_v36, -inf }
0x1e2c   :  { %4157 = vmax.xlane.f32.xlu0 %v4156_v41  ;;  %v7179_v43 = vpop.f32.mrf.mxu0 }
0x1e2e   :  { %v4260_v45 = vpop.f32.mrf.mxu0 }
0x1e2f   :  { %v4266_v47 = vmul.f32 0.25, %v4260_v45 }
0x1e30   :  { %v7190_v31 = vpop.f32.mrf.mxu0 }
0x1e31   :  { %v4267_v48 = vadd.f32 %v8668_v39, %v4266_v47 }
0x1e32   :  { %v4263_v38 = vpop.f32.mrf.mxu0 }
0x1e33   :  { %v4268_v49 = vsel %vm956_vm4, %v4267_v48, -inf }
0x1e34   :  { %4269 = vmax.xlane.f32.xlu1 %v4268_v49  ;;  %v7191_v30 = vpop.f32.mrf.mxu0  ;;  %v7524_v49 = vld [vmem:[%s9396_s4 + $0x70] sm:$0xff]  }
0x1ead   :  { %v4045_v44 = vpop.xlane.xlu0 %4044  ;;  %v3935_v51 = vpop.xlane.xlu1 %3934 }
0x1eae   :  { %v4046_v25 = vsub.f32 %v4042_v23, %v4045_v44  ;;  %v3936_v50 = vsub.f32 %v3932_v22, %v3935_v51  ;;  %v7525_v51 = vld [vmem:[%s9396_s4 + $0x68] sm:$0xff]  }
0x1eb0   :  { %v4047_v52 = vmul.f32 1.442695, %v4046_v25  ;;  %v3937_v42 = vmul.f32 1.442695, %v3936_v50 }
0x1eb2   :  { %7677 = vpow2.f32 %v4047_v52 }
0x1eb3   :  { %7679 = vpow2.f32 %v3937_v42 }
0x1eb5   :  { %v4158_v12 = vpop.xlane.xlu0 %4157 }
0x1eb6   :  { %v4159_v55 = vsub.f32 %v4155_v36, %v4158_v12 }
0x1eb8   :  { %v4160_v57 = vmul.f32 1.442695, %v4159_v55 }
0x1eba   :  { %7681 = vpow2.f32 %v4160_v57  ;;  %v7526_v57 = vld [vmem:[%s9396_s4 + $0x60] sm:$0xff]  }
0x1ebd   :  { %v4270_v4 = vpop.xlane.xlu1 %4269 }
0x1ebe   :  { %v4271_v9 = vsub.f32 %v4267_v48, %v4270_v4  ;;  %v7523_v48 = vld [vmem:[%s9396_s4 + $0x78] sm:$0xff]  }
0x1ebf   :  { %v7678_v58 = vpop.eup %7677  ;;  %7199 = vmatpush3.bf16.msra.mxu0 %v7523_v48 }
0x1ec0   :  { %v7680_v62 = vpop.eup %7679  ;;  %v4049_v39 = vsel %vm956_vm4, %v7678_v58, 0.0  ;;  %v4272_v10 = vmul.f32 1.442695, %v4271_v9  ;;  %7200 = vmatprep.subr.bf16.mxu0 %v7781_v17 }
0x1ec1   :  { %4050 = vadd.xlane.f32.xlu1 %v4049_v39  ;;  %v3939_v0 = vsel %vm956_vm4, %v7680_v62, 0.0 }
0x1ec2   :  { %3940 = vadd.xlane.f32.xlu0 %v3939_v0  ;;  %7683 = vpow2.f32 %v4272_v10 }
0x1ec3   :  { %7201 = vmatpush3.bf16.msra.mxu0 %v7524_v49 }
0x1ec4   :  { %7202 = vmatprep.subr.bf16.mxu0 %v7781_v17 }
0x1ec7   :  { %v7682_v2 = vpop.eup %7681  ;;  %7203 = vmatpush3.bf16.msra.mxu0 %v7525_v51 }
0x1ec8   :  { %v4162_v3 = vsel %vm956_vm4, %v7682_v2, 0.0  ;;  %7204 = vmatprep.subr.bf16.mxu0 %v7781_v17 }
0x1ec9   :  { %4163 = vadd.xlane.f32.xlu0 %v4162_v3 }
0x1ecb   :  { %7205 = vmatpush3.bf16.msra.mxu0 %v7526_v57 }
0x1ecf   :  { %v7684_v13 = vpop.eup %7683 }
0x1ed0   :  { %v4274_v14 = vsel %vm956_vm4, %v7684_v13, 0.0 }
0x1ed2   :  { %4168 = vrot.lane.b32.xlu1 %v8886_v1, %s7787_s2 }
0x1edf   :  { %4056 = vrot.lane.b32.xlu0 %v8886_v1, %s7783_s1 }
0x1ef6   :  { %4275 = vadd.xlane.f32.xlu1 %v4274_v14 }
0x1f07   :  { %4280 = vrot.lane.b32.xlu1 %v8886_v1, %s7789_s12 }
0x1f4a   :  { %v4051_v56 = vpop.xlane.xlu1 %4050 }
0x1f4b   :  { %v3941_v15 = vpop.xlane.xlu0 %3940 }
0x1f4c   :  { %7685 = vrcp.f32 %v3941_v15  ;;  %v4356_v15 = vrot.slane %v8857_v40, %v8236_v33 }
0x1f4d   :  { %7687 = vrcp.f32 %v4051_v56 }
0x1f4e   :  { %v4169_v46 = vpop.permute.xlu1 %4168 }
0x1f4f   :  { %v4174_v26 = vsel %vm972_vm3, %v4169_v46, 0 }
0x1f52   :  { %v4164_v7 = vpop.xlane.xlu0 %4163 }
0x1f53   :  { %7689 = vrcp.f32 %v4164_v7 }
0x1f56   :  { %v4057_v21 = vpop.permute.xlu0 %4056 }
0x1f57   :  { %v4062_v54 = vsel %vm972_vm3, %v4057_v21, 0 }
0x1f59   :  { %v7686_v19 = vpop.eup %7685 }
0x1f5a   :  { %v3943_v20 = vmul.f32 %v7686_v19, %v7680_v62  ;;  %v7688_v23 = vpop.eup %7687 }
0x1f5b   :  { %v4053_v1 = vmul.f32 %v7688_v23, %v7678_v58 }
0x1f5c   :  { %v3944_v22 = vpack.c.bf16 %v3943_v20, %v3943_v20 }
0x1f5d   :  { %v4054_v11 = vpack.c.bf16 %v4053_v1, %v4053_v1 }
0x1f5e   :  { %7159 = vmatmul.mubr.msk.bf16.vlgmr.msra.gmra.mxu1 %vm956_vm4, %v3944_v22 }
0x1f5f   :  { %7169 = vmatpush3.bf16.msra.mxu1 %v4062_v54  ;;  %7170 = vmatprep.mubr.msk.bf16.mxu1 %vm7782_vm1, %v7781_v17  ;;  %v7757_v54 = vld [vmem:[%s9399_s7 + $0x10] sm:$0xff] }
0x1f60   :  { %7180 = vmatprep.subr.bf16.mxu1 %v7781_v17  ;;  %v7690_v24 = vpop.eup %7689  ;;  %v2622_v1 = vrot.slane %v7757_v54, %v8342_v63 }
0x1f61   :  { %v4166_v27 = vmul.f32 %v7690_v24, %v7682_v2 }
0x1f62   :  { %v2754_v24 = vadd.f32 %v8663_v32, %v2622_v1  ;;  %v7527_v32 = vld [vmem:[%s9397_s5 + $0xf0] ss:$8 sps:$4 sm:$0xff]  }
0x1f63   :  { %v4167_v29 = vpack.c.bf16 %v4166_v27, %v4166_v27 }
0x1f64   :  { %v8977_v27 = vadd.f32 %v2754_v24, %v8493_v5  ;;  %v7532_v5 = vld [vmem:[%s9397_s5 + $0xe4] ss:$8 sps:$4 sm:$0xff]  }
0x1f66   :  { %7171 = vmatmul.mubr.msk.bf16.vlgmr.msra.gmra.mxu1 %vm956_vm4, %v4054_v11 }
0x1f67   :  { %7181 = vmatpush3.bf16.msra.mxu1 %v4174_v26  ;;  %7182 = vmatprep.mubr.msk.bf16.mxu1 %vm7782_vm1, %v7781_v17 }
0x1f68   :  { %7192 = vmatprep.subr.bf16.mxu1 %v7781_v17 }
0x1f6e   :  { %7183 = vmatmul.mubr.msk.bf16.vlgmr.msra.gmra.mxu1 %vm956_vm4, %v4167_v29 }
0x1f6f   :  { %7194 = vmatprep.mubr.msk.bf16.mxu1 %vm7782_vm1, %v7781_v17 }
0x1f7f   :  { %v4276_v34 = vpop.xlane.xlu1 %4275 }
0x1f80   :  { %7691 = vrcp.f32 %v4276_v34  ;;  %v4747_v34 = vsel %vm776_vm0, %v8977_v27, 0.0 }
0x1f83   :  { %v4281_v35 = vpop.permute.xlu1 %4280 }
0x1f84   :  { %v4286_v36 = vsel %vm972_vm3, %v4281_v35, 0  ;;  %v7529_v35 = vld [vmem:[%s9397_s5 + $0xf4] ss:$8 sps:$4 sm:$0xff]  }
0x1f85   :  { %7193 = vmatpush3.bf16.msra.mxu1 %v4286_v36  ;;  %v7530_v36 = vld [vmem:[%s9397_s5 + $0xe0] ss:$8 sps:$4 sm:$0xff]  }
0x1f86   :  { %4517 = vmatprep.subr.bf16.mxu1 %v7529_v35 }
0x1f8d   :  { %v7692_v37 = vpop.eup %7691 }
0x1f8e   :  { %v4278_v41 = vmul.f32 %v7692_v37, %v7684_v13  ;;  %v7535_v37 = vld [vmem:[%s9397_s5 + $0xd4] ss:$8 sps:$4 sm:$0xff]  }
0x1f90   :  { %v4279_v43 = vpack.c.bf16 %v4278_v41, %v4278_v41  ;;  %v7533_v41 = vld [vmem:[%s9397_s5 + $0xd0] ss:$8 sps:$4 sm:$0xff]  }
0x1f92   :  { %7195 = vmatmul.mubr.msk.bf16.vlgmr.msra.gmra.mxu1 %vm956_vm4, %v4279_v43  ;;  %v7538_v43 = vld [vmem:[%s9397_s5 + $0xc4] ss:$8 sps:$4 sm:$0xff]  }
0x1f93   :  { %4541 = vmatprep.mubr.bf16.mxu1 %v7780_v60  ;;  %4518 = vmatpush1.bf16.msra.mxu1 %v7527_v32 }
0x1f94   :  { %4519 = vmatprep.subr.bf16.mxu1 %v7532_v5 }
0x1f97   :  { %4520 = vmatpush1.bf16.msra.mxu1 %v7530_v36 }
0x1f98   :  { %4521 = vmatprep.subr.bf16.mxu1 %v7535_v37 }
0x1f9b   :  { %4522 = vmatpush1.bf16.msra.mxu1 %v7533_v41 }
0x1f9c   :  { %4523 = vmatprep.subr.bf16.mxu1 %v7538_v43 }
0x201e   :  { %v3985_v45 = vpop.f32.mrf.mxu1 }
0x2020   :  { %v7160_v47 = vpop.f32.mrf.mxu1 }
0x2022   :  { %v3988_v31 = vpop.f32.mrf.mxu1 }
0x2024   :  { %v7161_v38 = vpop.f32.mrf.mxu1 }
0x2026   :  { %v4098_v30 = vpop.f32.mrf.mxu1 }
0x2027   :  { %4329 = vrot.lane.b32.xlu0 %v4098_v30, %s7788_s30 }
0x2028   :  { %v7172_v44 = vpop.f32.mrf.mxu1 }
0x202a   :  { %v4101_v25 = vpop.f32.mrf.mxu1 }
0x202b   :  { %v4441_v25 = vrot.slane %v8857_v40, %v8272_v59 }
0x202c   :  { %v7173_v50 = vpop.f32.mrf.mxu1 }
0x202e   :  { %v4210_v52 = vpop.f32.mrf.mxu1 }
0x202f   :  { %4333 = vrot.lane.b32.xlu1 %v4210_v52, %s7786_s29 }
0x2030   :  { %v7184_v42 = vpop.f32.mrf.mxu1 }
0x2031   :  { %v4446_v42 = vrot.slane %v8857_v40, %v8275_v61 }
0x2032   :  { %v4213_v12 = vpop.f32.mrf.mxu1 }
0x2034   :  { %v7185_v55 = vpop.f32.mrf.mxu1 }
0x2052   :  { %v4322_v58 = vpop.f32.mrf.mxu1 }
0x2053   :  { %4337 = vrot.lane.b32.xlu0 %v4322_v58, %s7785_s0  ;;  %v7539_v58 = vld [vmem:[%s9398_s6 + $0x1f8] sm:$0xff]  }
0x2054   :  { %v7196_v62 = vpop.f32.mrf.mxu1  ;;  %6897 = vmatprep.subr.bf16.mxu0 %v7539_v58 }
0x2055   :  { %v7540_v62 = vld [vmem:[%s9398_s6 + $0x1b8] sm:$0xff]  }
0x2056   :  { %v4325_v39 = vpop.f32.mrf.mxu1 }
0x2057   :  { %v7541_v39 = vld [vmem:[%s9398_s6 + $0x1f0] sm:$0xff]  }
0x2058   :  { %v7197_v0 = vpop.f32.mrf.mxu1 }
0x2059   :  { %v7542_v0 = vld [vmem:[%s9398_s6 + $0x1b0] sm:$0xff]  }
0x2099   :  { %v4330_v2 = vpop.permute.xlu0 %4329 }
0x209a   :  { %v4340_v4 = vsel %vm907_vm2, %v3985_v45, %v4330_v2  ;;  %v7536_v45 = vld [vmem:[%s9397_s5 + $0xc0] ss:$8 sps:$4 sm:$0xff]  }
0x209b   :  { %4524 = vmatpush1.bf16.msra.mxu1 %v7536_v45  ;;  %v7543_v2 = vld [vmem:[%s9398_s6 + $0x1e8] sm:$0xff]  }
0x20a1   :  { %v4334_v3 = vpop.permute.xlu1 %4333 }
0x20a2   :  { %v4341_v9 = vsel %vm1366_vm5, %v4340_v4, %v4334_v3  ;;  %v7544_v3 = vld [vmem:[%s9398_s6 + $0x1a8] sm:$0xff]   ;;  %v7545_v4 = vld [vmem:[%s9398_s6 + $0x1e0] sm:$0xff]  }
0x20c5   :  { %v4338_v10 = vpop.permute.xlu0 %4337 }
0x20c6   :  { %v4342_v13 = vsel %vm1368_vm6, %v4341_v9, %v4338_v10  ;;  %v7546_v9 = vld [vmem:[%s9398_s6 + $0x1a0] sm:$0xff]   ;;  %v7547_v10 = vld [vmem:[%s9398_s6 + $0x1d8] sm:$0xff]  }
0x20c7   :  { %v4343_v14 = vpack.c.bf16 %v4342_v13, %v4342_v13  ;;  %v7548_v13 = vld [vmem:[%s9398_s6 + $0x198] sm:$0xff]  }
0x20c9   :  { %7207 = vmatmul.mubr.msk.bf16.vlgmr.msra.gmra.mxu0 %vm776_vm0, %v4343_v14  ;;  %v7549_v14 = vld [vmem:[%s9398_s6 + $0x1d0] sm:$0xff]  }
0x20ca   :  { %6898 = vmatpush3.bf16.msra.mxu0 %v7540_v62 }
0x20cb   :  { %6899 = vmatprep.subr.bf16.mxu0 %v7541_v39 }
0x20ce   :  { %6900 = vmatpush3.bf16.msra.mxu0 %v7542_v0 }
0x20cf   :  { %6901 = vmatprep.subr.bf16.mxu0 %v7543_v2 }
0x20d2   :  { %6902 = vmatpush3.bf16.msra.mxu0 %v7544_v3 }
0x20d3   :  { %6903 = vmatprep.subr.bf16.mxu0 %v7545_v4 }
0x20d6   :  { %6904 = vmatpush3.bf16.msra.mxu0 %v7546_v9 }
0x20d7   :  { %6905 = vmatprep.subr.bf16.mxu0 %v7547_v10  ;;  %v7560_v10 = vld [vmem:[%s9395_s3 + $0x124] ss:$8 sps:$4 sm:$0xff]  }
0x20da   :  { %6906 = vmatpush3.bf16.msra.mxu0 %v7548_v13  ;;  %v7558_v13 = vld [vmem:[%s9395_s3 + $0x120] ss:$8 sps:$4 sm:$0xff]  }
0x20db   :  { %6907 = vmatprep.subr.bf16.mxu0 %v7549_v14  ;;  %v7563_v14 = vld [vmem:[%s9395_s3 + $0x114] ss:$8 sps:$4 sm:$0xff]  }
0x2189   :  { %v4418_v56 = vpop.f32.mrf.mxu0 }
0x218a   :  { %v4419_v7 = vadd.f32 %v4418_v56, %v4356_v15  ;;  %v7550_v15 = vld [vmem:[%s9398_s6 + $0x190] sm:$0xff]   ;;  %v7551_v56 = vld [vmem:[%s9398_s6 + $0x1c8] sm:$0xff]  }
0x218b   :  { %v7208_v19 = vpop.f32.mrf.mxu0  ;;  %6908 = vmatpush3.bf16.msra.mxu0 %v7550_v15  ;;  %v7561_v15 = vld [vmem:[%s9395_s3 + $0x110] ss:$8 sps:$4 sm:$0xff]  }
0x218c   :  { %v8966_v20 = vadd.f32 %v4419_v7, %v8823_v18  ;;  %v7552_v7 = vld [vmem:[%s9398_s6 + $0x188] sm:$0xff]   ;;  %6909 = vmatprep.subr.bf16.mxu0 %v7551_v56  ;;  %v7553_v19 = vld [vmem:[%s9398_s6 + $0x1c0] sm:$0xff]  }
0x218d   :  { %v4421_v21 = vpop.f32.mrf.mxu0  ;;  %v7566_v56 = vld [vmem:[%s9395_s3 + $0x104] ss:$8 sps:$4 sm:$0xff]  }
0x218e   :  { %v4425_v22 = vsel %vm776_vm0, %v8966_v20, 0.0  ;;  %v7554_v21 = vld [vmem:[%s9398_s6 + $0x180] sm:$0xff]  }
0x218f   :  { %4426 = vadd.xlane.f32.xlu1 %v4425_v22  ;;  %v7209_v23 = vpop.f32.mrf.mxu0  ;;  %6910 = vmatpush3.bf16.msra.mxu0 %v7552_v7  ;;  %v4461_v22 = vrot.slane %v8857_v40, %v8333_v28  ;;  %v7564_v7 = vld [vmem:[%s9395_s3 + $0x100] ss:$8 sps:$4 sm:$0xff]  }
0x2190   :  { %6911 = vmatprep.subr.bf16.mxu0 %v7553_v19  ;;  %v4465_v23 = vrot.slane %v8878_v53, %v8333_v28 }
0x2193   :  { %6912 = vmatpush3.bf16.msra.mxu0 %v7554_v21 }
0x2194   :  { %7222 = vmatprep.subr.bf16.mxu0 %v7781_v17 }
0x2218   :  { %v4427_v46 = vpop.xlane.xlu1 %4426 }
0x2219   :  { %v4428_v11 = vmul.f32 0.015625, %v4427_v46 }
0x221b   :  { %v4429_v26 = vsub.f32 %v8966_v20, %v4428_v11 }
0x221d   :  { %v4430_v18 = vmul.f32 %v4429_v26, %v4429_v26 }
0x221f   :  { %v4431_v29 = vsel %vm776_vm0, %v4430_v18, 0.0 }
0x2220   :  { %4432 = vadd.xlane.f32.xlu0 %v4431_v29 }
0x2224   :  { %4748 = vadd.xlane.f32.xlu0 %v4747_v34 }
0x22a9   :  { %v4433_v47 = vpop.xlane.xlu0 %4432 }
0x22aa   :  { %v4434_v31 = vmul.f32 0.015625, %v4433_v47 }
0x22ac   :  { %v4435_v48 = vadd.f32 1e-05, %v4434_v31 }
0x22ad   :  { %v4749_v38 = vpop.xlane.xlu0 %4748 }
0x22ae   :  { %7693 = vrsqrt.f32 %v4435_v48  ;;  %v4753_v49 = vmul.f32 0.015625, %v4749_v38 }
0x22b0   :  { %v9007_v30 = vsub.f32 %v8977_v27, %v4753_v49 }
0x22b2   :  { %v4757_v44 = vmul.f32 %v9007_v30, %v9007_v30 }
0x22b4   :  { %v4759_v51 = vsel %vm776_vm0, %v4757_v44, 0.0 }
0x22b5   :  { %4760 = vadd.xlane.f32.xlu0 %v4759_v51 }
0x22bb   :  { %v7694_v50 = vpop.eup %7693 }
0x22bc   :  { %v4437_v52 = vmul.f32 %v7694_v50, %v4429_v26 }
0x22be   :  { %v4442_v12 = vmul.f32 %v4441_v25, %v4437_v52  ;;  %v4606_v52 = vrot.slane %v8857_v40, %v8342_v63  ;;  %v7557_v40 = vld [vmem:[%s9395_s3 + $0x134] ss:$8 sps:$4 sm:$0xff]  }
0x22bf   :  { %4854 = vmatprep.subr.bf16.mxu1 %v7557_v40 }
0x22c0   :  { %v4447_v55 = vadd.f32 %v4446_v42, %v4442_v12 }
0x22c2   :  { %v4448_v57 = vpack.c.bf16 %v4447_v55, %v4447_v55 }
0x22c4   :  { %6494 = vmatmul.mubr.msk.bf16.vlgmr.msra.gmra.mxu1 %vm776_vm0, %v4448_v57 }
0x22c5   :  { %4878 = vmatprep.mubr.bf16.mxu1 %v7780_v60 }
0x233e   :  { %v4761_v19 = vpop.xlane.xlu0 %4760 }
0x233f   :  { %v4765_v21 = vmul.f32 0.015625, %v4761_v19 }
0x2384   :  { %v4543_v54 = vpop.f32.mrf.mxu1 }
0x2385   :  { %v4544_v1 = vadd.f32 %v4543_v54, %v4461_v22  ;;  %v4767_v22 = vadd.f32 1e-05, %v4765_v21 }
0x2386   :  { %v4545_v46 = vpop.f32.mrf.mxu1 }
0x2387   :  { %v4550_v11 = vmul.f32 %v4544_v1, %v4544_v1  ;;  %v4546_v24 = vadd.f32 %v4545_v46, %v4465_v23 }
0x2388   :  { %v4547_v26 = vpop.f32.mrf.mxu1 }
0x2389   :  { %v4552_v18 = vmul.f32 %v4550_v11, %v4544_v1  ;;  %v4551_v29 = vmul.f32 %v4546_v24, %v4546_v24  ;;  %v9110_v11 = vld [vmem:[%s9399_s7 + $0x40] sm:$0xff] }
0x238a   :  { %v4548_v34 = vpop.f32.mrf.mxu1 }
0x238b   :  { %v4554_v35 = vmul.f32 0.044715, %v4552_v18  ;;  %v4553_v32 = vmul.f32 %v4551_v29, %v4546_v24 }
0x238d   :  { %v4556_v5 = vadd.f32 %v4554_v35, %v4544_v1  ;;  %v4555_v36 = vmul.f32 0.044715, %v4553_v32  ;;  %v4782_v35 = vrot.slane %v9110_v11, %v8117_v8  ;;  %v9132_v8 = vld [vmem:[%s9399_s7 + $0x48] sm:$0xff]  ;;  %s7790_s7 = smov [#allocation2]  }
0x238f   :  { %v4558_v37 = vmul.f32 0.7978846, %v4556_v5  ;;  %v4557_v41 = vadd.f32 %v4555_v36, %v4546_v24 }
0x2391   :  { %7695 = vtanh.f32 %v4558_v37  ;;  %v4559_v43 = vmul.f32 0.7978846, %v4557_v41 }
0x2393   :  { %7697 = vtanh.f32 %v4559_v43 }
0x2394   :  { %7699 = vrsqrt.f32 %v4767_v22 }
0x239e   :  { %v7696_v45 = vpop.eup %7695 }
0x239f   :  { %v4562_v53 = vadd.f32 1.0, %v7696_v45 }
0x23a0   :  { %v7698_v47 = vpop.eup %7697 }
0x23a1   :  { %v4563_v31 = vadd.f32 1.0, %v7698_v47  ;;  %v4564_v48 = vmul.f32 0.5, %v4562_v53  ;;  %v7700_v46 = vpop.eup %7699 }
0x23a2   :  { %v4771_v26 = vmul.f32 %v7700_v46, %v9007_v30 }
0x23a3   :  { %v4565_v38 = vmul.f32 0.5, %v4563_v31  ;;  %v4566_v49 = vmul.f32 %v4564_v48, %v4544_v1 }
0x23a5   :  { %v4567_v44 = vmul.f32 %v4565_v38, %v4546_v24  ;;  %v4568_v25 = vpack.c.bf16 %v4566_v49, %v4566_v49  ;;  %v4776_v24 = vrot.slane %v9110_v11, %v8109_v6  ;;  %v4798_v6 = vrot.slane %v9110_v11, %v8125_v16 }
0x23a7   :  { %v4569_v51 = vpack.c.bf16 %v4567_v44, %v4567_v44  ;;  %v4777_v29 = vmul.f32 %v4776_v24, %v4771_v26 }
0x23a9   :  { %4735 = vmatprep.mubr.bf16.mxu0 %v4569_v51  ;;  %v4783_v5 = vadd.f32 %v4782_v35, %v4777_v29  ;;  %v4802_v51 = vrot.slane %v9132_v8, %v8125_v16 }
0x23aa   :  { %4736 = vmatmul.mubr.bf16.vlgmr.msra.gmra.mxu0 %v4568_v25 }
0x23ab   :  { %7224 = vmatprep.mubr.msk.bf16.mxu0 %vm7782_vm1, %v7781_v17 }
0x246a   :  { %v6913_v50 = vpop.f32.mrf.mxu0 }
0x246c   :  { %v6914_v42 = vpop.f32.mrf.mxu0 }
0x246d   :  { %v6915_v12 = vadd.f32 %v6914_v42, %v6913_v50 }
0x246e   :  { %v6916_v55 = vpop.f32.mrf.mxu0 }
0x246f   :  { %v4738_v57 = vadd.f32 %v6915_v12, %v4606_v52 }
0x2470   :  { %v6917_v58 = vpop.f32.mrf.mxu0 }
0x2471   :  { %v9076_v62 = vadd.f32 %v4738_v57, %v8966_v20  ;;  %v7555_v20 = vld [vmem:[%s9395_s3 + $0x130] ss:$8 sps:$4 sm:$0xff]  }
0x2472   :  { %4855 = vmatpush1.bf16.msra.mxu1 %v7555_v20 }
0x2473   :  { %v4750_v39 = vsel %vm776_vm0, %v9076_v62, 0.0  ;;  %4856 = vmatprep.subr.bf16.mxu1 %v7560_v10 }
0x2474   :  { %4751 = vadd.xlane.f32.xlu1 %v4750_v39 }
0x2476   :  { %4857 = vmatpush1.bf16.msra.mxu1 %v7558_v13  ;;  %v6179_v13 = vld [vmem:[%s9400_s8 + $0x28] sm:$0xff] }
0x2477   :  { %4858 = vmatprep.subr.bf16.mxu1 %v7563_v14 }
0x247a   :  { %4859 = vmatpush1.bf16.msra.mxu1 %v7561_v15 }
0x247b   :  { %4860 = vmatprep.subr.bf16.mxu1 %v7566_v56 }
0x247e   :  { %4861 = vmatpush1.bf16.msra.mxu1 %v7564_v7 }
0x247f   :  { %7210 = vmatprep.subr.bf16.mxu1 %v7781_v17 }
0x24fd   :  { %v4752_v0 = vpop.xlane.xlu1 %4751 }
0x24fe   :  { %v4754_v2 = vmul.f32 0.015625, %v4752_v0  ;;  %v6178_v0 = vld [vmem:[%s9400_s8 + $0x20] sm:$0xff] }
0x2500   :  { %v4756_v3 = vsub.f32 %v9076_v62, %v4754_v2 }
0x2502   :  { %v4758_v4 = vmul.f32 %v4756_v3, %v4756_v3 }
0x2504   :  { %v4762_v9 = vsel %vm776_vm0, %v4758_v4, 0.0 }
0x2505   :  { %4763 = vadd.xlane.f32.xlu1 %v4762_v9 }
0x258e   :  { %v4764_v23 = vpop.xlane.xlu1 %4763 }
0x258f   :  { %v4766_v54 = vmul.f32 0.015625, %v4764_v23 }
0x2591   :  { %v4768_v1 = vadd.f32 1e-05, %v4766_v54 }
0x2593   :  { %7701 = vrsqrt.f32 %v4768_v1 }
0x25a0   :  { %v7702_v18 = vpop.eup %7701 }
0x25a1   :  { %v4772_v34 = vmul.f32 %v7702_v18, %v4756_v3 }
0x25a3   :  { %v4778_v32 = vmul.f32 %v4776_v24, %v4772_v34 }
0x25a5   :  { %v4784_v36 = vadd.f32 %v4782_v35, %v4778_v32 }
0x25a7   :  { %v4785_v37 = vpack.c.bf16 %v4784_v36, %v4783_v5 }
0x25a9   :  { %6561 = vmatmul.mubr.msk.bf16.vlgmr.msra.gmra.mxu1 %vm776_vm0, %v4785_v37 }
0x25aa   :  { %7212 = vmatprep.mubr.msk.bf16.mxu1 %vm7782_vm1, %v7781_v17 }
0x2669   :  { %v4880_v41 = vpop.f32.mrf.mxu1 }
0x266a   :  { %v4881_v45 = vadd.f32 %v4880_v41, %v4798_v6 }
0x266b   :  { %v4882_v30 = vpop.f32.mrf.mxu1 }
0x266c   :  { %v4883_v50 = vadd.f32 %v4882_v30, %v4802_v51 }
0x266d   :  { %v4884_v43 = vpop.f32.mrf.mxu1 }
0x266e   :  { %v4885_v53 = vadd.f32 %v4884_v43, %v4798_v6 }
0x266f   :  { %v4886_v38 = vpop.f32.mrf.mxu1 }
0x2670   :  { %v4889_v47 = vpack.c.bf16 %v4885_v53, %v4881_v45  ;;  %v4887_v25 = vadd.f32 %v4886_v38, %v4802_v51 }
0x2672   :  { %5014 = vrot.lane.b32.xlu1 %v4889_v47, %s7785_s0  ;;  %4892 = vrot.lane.b32.xlu0 %v4889_v47, %s7784_s28  ;;  %v9140_v42 = vpack.c.bf16 %v4887_v25, %v4883_v50  ;;  %s6097_s28 = sshll.u32 %s7790_s7, 4  ;;  %s6098_s28 = int_to_ptr.vmem [resolvable:$true] %s6097_s28 }
0x2673   :  { %p7763_p1 = scmp.lt.s32.totalorder %s6098_s28, %s6098_s28 }
0x2676   :  { %5012 = vrot.lane.b32.xlu1 %v4889_v47, %s7783_s1  ;;  %5140 = vrot.lane.b32.xlu0 %v4889_v47, %s7786_s29 }
0x267a   :  { %5138 = vrot.lane.b32.xlu1 %v4889_v47, %s7787_s2  ;;  %5265 = vrot.lane.b32.xlu0 %v4889_v47, %s7788_s30 }
0x267e   :  { %5263 = vrot.lane.b32.xlu1 %v4889_v47, %s7789_s12 }
0x26e4   :  { %v5015_v31 = vpop.permute.xlu1 %5014  ;;  %v4893_v48 = vpop.permute.xlu0 %4892 }
0x26e5   :  { %v5020_v49 = vsel %vm907_vm2, %v5015_v31, 0  ;;  %v4898_v44 = vsel %vm907_vm2, %v4893_v48, 0 }
0x26e6   :  { %7211 = vmatpush3.bf16.xpose.msra.mxu1 %v4898_v44  ;;  %7223 = vmatpush3.bf16.xpose.msra.mxu0 %v5020_v49 }
0x26e7   :  { %7216 = vmatprep.subr.bf16.mxu1 %v7781_v17  ;;  %7234 = vmatprep.subr.bf16.mxu0 %v7781_v17 }
0x26e8   :  { %v5141_v52 = vpop.permute.xlu0 %5140  ;;  %v5013_v12 = vpop.permute.xlu1 %5012 }
0x26e9   :  { %v5146_v55 = vsel %vm907_vm2, %v5141_v52, 0 }
0x26ec   :  { %v5266_v16 = vpop.permute.xlu0 %5265  ;;  %v5139_v57 = vpop.permute.xlu1 %5138 }
0x26ed   :  { %7213 = vmatmul.mubr.msk.bf16.vlgmr.msra.gmra.mxu1 %vm907_vm2, %v4889_v47  ;;  %7225 = vmatmul.mubr.msk.bf16.vlgmr.msra.gmra.mxu0 %vm907_vm2, %v5013_v12  ;;  %v5271_v58 = vsel %vm907_vm2, %v5266_v16, 0 }
0x26ee   :  { %7217 = vmatpush3.bf16.msra.mxu1 %v9140_v42  ;;  %7235 = vmatpush3.bf16.xpose.msra.mxu0 %v5146_v55 }
0x26ef   :  { %7236 = vmatprep.mubr.msk.bf16.mxu0 %vm7782_vm1, %v7781_v17  ;;  %7246 = vmatprep.subr.bf16.mxu0 %v7781_v17 }
0x26f0   :  { %7218 = vmatprep.mubr.msk.bf16.mxu1 %vm7782_vm1, %v7781_v17  ;;  %7228 = vmatprep.subr.bf16.mxu1 %v7781_v17  ;;  %v5264_v39 = vpop.permute.xlu1 %5263 }
0x26f5   :  { %7237 = vmatmul.mubr.msk.bf16.vlgmr.msra.gmra.mxu0 %vm907_vm2, %v5139_v57 }
0x26f6   :  { %7247 = vmatpush3.bf16.xpose.msra.mxu0 %v5271_v58  ;;  %7248 = vmatprep.mubr.msk.bf16.mxu0 %vm7782_vm1, %v7781_v17 }
0x26f7   :  { %7258 = vmatprep.subr.bf16.mxu0 %v7781_v17 }
0x26fd   :  { %7249 = vmatmul.mubr.msk.bf16.vlgmr.msra.gmra.mxu0 %vm907_vm2, %v5264_v39 }
0x26fe   :  { %7266 = vmatprep.mubr.msk.bf16.mxu0 %vm7782_vm1, %v7781_v17 }
0x27ad   :  { %v4934_v2 = vpop.f32.mrf.mxu1  ;;  %v5056_v3 = vpop.f32.mrf.mxu0 }
0x27ae   :  { %v4941_v4 = vmul.f32 0.25, %v4934_v2  ;;  %v5063_v9 = vmul.f32 0.25, %v5056_v3 }
0x27af   :  { %v7214_v40 = vpop.f32.mrf.mxu1  ;;  %v7226_v20 = vpop.f32.mrf.mxu0 }
0x27b0   :  { %v4943_v10 = vadd.f32 %v6178_v0, %v4941_v4  ;;  %v9166_v56 = vadd.f32 %v6178_v0, %v5063_v9 }
0x27b1   :  { %v4937_v14 = vpop.f32.mrf.mxu1  ;;  %v5059_v15 = vpop.f32.mrf.mxu0 }
0x27b2   :  { %v4942_v7 = vmul.f32 0.25, %v4937_v14  ;;  %v5064_v19 = vmul.f32 0.25, %v5059_v15  ;;  %v4945_v21 = vsel %vm907_vm2, %v4943_v10, -inf  ;;  %v5067_v26 = vsel %vm907_vm2, %v9166_v56, -inf }
0x27b3   :  { %v7227_v22 = vpop.f32.mrf.mxu0  ;;  %4946 = vmax.xlane.f32.xlu0 %v4945_v21  ;;  %v7215_v23 = vpop.f32.mrf.mxu1 }
0x27b4   :  { %v4944_v54 = vadd.f32 %v6179_v13, %v4942_v7  ;;  %v5066_v46 = vadd.f32 %v6179_v13, %v5064_v19 }
0x27b5   :  { %v5182_v1 = vpop.f32.mrf.mxu0 }
0x27b6   :  { %v5189_v24 = vmul.f32 0.25, %v5182_v1  ;;  %v4948_v18 = vsel %vm907_vm2, %v4944_v54, -inf  ;;  %v5070_v5 = vsel %vm907_vm2, %v5066_v46, -inf }
0x27b7   :  { %5068 = vmax.xlane.f32.xlu0 %v5067_v26  ;;  %4949 = vmax.xlane.f32.xlu1 %v4948_v18  ;;  %v7238_v29 = vpop.f32.mrf.mxu0 }
0x27b8   :  { %v9172_v34 = vadd.f32 %v6178_v0, %v5189_v24 }
0x27b9   :  { %v5185_v35 = vpop.f32.mrf.mxu0 }
0x27ba   :  { %v5190_v32 = vmul.f32 0.25, %v5185_v35  ;;  %v5193_v36 = vsel %vm907_vm2, %v9172_v34, -inf }
0x27bb   :  { %5071 = vmax.xlane.f32.xlu0 %v5070_v5  ;;  %5194 = vmax.xlane.f32.xlu1 %v5193_v36  ;;  %v7239_v37 = vpop.f32.mrf.mxu0 }
0x27bc   :  { %v5192_v41 = vadd.f32 %v6179_v13, %v5190_v32 }
0x27bd   :  { %v5307_v6 = vpop.f32.mrf.mxu0 }
0x27be   :  { %v5314_v30 = vmul.f32 0.25, %v5307_v6  ;;  %v5196_v43 = vsel %vm907_vm2, %v5192_v41, -inf }
0x27bf   :  { %5197 = vmax.xlane.f32.xlu0 %v5196_v43  ;;  %v7250_v45 = vpop.f32.mrf.mxu0 }
0x27c0   :  { %v5316_v53 = vadd.f32 %v6178_v0, %v5314_v30 }
0x27c1   :  { %v5310_v47 = vpop.f32.mrf.mxu0 }
0x27c2   :  { %v5315_v31 = vmul.f32 0.25, %v5310_v47  ;;  %v5318_v48 = vsel %vm907_vm2, %v5316_v53, -inf }
0x27c3   :  { %5319 = vmax.xlane.f32.xlu1 %v5318_v48  ;;  %v7251_v38 = vpop.f32.mrf.mxu0 }
0x27c4   :  { %v5317_v49 = vadd.f32 %v6179_v13, %v5315_v31 }
0x27c6   :  { %v5321_v44 = vsel %vm907_vm2, %v5317_v49, -inf }
0x27c7   :  { %5322 = vmax.xlane.f32.xlu0 %v5321_v44 }
0x283c   :  { %v4947_v51 = vpop.xlane.xlu0 %4946 }
0x283d   :  { %v4951_v25 = vsub.f32 %v4943_v10, %v4947_v51 }
0x283f   :  { %v4953_v50 = vmul.f32 1.442695, %v4951_v25 }
0x2840   :  { %v4950_v52 = vpop.xlane.xlu1 %4949  ;;  %v5069_v12 = vpop.xlane.xlu0 %5068 }
0x2841   :  { %7703 = vpow2.f32 %v4953_v50  ;;  %v4952_v55 = vsub.f32 %v4944_v54, %v4950_v52  ;;  %v5073_v54 = vsub.f32 %v9166_v56, %v5069_v12 }
0x2843   :  { %v4955_v16 = vmul.f32 1.442695, %v4952_v55 }
0x2844   :  { %v5072_v57 = vpop.xlane.xlu0 %5071  ;;  %v5195_v1 = vpop.xlane.xlu1 %5194 }
0x2845   :  { %7705 = vpow2.f32 %v4955_v16  ;;  %v5074_v58 = vsub.f32 %v5066_v46, %v5072_v57  ;;  %v5075_v46 = vmul.f32 1.442695, %v5073_v54  ;;  %v5199_v24 = vsub.f32 %v9172_v34, %v5195_v1 }
0x2847   :  { %v5077_v39 = vmul.f32 1.442695, %v5074_v58  ;;  %v5201_v18 = vmul.f32 1.442695, %v5199_v24 }
0x2848   :  { %v5198_v0 = vpop.xlane.xlu0 %5197 }
0x2849   :  { %v5200_v2 = vsub.f32 %v5192_v41, %v5198_v0  ;;  %7707 = vpow2.f32 %v5077_v39 }
0x284b   :  { %v5203_v3 = vmul.f32 1.442695, %v5200_v2 }
0x284c   :  { %v5320_v26 = vpop.xlane.xlu1 %5319 }
0x284d   :  { %7709 = vpow2.f32 %v5203_v3  ;;  %v5324_v29 = vsub.f32 %v5316_v53, %v5320_v26 }
0x284e   :  { %v7704_v4 = vpop.eup %7703 }
0x284f   :  { %v4957_v9 = vsel %vm907_vm2, %v7704_v4, 0.0  ;;  %v5326_v35 = vmul.f32 1.442695, %v5324_v29  ;;  %v7570_v29 = vld [vmem:[%s9396_s4 + $0x80] sm:$0xff]  }
0x2850   :  { %4958 = vadd.xlane.f32.xlu1 %v4957_v9  ;;  %v5323_v40 = vpop.xlane.xlu0 %5322 }
0x2851   :  { %v5325_v20 = vsub.f32 %v5317_v49, %v5323_v40 }
0x2852   :  { %v7706_v10 = vpop.eup %7705 }
0x2853   :  { %v5328_v13 = vmul.f32 1.442695, %v5325_v20  ;;  %v4960_v14 = vsel %vm907_vm2, %v7706_v10, 0.0 }
0x2854   :  { %4961 = vadd.xlane.f32.xlu0 %v4960_v14 }
0x2855   :  { %7711 = vpow2.f32 %v5328_v13 }
0x2856   :  { %v7708_v15 = vpop.eup %7707  ;;  %7713 = vpow2.f32 %v5075_v46  ;;  %v7569_v46 = vld [vmem:[%s9396_s4 + $0x88] sm:$0xff]  }
0x2857   :  { %v5082_v7 = vsel %vm907_vm2, %v7708_v15, 0.0  ;;  %7715 = vpow2.f32 %v5201_v18 }
0x2858   :  { %5083 = vadd.xlane.f32.xlu0 %v5082_v7  ;;  %7717 = vpow2.f32 %v5326_v35 }
0x285a   :  { %v9183_v19 = vpop.eup %7709 }
0x285b   :  { %v5208_v21 = vsel %vm907_vm2, %v9183_v19, 0.0 }
0x285c   :  { %5209 = vadd.xlane.f32.xlu0 %v5208_v21 }
0x2861   :  { %5091 = vrot.lane.b32.xlu1 %v9140_v42, %s7783_s1 }
0x2862   :  { %v9189_v22 = vpop.eup %7711 }
0x2863   :  { %v5333_v23 = vsel %vm907_vm2, %v9189_v22, 0.0  ;;  %v7714_v32 = vpop.eup %7713 }
0x2864   :  { %5334 = vadd.xlane.f32.xlu0 %v5333_v23  ;;  %v5079_v5 = vsel %vm907_vm2, %v7714_v32, 0.0  ;;  %v7716_v36 = vpop.eup %7715 }
0x2865   :  { %v5205_v56 = vsel %vm907_vm2, %v7716_v36, 0.0  ;;  %v7718_v37 = vpop.eup %7717 }
0x2866   :  { %v5330_v34 = vsel %vm907_vm2, %v7718_v37, 0.0 }
0x287a   :  { %5216 = vrot.lane.b32.xlu0 %v9140_v42, %s7787_s2 }
0x2885   :  { %5080 = vadd.xlane.f32.xlu1 %v5079_v5 }
0x2889   :  { %5206 = vadd.xlane.f32.xlu1 %v5205_v56 }
0x288d   :  { %5331 = vadd.xlane.f32.xlu1 %v5330_v34 }
0x289e   :  { %5341 = vrot.lane.b32.xlu1 %v9140_v42, %s7789_s12 }
0x28d9   :  { %v4959_v41 = vpop.xlane.xlu1 %4958 }
0x28da   :  { %7719 = vrcp.f32 %v4959_v41 }
0x28dd   :  { %v4962_v6 = vpop.xlane.xlu0 %4961  ;;  %v5092_v31 = vpop.permute.xlu1 %5091 }
0x28de   :  { %7721 = vrcp.f32 %v4962_v6 }
0x28e1   :  { %v5084_v48 = vpop.xlane.xlu0 %5083 }
0x28e2   :  { %7723 = vrcp.f32 %v5084_v48 }
0x28e5   :  { %v5210_v38 = vpop.xlane.xlu0 %5209 }
0x28e7   :  { %v7720_v30 = vpop.eup %7719 }
0x28e8   :  { %v4965_v45 = vmul.f32 %v7720_v30, %v7704_v4 }
0x28eb   :  { %v7722_v43 = vpop.eup %7721 }
0x28ec   :  { %v4966_v53 = vmul.f32 %v7722_v43, %v7706_v10 }
0x28ed   :  { %v5335_v25 = vpop.xlane.xlu0 %5334 }
0x28ee   :  { %v4967_v47 = vpack.c.bf16 %v4966_v53, %v4965_v45 }
0x28ef   :  { %v7724_v51 = vpop.eup %7723 }
0x28f0   :  { %7219 = vmatmul.mubr.msk.bf16.vlgmr.msra.gmra.mxu1 %vm907_vm2, %v4967_v47  ;;  %v5088_v52 = vmul.f32 %v7724_v51, %v7708_v15 }
0x28f1   :  { %7229 = vmatpush3.bf16.msra.mxu1 %v5092_v31  ;;  %7230 = vmatprep.mubr.msk.bf16.mxu1 %vm7782_vm1, %v7781_v17  ;;  %v5217_v57 = vpop.permute.xlu0 %5216 }
0x28f2   :  { %7240 = vmatprep.subr.bf16.mxu1 %v7781_v17 }
0x290e   :  { %v5081_v42 = vpop.xlane.xlu1 %5080 }
0x290f   :  { %7725 = vrcp.f32 %v5081_v42 }
0x2912   :  { %v5207_v49 = vpop.xlane.xlu1 %5206 }
0x2913   :  { %7727 = vrcp.f32 %v5207_v49 }
0x2914   :  { %7729 = vrcp.f32 %v5210_v38 }
0x2916   :  { %v5332_v44 = vpop.xlane.xlu1 %5331 }
0x2917   :  { %7731 = vrcp.f32 %v5332_v44 }
0x2918   :  { %7733 = vrcp.f32 %v5335_v25 }
0x291a   :  { %v5342_v4 = vpop.permute.xlu1 %5341 }
0x291c   :  { %v7726_v50 = vpop.eup %7725 }
0x291d   :  { %v5087_v12 = vmul.f32 %v7726_v50, %v7714_v32 }
0x291f   :  { %v5089_v55 = vpack.c.bf16 %v5088_v52, %v5087_v12  ;;  %v5431_v52 = vrot.slane %v9110_v11, %v8236_v33 }
0x2920   :  { %v7728_v16 = vpop.eup %7727 }
0x2921   :  { %7231 = vmatmul.mubr.msk.bf16.vlgmr.msra.gmra.mxu1 %vm907_vm2, %v5089_v55  ;;  %v7730_v58 = vpop.eup %7729  ;;  %v5213_v39 = vmul.f32 %v7728_v16, %v7716_v36 }
0x2922   :  { %7241 = vmatpush3.bf16.msra.mxu1 %v5217_v57  ;;  %7242 = vmatprep.mubr.msk.bf16.mxu1 %vm7782_vm1, %v7781_v17  ;;  %v5214_v0 = vmul.f32 %v7730_v58, %v9183_v19  ;;  %v7567_v19 = vld [vmem:[%s9396_s4 + $0x98] sm:$0xff]  }
0x2923   :  { %7252 = vmatprep.subr.bf16.mxu1 %v7781_v17  ;;  %7259 = vmatpush3.bf16.msra.mxu0 %v7567_v19  ;;  %v7571_v19 = vld [vmem:[%s9397_s5 + $0x130] ss:$8 sps:$4 sm:$0xff]  }
0x2924   :  { %v5215_v2 = vpack.c.bf16 %v5214_v0, %v5213_v39  ;;  %v7732_v3 = vpop.eup %7731  ;;  %7260 = vmatprep.subr.bf16.mxu0 %v7781_v17 }
0x2925   :  { %v7734_v9 = vpop.eup %7733  ;;  %v5338_v40 = vmul.f32 %v7732_v3, %v7718_v37 }
0x2926   :  { %v5339_v20 = vmul.f32 %v7734_v9, %v9189_v22  ;;  %v7568_v22 = vld [vmem:[%s9396_s4 + $0x90] sm:$0xff]  }
0x2927   :  { %7261 = vmatpush3.bf16.msra.mxu0 %v7568_v22  ;;  %v7577_v22 = vld [vmem:[%s9397_s5 + $0x110] ss:$8 sps:$4 sm:$0xff]  }
0x2928   :  { %v5340_v10 = vpack.c.bf16 %v5339_v20, %v5338_v40  ;;  %7262 = vmatprep.subr.bf16.mxu0 %v7781_v17 }
0x2929   :  { %7243 = vmatmul.mubr.msk.bf16.vlgmr.msra.gmra.mxu1 %vm907_vm2, %v5215_v2 }
0x292a   :  { %7253 = vmatpush3.bf16.msra.mxu1 %v5342_v4  ;;  %7254 = vmatprep.mubr.msk.bf16.mxu1 %vm7782_vm1, %v7781_v17 }
0x292b   :  { %7263 = vmatpush3.bf16.msra.mxu0 %v7569_v46 }
0x292c   :  { %7264 = vmatprep.subr.bf16.mxu0 %v7781_v17 }
0x292f   :  { %7265 = vmatpush3.bf16.msra.mxu0 %v7570_v29 }
0x2931   :  { %7255 = vmatmul.mubr.msk.bf16.vlgmr.msra.gmra.mxu1 %vm907_vm2, %v5340_v10 }
0x2932   :  { %5633 = vmatprep.mubr.bf16.mxu1 %v7780_v60 }
0x29b0   :  { %v5005_v13 = vpop.f32.mrf.mxu1 }
0x29b2   :  { %v7220_v14 = vpop.f32.mrf.mxu1 }
0x29b4   :  { %v5008_v15 = vpop.f32.mrf.mxu1 }
0x29b6   :  { %v7221_v7 = vpop.f32.mrf.mxu1 }
0x29b7   :  { %v7573_v7 = vld [vmem:[%s9397_s5 + $0x134] ss:$8 sps:$4 sm:$0xff]  }
0x29b8   :  { %5609 = vmatprep.subr.bf16.mxu1 %v7573_v7 }
0x29b9   :  { %5610 = vmatpush1.bf16.msra.mxu1 %v7571_v19 }
0x29e1   :  { %v5131_v21 = vpop.f32.mrf.mxu1 }
0x29e3   :  { %v7232_v23 = vpop.f32.mrf.mxu1 }
0x29e4   :  { %v7574_v23 = vld [vmem:[%s9397_s5 + $0x120] ss:$8 sps:$4 sm:$0xff]  }
0x29e5   :  { %v5134_v54 = vpop.f32.mrf.mxu1 }
0x29e6   :  { %v7300_v1 = vpack.i.bf16 %v5134_v54, %v5131_v21  ;;  %v7576_v21 = vld [vmem:[%s9397_s5 + $0x124] ss:$8 sps:$4 sm:$0xff]   ;;  %v7579_v54 = vld [vmem:[%s9397_s5 + $0x114] ss:$8 sps:$4 sm:$0xff]  }
0x29e7   :  { %v7233_v60 = vpop.f32.mrf.mxu1  ;;  %5611 = vmatprep.subr.bf16.mxu1 %v7576_v21 }
0x29e8   :  { %7301 = vrot.lane.b32.xlu1 %v7300_v1, %s7788_s30  ;;  %5612 = vmatpush1.bf16.msra.mxu1 %v7574_v23  ;;  %v7582_v1 = vld [vmem:[%s9397_s5 + $0x104] ss:$8 sps:$4 sm:$0xff]   ;;  %v7580_v60 = vld [vmem:[%s9397_s5 + $0x100] ss:$8 sps:$4 sm:$0xff]  }
0x29e9   :  { %v5256_v24 = vpop.f32.mrf.mxu1  ;;  %5613 = vmatprep.subr.bf16.mxu1 %v7579_v54 }
0x29eb   :  { %v7244_v26 = vpop.f32.mrf.mxu1 }
0x29ec   :  { %5614 = vmatpush1.bf16.msra.mxu1 %v7577_v22 }
0x29ed   :  { %v5259_v18 = vpop.f32.mrf.mxu1  ;;  %5615 = vmatprep.subr.bf16.mxu1 %v7582_v1 }
0x29ee   :  { %v7305_v35 = vpack.i.bf16 %v5259_v18, %v5256_v24 }
0x29ef   :  { %v7245_v32 = vpop.f32.mrf.mxu1 }
0x29f0   :  { %7306 = vrot.lane.b32.xlu0 %v7305_v35, %s7786_s29  ;;  %5616 = vmatpush1.bf16.msra.mxu1 %v7580_v60 }
0x29f1   :  { %v5381_v5 = vpop.f32.mrf.mxu1  ;;  %7270 = vmatprep.subr.mxu1 %v7781_v17 }
0x29f3   :  { %v7256_v36 = vpop.f32.mrf.mxu1 }
0x29f5   :  { %v5384_v56 = vpop.f32.mrf.mxu1 }
0x29f6   :  { %v7310_v37 = vpack.i.bf16 %v5384_v56, %v5381_v5  ;;  %v5531_v5 = vrot.slane %v9110_v11, %v8272_v59  ;;  %v7583_v59 = vld [vmem:[%s9398_s6 + $0x278] sm:$0xff]  }
0x29f7   :  { %v7257_v34 = vpop.f32.mrf.mxu1  ;;  %6940 = vmatprep.subr.bf16.mxu0 %v7583_v59 }
0x29f8   :  { %7311 = vrot.lane.b32.xlu1 %v7310_v37, %s7785_s0 }
0x2a5a   :  { %v7302_v41 = vpop.permute.xlu1 %7301 }
0x2a5b   :  { %v7304_v30 = vunpack.i.h.bf16 %v7302_v41  ;;  %v7303_v43 = vunpack.i.l.bf16 %v7302_v41  ;;  %v5537_v41 = vrot.slane %v9110_v11, %v8275_v61  ;;  %v7585_v61 = vld [vmem:[%s9398_s6 + $0x270] sm:$0xff]  }
0x2a5d   :  { %v5413_v31 = vsel %vm907_vm2, %v5008_v15, %v7304_v30  ;;  %v5412_v48 = vsel %vm907_vm2, %v5005_v13, %v7303_v43 }
0x2a62   :  { %v7307_v6 = vpop.permute.xlu0 %7306 }
0x2a63   :  { %v7309_v45 = vunpack.i.h.bf16 %v7307_v6  ;;  %v7308_v53 = vunpack.i.l.bf16 %v7307_v6 }
0x2a65   :  { %v5415_v49 = vsel %vm1366_vm5, %v5413_v31, %v7309_v45  ;;  %v5414_v44 = vsel %vm1366_vm5, %v5412_v48, %v7308_v53  ;;  %v7584_v53 = vld [vmem:[%s9398_s6 + $0x238] sm:$0xff]   ;;  %v7587_v31 = vld [vmem:[%s9398_s6 + $0x268] sm:$0xff]  }
0x2a66   :  { %v7588_v48 = vld [vmem:[%s9398_s6 + $0x228] sm:$0xff]  }
0x2a6a   :  { %v7312_v47 = vpop.permute.xlu1 %7311 }
0x2a6b   :  { %v7314_v42 = vunpack.i.h.bf16 %v7312_v47  ;;  %v7313_v38 = vunpack.i.l.bf16 %v7312_v47  ;;  %v7586_v47 = vld [vmem:[%s9398_s6 + $0x230] sm:$0xff]  }
0x2a6d   :  { %v5417_v51 = vsel %vm1368_vm6, %v5415_v49, %v7314_v42  ;;  %v5416_v25 = vsel %vm1368_vm6, %v5414_v44, %v7313_v38  ;;  %v7589_v42 = vld [vmem:[%s9398_s6 + $0x260] sm:$0xff]   ;;  %v7591_v49 = vld [vmem:[%s9398_s6 + $0x258] sm:$0xff]  }
0x2a6e   :  { %v5418_v50 = vpack.c.bf16 %v5417_v51, %v5416_v25  ;;  %v7590_v38 = vld [vmem:[%s9398_s6 + $0x220] sm:$0xff]   ;;  %v7592_v44 = vld [vmem:[%s9398_s6 + $0x218] sm:$0xff]   ;;  %v7593_v51 = vld [vmem:[%s9398_s6 + $0x250] sm:$0xff]  }
0x2a6f   :  { %v7594_v25 = vld [vmem:[%s9398_s6 + $0x210] sm:$0xff]  }
0x2a70   :  { %7267 = vmatmul.mubr.msk.bf16.vlgmr.msra.gmra.mxu0 %vm776_vm0, %v5418_v50  ;;  %v7595_v50 = vld [vmem:[%s9398_s6 + $0x248] sm:$0xff]  }
0x2a71   :  { %6941 = vmatpush3.bf16.msra.mxu0 %v7584_v53 }
0x2a72   :  { %6942 = vmatprep.subr.bf16.mxu0 %v7585_v61 }
0x2a75   :  { %6943 = vmatpush3.bf16.msra.mxu0 %v7586_v47 }
0x2a76   :  { %6944 = vmatprep.subr.bf16.mxu0 %v7587_v31 }
0x2a79   :  { %6945 = vmatpush3.bf16.msra.mxu0 %v7588_v48 }
0x2a7a   :  { %6946 = vmatprep.subr.bf16.mxu0 %v7589_v42  ;;  %v5718_v42 = vrot.slane %v9110_v11, %v8342_v63 }
0x2a7d   :  { %6947 = vmatpush3.bf16.msra.mxu0 %v7590_v38 }
0x2a7e   :  { %6948 = vmatprep.subr.bf16.mxu0 %v7591_v49 }
0x2a81   :  { %6949 = vmatpush3.bf16.msra.mxu0 %v7592_v44 }
0x2a82   :  { %6950 = vmatprep.subr.bf16.mxu0 %v7593_v51 }
0x2a85   :  { %6951 = vmatpush3.bf16.msra.mxu0 %v7594_v25 }
0x2a86   :  { %6952 = vmatprep.subr.bf16.mxu0 %v7595_v50 }
0x2b30   :  { %v5493_v12 = vpop.f32.mrf.mxu0 }
0x2b31   :  { %v5494_v55 = vadd.f32 %v5493_v12, %v5431_v52  ;;  %v7597_v12 = vld [vmem:[%s9398_s6 + $0x240] sm:$0xff]  }
0x2b32   :  { %v7268_v16 = vpop.f32.mrf.mxu0 }
0x2b33   :  { %v9245_v57 = vadd.f32 %v5494_v55, %v8977_v27  ;;  %v7598_v55 = vld [vmem:[%s9398_s6 + $0x200] sm:$0xff]   ;;  %v5553_v16 = vrot.slane %v9110_v11, %v8333_v28 }
0x2b34   :  { %v5496_v58 = vpop.f32.mrf.mxu0 }
0x2b35   :  { %v5497_v39 = vadd.f32 %v5496_v58, %v5431_v52  ;;  %v5502_v0 = vsel %vm776_vm0, %v9245_v57, 0.0  ;;  %v7596_v52 = vld [vmem:[%s9398_s6 + $0x208] sm:$0xff]   ;;  %v5557_v58 = vrot.slane %v9132_v8, %v8333_v28 }
0x2b36   :  { %5503 = vadd.xlane.f32.xlu0 %v5502_v0  ;;  %v7269_v2 = vpop.f32.mrf.mxu0  ;;  %6953 = vmatpush3.bf16.msra.mxu0 %v7596_v52 }
0x2b37   :  { %v9250_v3 = vadd.f32 %v5497_v39, %v9076_v62  ;;  %6954 = vmatprep.subr.bf16.mxu0 %v7597_v12 }
0x2b39   :  { %v5505_v4 = vsel %vm776_vm0, %v9250_v3, 0.0 }
0x2b3a   :  { %5506 = vadd.xlane.f32.xlu1 %v5505_v4  ;;  %6955 = vmatpush3.bf16.msra.mxu0 %v7598_v55 }
0x2bbf   :  { %v5504_v33 = vpop.xlane.xlu0 %5503 }
0x2bc0   :  { %v5508_v9 = vmul.f32 0.015625, %v5504_v33 }
0x2bc2   :  { %v5510_v40 = vsub.f32 %v9245_v57, %v5508_v9 }
0x2bc3   :  { %v5507_v27 = vpop.xlane.xlu1 %5506 }
0x2bc4   :  { %v5509_v20 = vmul.f32 0.015625, %v5507_v27  ;;  %v5512_v10 = vmul.f32 %v5510_v40, %v5510_v40 }
0x2bc6   :  { %v5511_v13 = vsub.f32 %v9250_v3, %v5509_v20  ;;  %v5514_v14 = vsel %vm776_vm0, %v5512_v10, 0.0 }
0x2bc7   :  { %5515 = vadd.xlane.f32.xlu0 %v5514_v14 }
0x2bc8   :  { %v5513_v15 = vmul.f32 %v5511_v13, %v5511_v13 }
0x2bca   :  { %v5517_v62 = vsel %vm776_vm0, %v5513_v15, 0.0 }
0x2bcb   :  { %5518 = vadd.xlane.f32.xlu0 %v5517_v62 }
0x2c50   :  { %v5516_v46 = vpop.xlane.xlu0 %5515 }
0x2c51   :  { %v5520_v24 = vmul.f32 0.015625, %v5516_v46 }
0x2c53   :  { %v5522_v26 = vadd.f32 1e-05, %v5520_v24 }
0x2c54   :  { %v5519_v18 = vpop.xlane.xlu0 %5518 }
0x2c55   :  { %7735 = vrsqrt.f32 %v5522_v26  ;;  %v5521_v29 = vmul.f32 0.015625, %v5519_v18 }
0x2c57   :  { %v5523_v35 = vadd.f32 1e-05, %v5521_v29 }
0x2c59   :  { %7737 = vrsqrt.f32 %v5523_v35 }
0x2c62   :  { %v7736_v32 = vpop.eup %7735 }
0x2c63   :  { %v5526_v36 = vmul.f32 %v7736_v32, %v5510_v40 }
0x2c65   :  { %v5532_v37 = vmul.f32 %v5531_v5, %v5526_v36 }
0x2c66   :  { %v7738_v56 = vpop.eup %7737 }
0x2c67   :  { %v5527_v34 = vmul.f32 %v7738_v56, %v5511_v13  ;;  %v5538_v30 = vadd.f32 %v5537_v41, %v5532_v37 }
0x2c69   :  { %v5533_v6 = vmul.f32 %v5531_v5, %v5527_v34 }
0x2c6b   :  { %v5539_v43 = vadd.f32 %v5537_v41, %v5533_v6 }
0x2c6d   :  { %v5540_v45 = vpack.c.bf16 %v5539_v43, %v5538_v30 }
0x2c6f   :  { %6599 = vmatmul.mubr.msk.bf16.vlgmr.msra.gmra.mxu1 %vm776_vm0, %v5540_v45 }
0x2c70   :  { %7274 = vmatprep.mubr.msk.f32.mxu1 %vm7782_vm1, %v7781_v17 }
0x2d2f   :  { %v5635_v39 = vpop.f32.mrf.mxu1 }
0x2d30   :  { %v5636_v0 = vadd.f32 %v5635_v39, %v5553_v16 }
0x2d31   :  { %v5637_v2 = vpop.f32.mrf.mxu1 }
0x2d32   :  { %v5644_v4 = vmul.f32 %v5636_v0, %v5636_v0  ;;  %v5638_v33 = vadd.f32 %v5637_v2, %v5557_v58 }
0x2d33   :  { %v5639_v9 = vpop.f32.mrf.mxu1 }
0x2d34   :  { %v5648_v40 = vmul.f32 %v5644_v4, %v5636_v0  ;;  %v5645_v27 = vmul.f32 %v5638_v33, %v5638_v33  ;;  %v5640_v20 = vadd.f32 %v5639_v9, %v5553_v16 }
0x2d35   :  { %v5641_v10 = vpop.f32.mrf.mxu1 }
0x2d36   :  { %v5652_v13 = vmul.f32 0.044715, %v5648_v40  ;;  %v5649_v14 = vmul.f32 %v5645_v27, %v5638_v33  ;;  %v5646_v15 = vmul.f32 %v5640_v20, %v5640_v20  ;;  %v5642_v62 = vadd.f32 %v5641_v10, %v5557_v58 }
0x2d38   :  { %v5656_v7 = vadd.f32 %v5652_v13, %v5636_v0  ;;  %v5653_v19 = vmul.f32 0.044715, %v5649_v14  ;;  %v5650_v21 = vmul.f32 %v5646_v15, %v5640_v20  ;;  %v5647_v23 = vmul.f32 %v5642_v62, %v5642_v62 }
0x2d3a   :  { %v5660_v54 = vmul.f32 0.7978846, %v5656_v7  ;;  %v5657_v28 = vadd.f32 %v5653_v19, %v5638_v33  ;;  %v5654_v8 = vmul.f32 0.044715, %v5650_v21  ;;  %v5651_v22 = vmul.f32 %v5647_v23, %v5642_v62  ;;  %v6648_v19 = vld [vmem:[%s9401_s9] ss:$0 sm:$0xff] }
0x2d3c   :  { %v5661_v1 = vmul.f32 0.7978846, %v5657_v28  ;;  %v5658_v60 = vadd.f32 %v5654_v8, %v5640_v20  ;;  %v5655_v46 = vmul.f32 0.044715, %v5651_v22  ;;  %7739 = vtanh.f32 %v5660_v54  ;;  %v6649_v28 = vld [vmem:[%s9401_s9 + $0x1] ss:$0 sm:$0xff] }
0x2d3e   :  { %7741 = vtanh.f32 %v5661_v1  ;;  %v5662_v24 = vmul.f32 0.7978846, %v5658_v60  ;;  %v5659_v26 = vadd.f32 %v5655_v46, %v5642_v62  ;;  %v6180_v1 = vld [vmem:[%s9400_s8 + $0x30] sm:$0x3] }
0x2d40   :  { %7743 = vtanh.f32 %v5662_v24  ;;  %v5663_v18 = vmul.f32 0.7978846, %v5659_v26 }
0x2d42   :  { %7745 = vtanh.f32 %v5663_v18 }
0x2d49   :  { %v7740_v29 = vpop.eup %7739 }
0x2d4a   :  { %v5668_v36 = vadd.f32 1.0, %v7740_v29 }
0x2d4b   :  { %v7742_v35 = vpop.eup %7741 }
0x2d4c   :  { %v5669_v32 = vadd.f32 1.0, %v7742_v35  ;;  %v5672_v30 = vmul.f32 0.5, %v5668_v36  ;;  %v7600_v36 = vld [vmem:[%s9402_s10 + $0x10] sm:$0xff]  }
0x2d4d   :  { %v7744_v5 = vpop.eup %7743 }
0x2d4e   :  { %v5670_v56 = vadd.f32 1.0, %v7744_v5  ;;  %v5673_v6 = vmul.f32 0.5, %v5669_v32  ;;  %v5676_v61 = vmul.f32 %v5672_v30, %v5636_v0  ;;  %v7599_v5 = vld [vmem:[%s9402_s10 + $0x18] sm:$0xff]  }
0x2d4f   :  { %v7746_v37 = vpop.eup %7745 }
0x2d50   :  { %v5674_v34 = vmul.f32 0.5, %v5670_v56  ;;  %v5671_v41 = vadd.f32 1.0, %v7746_v37  ;;  %v5677_v59 = vmul.f32 %v5673_v6, %v5638_v33  ;;  %v7601_v56 = vld [vmem:[%s9402_s10 + $0x8] sm:$0xff]   ;;  %v7602_v37 = vld [vmem:[%s9402_s10] sm:$0xff]  }
0x2d52   :  { %v5675_v43 = vmul.f32 0.5, %v5671_v41  ;;  %v5678_v45 = vmul.f32 %v5674_v34, %v5640_v20 }
0x2d54   :  { %v5679_v53 = vmul.f32 %v5675_v43, %v5642_v62  ;;  %v5680_v31 = vpack.c.bf16 %v5678_v45, %v5676_v61  ;;  %v6651_v43 = vld [vmem:[%s9401_s9 + $0x2] ss:$0 sm:$0xff] }
0x2d56   :  { %v5681_v47 = vpack.c.bf16 %v5679_v53, %v5677_v59  ;;  %v6652_v59 = vld [vmem:[%s9401_s9 + $0x3] ss:$0 sm:$0xff] }
0x2d58   :  { %5847 = vmatprep.mubr.bf16.mxu0 %v5681_v47 }
0x2d59   :  { %5848 = vmatmul.mubr.bf16.vlgmr.msra.gmra.mxu0 %v5680_v31 }
0x2e19   :  { %v6956_v48 = vpop.f32.mrf.mxu0 }
0x2e1b   :  { %v6957_v38 = vpop.f32.mrf.mxu0 }
0x2e1c   :  { %v6958_v49 = vadd.f32 %v6957_v38, %v6956_v48 }
0x2e1d   :  { %v6959_v44 = vpop.f32.mrf.mxu0 }
0x2e1e   :  { %v5850_v51 = vadd.f32 %v6958_v49, %v5718_v42 }
0x2e1f   :  { %v6960_v25 = vpop.f32.mrf.mxu0 }
0x2e20   :  { %v6961_v50 = vadd.f32 %v6960_v25, %v6959_v44  ;;  %v5856_v52 = vadd.f32 %v5850_v51, %v9245_v57 }
0x2e22   :  { %v5853_v12 = vadd.f32 %v6961_v50, %v5718_v42  ;;  %v5863_v55 = vsel %vm776_vm0, %v5856_v52, 0.0 }
0x2e23   :  { %5864 = vadd.xlane.f32.xlu0 %v5863_v55 }
0x2e24   :  { %v5857_v16 = vadd.f32 %v5853_v12, %v9250_v3 }
0x2e26   :  { %v5866_v58 = vsel %vm776_vm0, %v5857_v16, 0.0 }
0x2e27   :  { %5867 = vadd.xlane.f32.xlu1 %v5866_v58 }
0x2eac   :  { %v5865_v39 = vpop.xlane.xlu0 %5864 }
0x2ead   :  { %v5869_v0 = vmul.f32 0.015625, %v5865_v39 }
0x2eaf   :  { %v5871_v63 = vsub.f32 %v5856_v52, %v5869_v0 }
0x2eb0   :  { %v5868_v11 = vpop.xlane.xlu1 %5867 }
0x2eb1   :  { %v5870_v2 = vmul.f32 0.015625, %v5868_v11  ;;  %v5873_v4 = vmul.f32 %v5871_v63, %v5871_v63 }
0x2eb3   :  { %v5872_v33 = vsub.f32 %v5857_v16, %v5870_v2  ;;  %v5875_v9 = vsel %vm776_vm0, %v5873_v4, 0.0 }
0x2eb4   :  { %5876 = vadd.xlane.f32.xlu0 %v5875_v9 }
0x2eb5   :  { %v5874_v57 = vmul.f32 %v5872_v33, %v5872_v33 }
0x2eb7   :  { %v5878_v40 = vsel %vm776_vm0, %v5874_v57, 0.0 }
0x2eb8   :  { %5879 = vadd.xlane.f32.xlu1 %v5878_v40 }
0x2f3d   :  { %v5877_v27 = vpop.xlane.xlu0 %5876 }
0x2f3e   :  { %v5881_v20 = vmul.f32 0.015625, %v5877_v27 }
0x2f40   :  { %v5883_v3 = vadd.f32 1e-05, %v5881_v20 }
0x2f41   :  { %v5880_v10 = vpop.xlane.xlu1 %5879 }
0x2f42   :  { %7747 = vrsqrt.f32 %v5883_v3  ;;  %v5882_v13 = vmul.f32 0.015625, %v5880_v10 }
0x2f44   :  { %v5884_v14 = vadd.f32 1e-05, %v5882_v13 }
0x2f46   :  { %7749 = vrsqrt.f32 %v5884_v14 }
0x2f4f   :  { %v7748_v15 = vpop.eup %7747 }
0x2f50   :  { %v5887_v62 = vmul.f32 %v7748_v15, %v5871_v63 }
0x2f52   :  { %v5893_v54 = vmul.f32 %v6648_v19, %v5887_v62 }
0x2f53   :  { %v7750_v7 = vpop.eup %7749 }
0x2f54   :  { %v5888_v21 = vmul.f32 %v7750_v7, %v5872_v33  ;;  %v5899_v22 = vadd.f32 %v6649_v28, %v5893_v54 }
0x2f56   :  { %v5894_v23 = vmul.f32 %v6648_v19, %v5888_v21 }
0x2f58   :  { %v5900_v8 = vadd.f32 %v6649_v28, %v5894_v23 }
0x2f5a   :  { %7271 = vmatpush3.msra.mxu1 %v5900_v8 }
0x2f5b   :  { %7272 = vmatprep.subr.mxu1 %v7781_v17 }
0x2f5c   :  { %7273 = vmatpush3.msra.mxu1 %v5899_v22 }
0x2f5d   :  { %7275 = vmatmul.mubr.msk.f32.vlgmr.msra.gmra.mxu1 %vm907_vm2, %v6180_v1  ;;  %7277 = vmatprep.subr.bf16.mxu1 %v7781_v17 }
0x2f5e   :  { %7285 = vmatprep.mubr.msk.bf16.mxu1 %vm7782_vm1, %v7781_v17  ;;  %7278 = vmatpush3.bf16.msra.mxu1 %v7599_v5 }
0x2f5f   :  { %7279 = vmatprep.subr.bf16.mxu1 %v7781_v17 }
0x2f62   :  { %7280 = vmatpush3.bf16.msra.mxu1 %v7600_v36 }
0x2f63   :  { %7281 = vmatprep.subr.bf16.mxu1 %v7781_v17 }
0x2f66   :  { %7282 = vmatpush3.bf16.msra.mxu1 %v7601_v56 }
0x2f67   :  { %7283 = vmatprep.subr.bf16.mxu1 %v7781_v17  ;;  %v6653_v17 = vld [vmem:[%s9401_s9 + $0x4] ss:$0 sm:$0xff]  ;;  %s7758_s9 = scalar_lea.vmem %s6098_s28, 32 }
0x2f68   :  { %p7759_p0 = scmp.ne.s32.totalorder %s6098_s28, %s7758_s9  ;;  %p7764_p2 = scmp.lt.s32.totalorder %s7758_s9, %s7758_s9 }
0x2f6a   :  { %7284 = vmatpush3.bf16.msra.mxu1 %v7602_v37  ;;  %p7765_p3 = por %p7764_p2, %p7763_p1 }
0x2f6c   :  { %p7766_p4 = pnand %p7765_p3, %p7759_p0 }
0x301d   :  { %v5970_v60 = vpop.f32.mrf.mxu1 }
0x301e   :  { %v5975_v46 = vsel %vm5974_vm7, %v5970_v60, 0.0 }
0x301f   :  { %5976 = vadd.xlane.f32.xlu1 %v5975_v46  ;;  %v7276_v24 = vpop.f32.mrf.mxu1 }
0x30a8   :  { %v5977_v26 = vpop.xlane.xlu1 %5976 }
0x30a9   :  { %v5978_v18 = vmul.f32 0.015625, %v5977_v26 }
0x30ab   :  { %v5979_v29 = vsub.f32 %v5970_v60, %v5978_v18 }
0x30ad   :  { %v5980_v35 = vmul.f32 %v5979_v29, %v5979_v29 }
0x30af   :  { %v5981_v32 = vsel %vm5974_vm7, %v5980_v35, 0.0 }
0x30b0   :  { %5982 = vadd.xlane.f32.xlu0 %v5981_v32 }
0x3139   :  { %v5983_v34 = vpop.xlane.xlu0 %5982 }
0x313a   :  { %v5984_v41 = vmul.f32 0.015625, %v5983_v34 }
0x313c   :  { %v5985_v6 = vadd.f32 1e-05, %v5984_v41 }
0x313e   :  { %7751 = vrsqrt.f32 %v5985_v6 }
0x314b   :  { %v7752_v30 = vpop.eup %7751 }
0x314c   :  { %v5987_v45 = vmul.f32 %v7752_v30, %v5979_v29 }
0x314e   :  { %v5992_v53 = vmul.f32 %v6651_v43, %v5987_v45 }
0x3150   :  { %v5997_v61 = vadd.f32 %v6652_v59, %v5992_v53 }
0x3152   :  { %v5998_v47 = vpack.c.bf16 %v5997_v61, %v5997_v61 }
0x3154   :  { %7286 = vmatmul.mubr.msk.bf16.vlgmr.msra.gmra.mxu1 %vm776_vm0, %v5998_v47 }
0x3214   :  { %v6072_v31 = vpop.f32.mrf.mxu1 }
0x3215   :  { %v6073_v48 = vadd.f32 %v6653_v17, %v6072_v31 }
0x3216   :  { %v7287_v42 = vpop.f32.mrf.mxu1 }
0x3217   :  { %v6079_v38 = vsel %vm6078_vm8, %v6073_v48, -inf }
0x3218   :  { %6080 = vmax.xlane.f32.xlu1 %v6079_v38  ;;  %v6075_v49 = vpop.f32.mrf.mxu1 }
0x321a   :  { %v7288_v44 = vpop.f32.mrf.mxu1 }
0x32a1   :  { %v6081_v51 = vpop.xlane.xlu1 %6080 }
0x32a2   :  { %v6082_v25 = vsub.f32 %v6073_v48, %v6081_v51 }
0x32a4   :  { %v6083_v50 = vmul.f32 1.442695, %v6082_v25 }
0x32a6   :  { %7753 = vpow2.f32 %v6083_v50 }
0x32b3   :  { %v7754_v52 = vpop.eup %7753 }
0x32b4   :  { %v6085_v12 = vsel %vm6078_vm8, %v7754_v52, 0.0 }
0x32b5   :  { %6086 = vadd.xlane.f32.xlu0 %v6085_v12 }
0x333e   :  { %v6087_v55 = vpop.xlane.xlu0 %6086 }
0x333f   :  { %7755 = vrcp.f32 %v6087_v55 }
0x334c   :  { %v7756_v16 = vpop.eup %7755 }
0x334d   :  { %v6089_v58 = vmul.f32 %v7756_v16, %v7754_v52 }
0x334f   :  { %6090 = vst [vmem:[#allocation2] sm:$0x3] %v6089_v58 }
0x3350   :  { %7769 = shalt.err (!%p7766_p4)
}
0x3351   :  { %6100 = dma.vmem_to_hbm [thread:$0]  %s6098_s28, 32, %s9403_s11, [#allocation3]  }
0x3352   :  { %7778 = dma.done.wait [#allocation3], 32  }
0x3353   :  { %7779 = vsyncadd [#allocation3], 4294967264 }
0x3354   :  { %6104 = vsyncpa [#allocation3], 1 }

</bundles_post_ra>
